<compile_context>
chip_gen: v5e
topology: v5e:2x2
jax: 0.10.0
libtpu: 0.0.40
codegen_flags: <defaults>
</compile_context>

<pallas_src>
import functools

import jax
import jax.numpy as jnp
from jax import lax
from jax.experimental import pallas as pl
from jax.experimental.pallas import tpu as pltpu

# Synthetic stand-in for the rescale_with_baseline constants of
# distilbert-base-uncased / layer 5 (real ones are loaded from a baseline file).
_BASELINE_P = 0.85
_BASELINE_R = 0.85
_BASELINE_F = 0.85
_INV_P = 1.0 / (1.0 - _BASELINE_P)
_INV_R = 1.0 / (1.0 - _BASELINE_R)
_INV_F = 1.0 / (1.0 - _BASELINE_F)

_OUT_LANES = 128  # lane-dense output slab; P/R/F live in lanes 0/1/2


def _bertscore_kernel(lens_ref, emb_ref, w_ref, out_ref, *, btile, seq_len):
    """One grid step scores BTILE (candidate, reference) pairs.

    lens_ref: (2, btile, L) int32  — row i of plane 0/1 is hyp_len[i]/ref_len[i]
                                     replicated across L lanes.
    emb_ref : (2, btile, L, D) bf16 — plane 0 = hyp embeddings, plane 1 = ref.
    w_ref   : (D, D) bf16           — grid-invariant projection weights.
    out_ref : (btile, 128) f32      — P/R/F in lanes 0/1/2.
    """
    L = seq_len
    D = emb_ref.shape[-1]

    # ---- masks: two vectorized compares (no per-row scalar/select chains) ---
    pos = lax.broadcasted_iota(jnp.int32, (btile, L), 1)
    hm = (pos < lens_ref[0]).astype(jnp.float32)     # (btile, L) candidate mask
    rm = (pos < lens_ref[1]).astype(jnp.float32)     # (btile, L) reference mask

    # ---- fused "encoder" projection: hyp+ref in ONE bf16 MXU matmul ---------
    # TODO(synk): the pretrained DistilBERT transformer stack has no in-script
    # Pallas equivalent; a deterministic projection + tanh stands in for its
    # layer-5 contextualized output.
    x = emb_ref[...].reshape(2 * btile * L, D)       # bf16, copy-free flatten
    proj = jnp.tanh(jnp.dot(x, w_ref[...], preferred_element_type=jnp.float32))

    # L2-normalize token embeddings along the hidden dim (cosine similarity),
    # then drop to bf16 for the similarity matmul (unit-norm, bf16-safe).
    proj = proj * lax.rsqrt(jnp.sum(proj * proj, axis=-1, keepdims=True) + 1e-12)
    proj = proj.astype(jnp.bfloat16)
    hyp_n = proj[:btile * L].reshape(btile, L, D)
    ref_n = proj[btile * L:].reshape(btile, L, D)

    # Pairwise cosine similarity per pair; zero padded positions before the max
    # (matches bert_score's own masking behavior).
    sim = jnp.einsum('bld,bmd->blm', hyp_n, ref_n,
                     preferred_element_type=jnp.float32)     # (btile, L, L)
    sim = sim * (hm[:, :, None] * rm[:, None, :])

    # Greedy matching + masked (uniform-weight, idf=False) means.
    # TODO(synk): bert_score also zero-weights [CLS]/[SEP]; synthetic tokens
    # carry no special-token ids, so all valid tokens are weighted equally.
    word_p = jnp.max(sim, axis=2)                # (btile, L) best ref per cand tok
    word_r = jnp.max(sim, axis=1)                # (btile, L) best cand per ref tok
    nh = jnp.maximum(jnp.sum(hm, axis=1, keepdims=True), 1.0)   # NaN-safe denom
    nr = jnp.maximum(jnp.sum(rm, axis=1, keepdims=True), 1.0)
    P = jnp.sum(word_p * hm, axis=1, keepdims=True) * pl.reciprocal(nh, approx=True)
    R = jnp.sum(word_r * rm, axis=1, keepdims=True) * pl.reciprocal(nr, approx=True)
    F = 2.0 * P * R * pl.reciprocal(P + R + 1e-8, approx=True)

    # Rescale with baseline, constant-folded to a multiply-add.
    Pr = (P - _BASELINE_P) * _INV_P              # (btile, 1)
    Rr = (R - _BASELINE_R) * _INV_R
    Fr = (F - _BASELINE_F) * _INV_F

    # Lane-dense output: one unmasked (btile, 128) store per grid step.
    lane = lax.broadcasted_iota(jnp.int32, (btile, _OUT_LANES), 1)
    out_ref[...] = jnp.where(lane == 0, Pr,
                   jnp.where(lane == 1, Rr,
                   jnp.where(lane == 2, Fr, 0.0)))


def bert_score_pallas(hyp_emb, ref_emb, hyp_lens, ref_lens, w, *, btile=32):
    """hyp_emb/ref_emb: (B, L, D); hyp_lens/ref_lens: (B,) int32; w: (D, D)."""
    B, L, D = hyp_emb.shape
    assert B % btile == 0, "B must be a multiple of btile"
    assert btile % 8 == 0, "btile must be a multiple of 8 (TPU (8,128) tiling)"
    nblk = B // btile

    # Wrapper-side packing (one-time XLA ops, hoisted out of the grid loop):
    #   * hyp/ref stacked into one (2, B, L, D) bf16 slab -> single DMA stream.
    #   * lengths replicated lane-dense into (2, B, L) int32 for in-kernel
    #     broadcasted compares (no scalar-prefetch select chains).
    emb_all = jnp.stack([hyp_emb, ref_emb], axis=0).astype(jnp.bfloat16)
    lens_all = jnp.stack(
        [jnp.broadcast_to(hyp_lens[:, None], (B, L)),
         jnp.broadcast_to(ref_lens[:, None], (B, L))], axis=0).astype(jnp.int32)

    lens_spec = pl.BlockSpec((2, btile, L), lambda b: (0, b, 0))
    emb_spec = pl.BlockSpec((2, btile, L, D), lambda b: (0, b, 0, 0))
    w_spec = pl.BlockSpec((D, D), lambda b: (0, 0))          # grid-invariant
    out_spec = pl.BlockSpec((btile, _OUT_LANES), lambda b: (b, 0))

    grid_spec = pltpu.PrefetchScalarGridSpec(
        num_scalar_prefetch=0,
        grid=(nblk,),
        in_specs=[lens_spec, emb_spec, w_spec],
        out_specs=out_spec,
    )

    out = pl.pallas_call(
        functools.partial(_bertscore_kernel, btile=btile, seq_len=L),
        grid_spec=grid_spec,
        out_shape=jax.ShapeDtypeStruct((B, _OUT_LANES), jnp.float32),
        compiler_params=pltpu.CompilerParams(
            dimension_semantics=("parallel",),      # shards blocks across TCs
            vmem_limit_bytes=32 * 1024 * 1024,      # safe on v5e/v6e/v7x at these tiles
        ),
    )(lens_all, emb_all, w.astype(jnp.bfloat16))
    return out[:, 0], out[:, 1], out[:, 2]


def bert_score_forward(ref_ids, hyp_ids, ref_lens, hyp_lens, emb_table, w):
    """Mirrors BertScore.forward(refs, hyps) -> (mean(f), f)."""
    # Glue: embedding lookup (stands in for tokenizer + embedding layer).
    ref_emb = emb_table[ref_ids].astype(jnp.bfloat16)   # (B, L, D) bf16 -> half HBM bytes
    hyp_emb = emb_table[hyp_ids].astype(jnp.bfloat16)
    p, r, f = bert_score_pallas(hyp_emb, ref_emb, hyp_lens, ref_lens,
                                w.astype(jnp.bfloat16))
    return jnp.mean(f), f


def _bert_score_ref(ref_ids, hyp_ids, ref_lens, hyp_lens, emb_table, w):
    """Pure-JAX reference mirroring the kernel numerics (bf16 matmul inputs)."""
    L = ref_ids.shape[1]
    pos = jnp.arange(L)[None, :]
    hm = (pos < hyp_lens[:, None]).astype(jnp.float32)
    rm = (pos < ref_lens[:, None]).astype(jnp.float32)
    hyp = emb_table[hyp_ids].astype(jnp.bfloat16)
    ref = emb_table[ref_ids].astype(jnp.bfloat16)
    wb = w.astype(jnp.bfloat16)

    def proj(x):
        y = jnp.tanh(jnp.einsum('bld,de->ble', x, wb,
                                preferred_element_type=jnp.float32))
        y = y * lax.rsqrt(jnp.sum(y * y, axis=-1, keepdims=True) + 1e-12)
        return y.astype(jnp.bfloat16)

    hyp_n, ref_n = proj(hyp), proj(ref)
    sim = jnp.einsum('bld,bmd->blm', hyp_n, ref_n,
                     preferred_element_type=jnp.float32)
    sim = sim * (hm[:, :, None] * rm[:, None, :])
    P = jnp.sum(jnp.max(sim, 2) * hm, 1) / jnp.maximum(jnp.sum(hm, 1), 1.0)
    R = jnp.sum(jnp.max(sim, 1) * rm, 1) / jnp.maximum(jnp.sum(rm, 1), 1.0)
    F = 2.0 * P * R / (P + R + 1e-8)
    return (F - _BASELINE_F) * _INV_F


if __name__ == "__main__":
    # B matches the module's batch_size=64; BTILE=32 -> grid of 2 (both v7x TCs
    # busy) and a fused-projection M dim of 2*32*8 = 512 (multiple of 256).
    B, L, D, VOCAB, BTILE = 64, 8, 128, 100, 32
    key = jax.random.PRNGKey(0)
    k_emb, k_w, k_ref, k_hyp, k_rl, k_hl = jax.random.split(key, 6)

    # Deterministic synthetic parameters.
    emb_table = jax.random.normal(k_emb, (VOCAB, D), dtype=jnp.float32) * 0.1
    w = jax.random.normal(k_w, (D, D), dtype=jnp.float32) * 0.2

    # Deterministic synthetic "sentences": token ids + valid-token lengths.
    ref_ids = jax.random.randint(k_ref, (B, L), 0, VOCAB, dtype=jnp.int32)
    hyp_ids = jax.random.randint(k_hyp, (B, L), 0, VOCAB, dtype=jnp.int32)
    ref_lens = jax.random.randint(k_rl, (B,), 1, L + 1, dtype=jnp.int32)
    hyp_lens = jax.random.randint(k_hl, (B,), 1, L + 1, dtype=jnp.int32)

    mean_f, f = bert_score_forward(ref_ids, hyp_ids, ref_lens, hyp_lens,
                                   emb_table, w)
    mean_f = jax.block_until_ready(mean_f)
    f = jax.block_until_ready(f)

    # Loose sanity check against a pure-JAX reference (bf16 MXU + approx
    # reciprocal introduce small deviations).
    f_ref = _bert_score_ref(ref_ids, hyp_ids, ref_lens, hyp_lens, emb_table, w)
    assert jnp.allclose(f, f_ref, atol=0.1, rtol=0.05), (f, f_ref)

    # Same return convention as the PyTorch module: (float mean, python list).
    result = (float(mean_f), [float(x) for x in f])
    assert len(result[1]) == B
    print("KERNEL_OK")
</pallas_src>

<mosaic_0001>
module attributes {stable_mosaic.version = 11 : i64} {
  func.func @_bertscore_kernel(%arg0: i32, %arg1: memref<2x32x8xi32, #tpu.memory_space<vmem>>, %arg2: memref<2x32x8x128xbf16, #tpu.memory_space<vmem>>, %arg3: memref<128x128xbf16, #tpu.memory_space<vmem>>, %arg4: memref<32x128xf32, #tpu.memory_space<vmem>>) attributes {dimension_semantics = [#tpu.dimension_semantics<parallel>], iteration_bounds = array<i64: 2>, scalar_prefetch = 0 : i64, scratch_operands = 0 : i64, tpu.core_type = #tpu.core_type<tc>, window_params = [{transform_indices = @transform_0, window_bounds = array<i64: 2, 32, 8>}, {transform_indices = @transform_1, window_bounds = array<i64: 2, 32, 8, 128>}, {pipeline_mode = #tpu.pipeline_mode<synchronous>, transform_indices = @transform_2, window_bounds = array<i64: 128, 128>}, {transform_indices = @transform_3, window_bounds = array<i64: 32, 128>}]} {
    %0 = tpu.iota {dimensions = array<i32: 1>} : vector<32x8xi32>
    %c0 = arith.constant 0 : index
    %c0_0 = arith.constant 0 : index
    %c0_1 = arith.constant 0 : index
    %1 = vector.load %arg1[%c0, %c0_0, %c0_1] : memref<2x32x8xi32, #tpu.memory_space<vmem>>, vector<1x32x8xi32>
    %2 = vector.shape_cast %1 : vector<1x32x8xi32> to vector<32x8xi32>
    %3 = arith.cmpi slt, %0, %2 : vector<32x8xi32>
    %4 = arith.extui %3 : vector<32x8xi1> to vector<32x8xi32>
    %5 = arith.sitofp %4 : vector<32x8xi32> to vector<32x8xf32>
    %c1 = arith.constant 1 : index
    %c0_2 = arith.constant 0 : index
    %c0_3 = arith.constant 0 : index
    %6 = vector.load %arg1[%c1, %c0_2, %c0_3] : memref<2x32x8xi32, #tpu.memory_space<vmem>>, vector<1x32x8xi32>
    %7 = vector.shape_cast %6 : vector<1x32x8xi32> to vector<32x8xi32>
    %8 = arith.cmpi slt, %0, %7 : vector<32x8xi32>
    %9 = arith.extui %8 : vector<32x8xi1> to vector<32x8xi32>
    %10 = arith.sitofp %9 : vector<32x8xi32> to vector<32x8xf32>
    %c0_4 = arith.constant 0 : index
    %c0_5 = arith.constant 0 : index
    %c0_6 = arith.constant 0 : index
    %c0_7 = arith.constant 0 : index
    %11 = vector.load %arg2[%c0_4, %c0_5, %c0_6, %c0_7] : memref<2x32x8x128xbf16, #tpu.memory_space<vmem>>, vector<2x32x8x128xbf16>
    %12 = vector.shape_cast %11 : vector<2x32x8x128xbf16> to vector<512x128xbf16>
    %c0_8 = arith.constant 0 : index
    %c0_9 = arith.constant 0 : index
    %13 = vector.load %arg3[%c0_8, %c0_9] : memref<128x128xbf16, #tpu.memory_space<vmem>>, vector<128x128xbf16>
    %cst = arith.constant dense<0.000000e+00> : vector<512x128xf32>
    %14 = tpu.matmul %12, %13, %cst {dimension_numbers = #tpu.dot_dimension_numbers<[1], [0], [0], [1], [0, 0, 1, 1], [], []>} : vector<512x128xbf16>, vector<128x128xbf16>, vector<512x128xf32> -> vector<512x128xf32>
    %15 = math.tanh %14 : vector<512x128xf32>
    %16 = arith.mulf %15, %15 : vector<512x128xf32>
    %cst_10 = arith.constant dense<0.000000e+00> : vector<512xf32>
    %17 = vector.multi_reduction <add>, %16, %cst_10 [1] : vector<512x128xf32> to vector<512xf32>
    %18 = vector.shape_cast %17 : vector<512xf32> to vector<512x1xf32>
    %cst_11 = arith.constant 9.99999996E-13 : f32
    %19 = vector.broadcast %cst_11 : f32 to vector<512x1xf32>
    %20 = arith.addf %18, %19 : vector<512x1xf32>
    %21 = math.rsqrt %20 : vector<512x1xf32>
    %22 = vector.broadcast %21 : vector<512x1xf32> to vector<512x128xf32>
    %23 = arith.mulf %15, %22 : vector<512x128xf32>
    %24 = arith.truncf %23 : vector<512x128xf32> to vector<512x128xbf16>
    %25 = vector.extract_strided_slice %24 {offsets = [0, 0], sizes = [256, 128], strides = [1, 1]} : vector<512x128xbf16> to vector<256x128xbf16>
    %26 = vector.shape_cast %25 : vector<256x128xbf16> to vector<32x8x128xbf16>
    %27 = vector.extract_strided_slice %24 {offsets = [256, 0], sizes = [256, 128], strides = [1, 1]} : vector<512x128xbf16> to vector<256x128xbf16>
    %28 = vector.shape_cast %27 : vector<256x128xbf16> to vector<32x8x128xbf16>
    "tpu.trace_start"() <{level = 10 : i32, message = "bld,bmd->blm"}> : () -> ()
    %cst_12 = arith.constant dense<0.000000e+00> : vector<32x8x8xf32>
    %29 = tpu.matmul %26, %28, %cst_12 {dimension_numbers = #tpu.dot_dimension_numbers<[2], [2], [1], [1], [0, 0, 0, 1, 1, 1], [0], [0]>} : vector<32x8x128xbf16>, vector<32x8x128xbf16>, vector<32x8x8xf32> -> vector<32x8x8xf32>
    "tpu.trace_stop"() : () -> ()
    %30 = vector.shape_cast %5 : vector<32x8xf32> to vector<32x8x1xf32>
    %31 = vector.shape_cast %10 : vector<32x8xf32> to vector<32x1x8xf32>
    %32 = vector.broadcast %30 : vector<32x8x1xf32> to vector<32x8x8xf32>
    %33 = vector.broadcast %31 : vector<32x1x8xf32> to vector<32x8x8xf32>
    %34 = arith.mulf %32, %33 : vector<32x8x8xf32>
    %35 = arith.mulf %29, %34 : vector<32x8x8xf32>
    %cst_13 = arith.constant dense<0xFF800000> : vector<32x8xf32>
    %36 = vector.multi_reduction <maximumf>, %35, %cst_13 [2] : vector<32x8x8xf32> to vector<32x8xf32>
    %cst_14 = arith.constant dense<0xFF800000> : vector<32x8xf32>
    %37 = vector.multi_reduction <maximumf>, %35, %cst_14 [1] : vector<32x8x8xf32> to vector<32x8xf32>
    %cst_15 = arith.constant dense<0.000000e+00> : vector<32xf32>
    %38 = vector.multi_reduction <add>, %5, %cst_15 [1] : vector<32x8xf32> to vector<32xf32>
    %39 = vector.shape_cast %38 : vector<32xf32> to vector<32x1xf32>
    %cst_16 = arith.constant 1.000000e+00 : f32
    %40 = vector.broadcast %cst_16 : f32 to vector<32x1xf32>
    %41 = arith.maximumf %39, %40 : vector<32x1xf32>
    %cst_17 = arith.constant dense<0.000000e+00> : vector<32xf32>
    %42 = vector.multi_reduction <add>, %10, %cst_17 [1] : vector<32x8xf32> to vector<32xf32>
    %43 = vector.shape_cast %42 : vector<32xf32> to vector<32x1xf32>
    %cst_18 = arith.constant 1.000000e+00 : f32
    %44 = vector.broadcast %cst_18 : f32 to vector<32x1xf32>
    %45 = arith.maximumf %43, %44 : vector<32x1xf32>
    %46 = arith.mulf %36, %5 : vector<32x8xf32>
    %cst_19 = arith.constant dense<0.000000e+00> : vector<32xf32>
    %47 = vector.multi_reduction <add>, %46, %cst_19 [1] : vector<32x8xf32> to vector<32xf32>
    %48 = vector.shape_cast %47 : vector<32xf32> to vector<32x1xf32>
    %49 = tpu.reciprocal %41 {approx = true} : vector<32x1xf32> -> vector<32x1xf32>
    %50 = arith.mulf %48, %49 : vector<32x1xf32>
    %51 = arith.mulf %37, %10 : vector<32x8xf32>
    %cst_20 = arith.constant dense<0.000000e+00> : vector<32xf32>
    %52 = vector.multi_reduction <add>, %51, %cst_20 [1] : vector<32x8xf32> to vector<32xf32>
    %53 = vector.shape_cast %52 : vector<32xf32> to vector<32x1xf32>
    %54 = tpu.reciprocal %45 {approx = true} : vector<32x1xf32> -> vector<32x1xf32>
    %55 = arith.mulf %53, %54 : vector<32x1xf32>
    %cst_21 = arith.constant 2.000000e+00 : f32
    %56 = vector.broadcast %cst_21 : f32 to vector<32x1xf32>
    %57 = arith.mulf %56, %50 : vector<32x1xf32>
    %58 = arith.mulf %57, %55 : vector<32x1xf32>
    %59 = arith.addf %50, %55 : vector<32x1xf32>
    %cst_22 = arith.constant 9.99999993E-9 : f32
    %60 = vector.broadcast %cst_22 : f32 to vector<32x1xf32>
    %61 = arith.addf %59, %60 : vector<32x1xf32>
    %62 = tpu.reciprocal %61 {approx = true} : vector<32x1xf32> -> vector<32x1xf32>
    %63 = arith.mulf %58, %62 : vector<32x1xf32>
    %cst_23 = arith.constant 8.500000e-01 : f32
    %64 = vector.broadcast %cst_23 : f32 to vector<32x1xf32>
    %65 = arith.subf %50, %64 : vector<32x1xf32>
    %cst_24 = arith.constant 6.66666651 : f32
    %66 = vector.broadcast %cst_24 : f32 to vector<32x1xf32>
    %67 = arith.mulf %65, %66 : vector<32x1xf32>
    %cst_25 = arith.constant 8.500000e-01 : f32
    %68 = vector.broadcast %cst_25 : f32 to vector<32x1xf32>
    %69 = arith.subf %55, %68 : vector<32x1xf32>
    %cst_26 = arith.constant 6.66666651 : f32
    %70 = vector.broadcast %cst_26 : f32 to vector<32x1xf32>
    %71 = arith.mulf %69, %70 : vector<32x1xf32>
    %cst_27 = arith.constant 8.500000e-01 : f32
    %72 = vector.broadcast %cst_27 : f32 to vector<32x1xf32>
    %73 = arith.subf %63, %72 : vector<32x1xf32>
    %cst_28 = arith.constant 6.66666651 : f32
    %74 = vector.broadcast %cst_28 : f32 to vector<32x1xf32>
    %75 = arith.mulf %73, %74 : vector<32x1xf32>
    %76 = tpu.iota {dimensions = array<i32: 1>} : vector<32x128xi32>
    %c0_i32 = arith.constant 0 : i32
    %77 = vector.broadcast %c0_i32 : i32 to vector<32x128xi32>
    %78 = arith.cmpi eq, %76, %77 : vector<32x128xi32>
    %c1_i32 = arith.constant 1 : i32
    %79 = vector.broadcast %c1_i32 : i32 to vector<32x128xi32>
    %80 = arith.cmpi eq, %76, %79 : vector<32x128xi32>
    %c2_i32 = arith.constant 2 : i32
    %81 = vector.broadcast %c2_i32 : i32 to vector<32x128xi32>
    %82 = arith.cmpi eq, %76, %81 : vector<32x128xi32>
    %cst_29 = arith.constant 0.000000e+00 : f32
    %83 = vector.shape_cast %75 : vector<32x1xf32> to vector<32x1xf32>
    %84 = vector.broadcast %83 : vector<32x1xf32> to vector<32x128xf32>
    %85 = vector.broadcast %cst_29 : f32 to vector<32x128xf32>
    %86 = arith.select %82, %84, %85 : vector<32x128xi1>, vector<32x128xf32>
    %87 = vector.shape_cast %71 : vector<32x1xf32> to vector<32x1xf32>
    %88 = vector.broadcast %87 : vector<32x1xf32> to vector<32x128xf32>
    %89 = arith.select %80, %88, %86 : vector<32x128xi1>, vector<32x128xf32>
    %90 = vector.shape_cast %67 : vector<32x1xf32> to vector<32x1xf32>
    %91 = vector.broadcast %90 : vector<32x1xf32> to vector<32x128xf32>
    %92 = arith.select %78, %91, %89 : vector<32x128xi1>, vector<32x128xf32>
    %c0_30 = arith.constant 0 : index
    %c0_31 = arith.constant 0 : index
    %93 = vector.load %arg4[%c0_30, %c0_31] : memref<32x128xf32, #tpu.memory_space<vmem>>, vector<32x128xf32>
    tpu.vector_store %arg4[%c0_30, %c0_31], %92 {strides = array<i32>} : memref<32x128xf32, #tpu.memory_space<vmem>>, vector<32x128xf32>,
    return
  }
  func.func @transform_0(%arg0: i32) -> (i32, i32, i32) {
    %c0_i32 = arith.constant 0 : i32
    %c0_i32_0 = arith.constant 0 : i32
    %c0_i32_1 = arith.constant 0 : i32
    return %c0_i32, %arg0, %c0_i32_0 : i32, i32, i32
  }
  func.func @transform_1(%arg0: i32) -> (i32, i32, i32, i32) {
    %c0_i32 = arith.constant 0 : i32
    %c0_i32_0 = arith.constant 0 : i32
    %c0_i32_1 = arith.constant 0 : i32
    %c0_i32_2 = arith.constant 0 : i32
    return %c0_i32, %arg0, %c0_i32_0, %c0_i32_1 : i32, i32, i32, i32
  }
  func.func @transform_2(%arg0: i32) -> (i32, i32) {
    %c0_i32 = arith.constant 0 : i32
    %c0_i32_0 = arith.constant 0 : i32
    %c0_i32_1 = arith.constant 0 : i32
    return %c0_i32, %c0_i32_0 : i32, i32
  }
  func.func @transform_3(%arg0: i32) -> (i32, i32) {
    %c0_i32 = arith.constant 0 : i32
    %c0_i32_0 = arith.constant 0 : i32
    return %arg0, %c0_i32 : i32, i32
  }
}

</mosaic_0001>

<bundles_post_ra>
// kernel: tpu_custom_call.1
= control target key start
LH: loop header
LB: loop body
LE: loop exit
PB: predicated region body
PF: predicated region fallthrough
CT: control target
= control target key end

     0   :  { %8 = vsyncpa [#allocation4], 0  ;;  %s7435_s0 = inlined_call_operand.vmem [shape: s32[2,64,8], index: 0, kind: input, shape index: {}]   ;;  %s7436_s1 = inlined_call_operand.hbm [shape: bf16[2,64,8,128], index: 1, kind: input, shape index: {}]   ;;  %s7437_s2 = inlined_call_operand.vmem [shape: bf16[128,128], index: 2, kind: input, shape index: {}]   ;;  %s7438_s3 = inlined_call_operand.hbm [shape: f32[64,128], index: 3, kind: output, shape index: {}]  }
   0x1   :  { %10 = vsyncpa [#allocation4 + $0x1], 0 }
   0x2   :  { %11 = vsyncpa [#allocation5], 0 }
   0x3   :  { %13 = vsyncpa [#allocation5 + $0x1], 0  ;;  %s4771_s12 = smov 0   ;;  %s4773_s13 = smov 0  }
   0x4   :  { %s4775_s14 = smov 0   ;;  %s4777_s15 = smov 0  }
   0x5 LB: > { %s4792_s16 = sadd.s32 4294967295, %s4739_s15   ;;  %s3898_s17 = sadd.s32 4294967294, %s4739_s15   ;;  %s4739_s15 = sphi %s4777_s15, %s7889_s15   ;;  %s4735_s14 = sphi %s4775_s14, %s7888_s14   ;;  %s4731_s13 = sphi %s4773_s13, %s7887_s13   ;;  %s4727_s12 = sphi %s4771_s12, %s7886_s12  }
   0x6   : > { %s4796_s18 = sadd.s32 1, %s4739_s15   ;;  %s26_s19 = sadd.s32 1, %s4735_s14 }
   0x7   : > { %s23_s20 = ssub.s32 %s4739_s15, %s4796_s18  ;;  %p33_p0 = scmp.ne.s32.totalorder %s4735_s14, %s4731_s13 }
   0x8   : > { %p24_p1 = scmp.eq.s32.totalorder %s23_s20, 0  ;;  %p34_p2 = scmp.eq.s32.totalorder %s4739_s15, 0 }
   0x9   : > { %p65_p3 = scmp.ne.s32.totalorder %s4731_s13, %s4727_s12  ;;  %p66_p4 = scmp.eq.s32.totalorder %s4792_s16, 0 }
   0xa   : > { %s4808_s21 = scalar_select %p24_p1, %s4735_s14, %s26_s19  }
   0xb   : > { %p4810_p5 = por %p34_p2, %p33_p0  ;;  %p4814_p6 = por %p66_p4, %p65_p3 }
   0xc   : > { %p110_p7 = scmp.eq.s32.totalorder %s4792_s16, 1  ;;  %p116_p8 = scmp.eq.s32.totalorder %s3898_s17, 1 }
   0xd   : > { %p3900_p11 = scmp.ge.s32.totalorder %s4739_s15, 2 }
   0xe   : > { %p4819_p9 = por %p110_p7, %p33_p0  ;;  %p4823_p10 = por %p116_p8, %p65_p3 }
   0xf   : > { %135 = sbr.rel (%p3900_p11) target bundleno = 46 (0x2e), region = 20 }
  0x14   : > { %138 = sbr.rel (!%p4810_p5) target bundleno = 32 (0x20), region = 24  ;;  %s140_s26 = sand.u32 (%p4810_p5), 1, %s4735_s14  }
  0x15   : > { %s4102_s27 = sshll.u32 (%p4810_p5), %s4739_s15, 5  ;;  %s3901_s28 = sshll.u32 (%p4810_p5), %s140_s26, 6 }
  0x16   : > { %s145_s4 = scalar_lea.vmem (%p4810_p5), %s7435_s0, %s4102_s27  ;;  %s142_s5 = scalar_lea.vmem (%p4810_p5), [#allocation2], %s3901_s28 }
  0x17   : > { %v188_v0 = vld [vmem:[%s145_s4] sm:$0xff] (%p4810_p5)  ;;  %v190_v1 = vld [vmem:[%s145_s4 + $0x8] sm:$0xff] (%p4810_p5)  ;;  %v192_v2 = vld [vmem:[%s145_s4 + $0x10] sm:$0xff] (%p4810_p5) }
  0x18   : > { %189 = vst [vmem:[%s142_s5] sm:$0xff] (%p4810_p5), %v188_v0  ;;  %v194_v3 = vld [vmem:[%s145_s4 + $0x18] sm:$0xff] (%p4810_p5)  ;;  %v196_v4 = vld [vmem:[%s145_s4 + $0x40] sm:$0xff] (%p4810_p5)  ;;  %v198_v5 = vld [vmem:[%s145_s4 + $0x48] sm:$0xff] (%p4810_p5) }
  0x19   : > { %191 = vst [vmem:[%s142_s5 + $0x8] sm:$0xff] %v190_v1  ;;  %v200_v6 = vld [vmem:[%s145_s4 + $0x50] sm:$0xff]  ;;  %v202_v7 = vld [vmem:[%s145_s4 + $0x58] sm:$0xff] }
  0x1a   : > { %193 = vst [vmem:[%s142_s5 + $0x10] sm:$0xff] %v192_v2 }
  0x1b   : > { %195 = vst [vmem:[%s142_s5 + $0x18] sm:$0xff] %v194_v3 }
  0x1c   : > { %197 = vst [vmem:[%s142_s5 + $0x20] sm:$0xff] %v196_v4 }
  0x1d   : > { %199 = vst [vmem:[%s142_s5 + $0x28] sm:$0xff] %v198_v5 }
  0x1e   : > { %201 = vst [vmem:[%s142_s5 + $0x30] sm:$0xff] %v200_v6 }
  0x1f   : > { %203 = vst [vmem:[%s142_s5 + $0x38] sm:$0xff] %v202_v7 }
  0x20 PF: > { %s210_s6 = sand.u32 1, %s4735_s14   ;;  %s4103_s7 = sshll.u32 %s4739_s15, 7 }
  0x21   : > { %s3904_s8 = sshll.u32 %s210_s6, 8  ;;  %s219_s11 = scalar_lea.hbm %s7436_s1, %s4103_s7 }
  0x22   : > { %s4169_s17 = scalar_select %p4810_p5, [#allocation0], [#allocation9] }
  0x23   : > { %s232_s19 = sshll.u32 %s219_s11, 4  ;;  %s214_s20 = scalar_lea.vmem [#allocation3], %s3904_s8  ;;  %s233_s19 = int_to_ptr.hbm [resolvable:$true] %s232_s19 }
  0x24   : > { %s234_s26 = sshll.u32 %s214_s20, 4  ;;  %s224_s27 = sld [smem:[%s4169_s17]]   ;;  %s235_s26 = int_to_ptr.vmem [resolvable:$true] %s234_s26 }
  0x25   : > { %s4741_s28 = smov 4096   ;;  %s4742_s29 = smov 2048  }
  0x26   : > { %4170 = sst [smem:[#allocation8]] (%p4810_p5), %s4741_s28  ;;  %s4743_s30 = smov 32  }
  0x27   : > { %4171 = sst [smem:[#allocation8 + $0x1]] (%p4810_p5), %s4742_s29  ;;  %s4744_s4 = smov 64  }
  0x28   : > { %4172 = sst [smem:[#allocation8 + $0x2]] (%p4810_p5), %s4743_s30  ;;  %s4745_s8 = smov 4  }
  0x29   : > { %4173 = sst [smem:[#allocation8 + $0x3]] (%p4810_p5), %s4744_s4  ;;  %s211_s9 = scalar_lea.sflag [#allocation4], %s210_s6 }
  0x2a   : > { %s3907_s5 = sshll.u32 %s224_s27, 26  ;;  %4174 = sst [smem:[#allocation8 + $0x4]] (%p4810_p5), %s4744_s4 }
  0x2b   : > { %s3908_s7 = sadd.s32 134217728, %s3907_s5  ;;  %4175 = sst [smem:[#allocation8 + $0x5]] (%p4810_p5), %s4745_s8 }
  0x2c   : > { %s4746_s10 = smov [#allocation7]  }
  0x2d   : > { %4176 = dma.general (%p4810_p5), %s233_s19, 4096, %s235_s26, %s211_s9, %s4746_s10, [#allocation8], %s3908_s7, 0  }
  0x2e PF: > { %p3909_p12 = scmp.ge.s32.totalorder %s4739_s15, 1  ;;  %p255_p13 = scmp.lt.s32.totalorder %s4739_s15, 3 }
  0x30   : > { %p256_p0 = pnand %p3909_p12, %p255_p13 }
  0x32   : > { %259 = sbr.rel (%p256_p0) target bundleno = 1388 (0x56c), region = 66 }
  0x37   : > { %s4861_s11 = sand.u32 1, %s4731_s13  }
  0x38   : > { %s3910_s17 = sshll.u32 %s4861_s11, 6  ;;  %s3911_s20 = sshll.u32 %s4861_s11, 8 }
  0x39   : > { %s4865_s6 = scalar_lea.vmem [#allocation2], %s3910_s17  ;;  %s269_s22 = scalar_lea.sflag [#allocation4], %s4861_s11 }
  0x3a   : > { %s4868_s19 = scalar_lea.vmem [#allocation3], %s3911_s20 }
  0x3b   : > { %4718 = dma.done.wait (%p4814_p6), %s269_s22, 4096  }
  0x3c   : > { %4720 = vsyncadd (%p4814_p6), %s269_s22, 4294963200  ;;  %v304_v8 = vlaneseq  ;;  %v4143_v11 = vld [vmem:[%s7437_s2 + $0x38] sm:$0xff]  ;;  %v308_v12 = vld [vmem:[%s4865_s6 + $0x10] sm:$0xff]  ;;  %vm2716_vm0 = vcmask 64512   ;;  %v4747_v15 = vmov 0.0   ;;  %s4144_s27 = sshll.u32 %s4792_s16, 5 }
  0x3d   : > { %v307_v13 = vld [vmem:[%s4865_s6 + $0x8] sm:$0xff]  ;;  %v306_v14 = vld [vmem:[%s4865_s6] sm:$0xff]  ;;  %659 = vmatpush.bf16.msra.mxu0 %v4143_v11  ;;  %4145 = vmatpush.bf16.msra.mxu1 %v4143_v11  ;;  %v4142_v18 = vld [vmem:[%s7437_s2 + $0x30] sm:$0xff]  ;;  %s3803_s29 = scalar_lea.hbm %s7438_s3, %s4144_s27  ;;  %s3792_s4 = scalar_lea.sflag [#allocation5], %s4861_s11 }
  0x3e   : > { %v2334_v9 = vshrl.u32 %v304_v8, 7  ;;  %v4874_v10 = vand.u32 127, %v304_v8  ;;  %v3918_v19 = vld [vmem:[%s4865_s6 + $0x28] sm:$0xff]  ;;  %v3917_v20 = vld [vmem:[%s4865_s6 + $0x20] sm:$0xff]  ;;  %4146 = vmatpush.bf16.msra.mxu2 %v4143_v11  ;;  %4147 = vmatpush.bf16.msra.mxu3 %v4143_v11  ;;  %v309_v24 = vld [vmem:[%s4865_s6 + $0x18] sm:$0xff]  ;;  %s3806_s30 = sshll.u32 %s3803_s29, 4  ;;  %s3807_s30 = int_to_ptr.hbm [resolvable:$true] %s3806_s30 }
  0x3f   : > { %v4141_v26 = vld [vmem:[%s7437_s2 + $0x28] sm:$0xff]  ;;  %v3920_v30 = vld [vmem:[%s4865_s6 + $0x38] sm:$0xff]  ;;  %v3919_v33 = vld [vmem:[%s4865_s6 + $0x30] sm:$0xff]  ;;  %s4687_s5 = sshra.s32 %s3807_s30, 4  ;;  %s4693_s10 = scalar_lea.hbm %s7438_s3, 64  ;;  %s4688_s5 = int_to_ptr.hbm [resolvable:$true] %s4687_s5 }
  0x40   : > { %7549 = vst [vmem:[#allocation12_spill] sm:$0xff] %v4874_v10  ;;  %4227 = vset.pattern.permute.xlu1 %v2334_v9  ;;  %4289 = vset.pattern.permute.xlu0 %v2334_v9  ;;  %vm312_vm1 = vcmp.lt.s32.totalorder %v4874_v10, %v308_v12  ;;  %vm311_vm2 = vcmp.lt.s32.totalorder %v4874_v10, %v307_v13  ;;  %v4140_v34 = vld [vmem:[%s7437_s2 + $0x20] sm:$0xff]  ;;  %v4139_v36 = vld [vmem:[%s7437_s2 + $0x18] sm:$0xff]  ;;  %v4138_v40 = vld [vmem:[%s7437_s2 + $0x10] sm:$0xff]  ;;  %s4689_s7 = scalar_lea.hbm %s4688_s5, 32  ;;  %p4694_p4 = scmp.lt.s32.totalorder %s4688_s5, %s7438_s3 }
  0x41   : > { %4258 = vset.pattern.permute.xlu2 %v2334_v9  ;;  %v4884_v16 = vsel %vm312_vm1, 1.0, %v4747_v15  ;;  %v4886_v17 = vsel %vm311_vm2, 1.0, %v4747_v15  ;;  %vm310_vm3 = vcmp.lt.s32.totalorder %v4874_v10, %v306_v14  ;;  %vm328_vm4 = vcmp.lt.s32.totalorder %v4874_v10, %v3918_v19  ;;  %660 = vmatpush.bf16.msra.mxu0 %v4142_v18  ;;  %v4137_v42 = vld [vmem:[%s7437_s2 + $0x8] sm:$0xff]  ;;  %v4136_v43 = vld [vmem:[%s7437_s2] sm:$0xff]  ;;  %v4130_v49 = vld [vmem:[%s4868_s19 + $0xd0] sm:$0xff]  ;;  %p4690_p1 = scmp.ne.s32.totalorder %s4688_s5, %s4689_s7  ;;  %p4695_p5 = scmp.lt.s32.totalorder %s4693_s10, %s4689_s7 }
  0x42   : > { %v3011_v21 = vsel %vm2716_vm0, %v4884_v16, 0.0  ;;  %v3008_v22 = vsel %vm2716_vm0, %v4886_v17, 0.0  ;;  %v4898_v23 = vsel %vm310_vm3, 1.0, %v4747_v15  ;;  %vm327_vm5 = vcmp.lt.s32.totalorder %v4874_v10, %v3917_v20  ;;  %4148 = vmatpush.bf16.msra.mxu1 %v4142_v18  ;;  %4149 = vmatpush.bf16.msra.mxu2 %v4142_v18  ;;  %v4104_v44 = vld [vmem:[%s4868_s19] sm:$0xff]  ;;  %v4125_v48 = vld [vmem:[%s4868_s19 + $0xa8] sm:$0xff]  ;;  %v4126_v5 = vld [vmem:[%s4868_s19 + $0xb0] sm:$0xff] }
  0x43   : > { %3012 = vadd.xlane.f32.xlu1 %v3011_v21  ;;  %3009 = vadd.xlane.f32.xlu0 %v3008_v22  ;;  %v3005_v25 = vsel %vm2716_vm0, %v4898_v23, 0.0  ;;  %vm313_vm6 = vcmp.lt.s32.totalorder %v4874_v10, %v309_v24  ;;  %v4909_v27 = vsel %vm328_vm4, 1.0, %v4747_v15  ;;  %v4911_v28 = vsel %vm327_vm5, 1.0, %v4747_v15  ;;  %v4120_v45 = vld [vmem:[%s4868_s19 + $0x80] sm:$0xff]  ;;  %v4105_v63 = vld [vmem:[%s4868_s19 + $0x8] sm:$0xff]  ;;  %v4131_v6 = vld [vmem:[%s4868_s19 + $0xd8] sm:$0xff]  ;;  %p4691_p2 = pnand %p4690_p1, %p4819_p9  ;;  %p4696_p6 = por %p4695_p5, %p4694_p4 }
  0x44   : > { %3006 = vadd.xlane.f32.xlu2 %v3005_v25  ;;  %7550 = vst [vmem:[#allocation13_spill] sm:$0xff] %v4909_v27  ;;  %4150 = vmatpush.bf16.msra.mxu3 %v4142_v18  ;;  %v4913_v29 = vsel %vm313_vm6, 1.0, %v4747_v15  ;;  %v3024_v31 = vsel %vm2716_vm0, %v4909_v27, 0.0  ;;  %v3021_v32 = vsel %vm2716_vm0, %v4911_v28, 0.0  ;;  %vm330_vm7 = vcmp.lt.s32.totalorder %v4874_v10, %v3920_v30  ;;  %v4121_v2 = vld [vmem:[%s4868_s19 + $0x88] sm:$0xff]  ;;  %v4106_v24 = vld [vmem:[%s4868_s19 + $0x10] sm:$0xff] }
  0x45   : > { %7551 = vst [vmem:[#allocation14_spill] sm:$0xff] %v4911_v28  ;;  %661 = vmatpush.bf16.msra.mxu0 %v4141_v26  ;;  %v3014_v35 = vsel %vm2716_vm0, %v4913_v29, 0.0  ;;  %vm329_vm8 = vcmp.lt.s32.totalorder %v4874_v10, %v3919_v33  ;;  %v4931_v37 = vsel %vm330_vm7, 1.0, %v4747_v15  ;;  %v2332_v46 = vperm.slane %v4898_v23, 0  ;;  %v4132_v33 = vld [vmem:[%s4868_s19 + $0xe0] sm:$0xff]  ;;  %p4692_p3 = pneg %p4691_p2 }
  0x46   : > { %4151 = vmatpush.bf16.msra.mxu1 %v4141_v26  ;;  %4152 = vmatpush.bf16.msra.mxu2 %v4141_v26  ;;  %7552 = vst [vmem:[#allocation15_spill] sm:$0xff] %v4931_v37  ;;  %v4933_v38 = vsel %vm329_vm8, 1.0, %v4747_v15  ;;  %v3030_v39 = vsel %vm2716_vm0, %v4931_v37, 0.0  ;;  %v2339_v47 = vperm.slane %v4898_v23, 1  ;;  %v2360_v50 = vperm.slane %v4898_v23, 4  ;;  %v4118_v37 = vld [vmem:[%s4868_s19 + $0x70] sm:$0xff] }
  0x47   : > { %7553 = vst [vmem:[#allocation16_spill] sm:$0xff] %v4933_v38  ;;  %v3027_v41 = vsel %vm2716_vm0, %v4933_v38, 0.0  ;;  %v2367_v51 = vperm.slane %v4898_v23, 5  ;;  %v2388_v54 = vperm.slane %v4886_v17, 0  ;;  %v2395_v55 = vperm.slane %v4886_v17, 1  ;;  %p4697_p7 = pnand %p4696_p6, %p4692_p3 }
  0x48   : > { %4153 = vmatpush.bf16.msra.mxu3 %v4141_v26  ;;  %v4956_v52 = vpack.i.bf16 %v2339_v47, %v2332_v46  ;;  %v2346_v56 = vperm.slane %v4898_v23, 2  ;;  %v2353_v57 = vperm.slane %v4898_v23, 3  ;;  %v2458_v58 = vperm.slane %v4884_v16, 2  ;;  %v4123_v47 = vld [vmem:[%s4868_s19 + $0x98] sm:$0xff] }
  0x49   : > { %662 = vmatpush.bf16.msra.mxu0 %v4140_v34  ;;  %v4958_v53 = vpack.i.bf16 %v2367_v51, %v2360_v50  ;;  %v2465_v59 = vperm.slane %v4884_v16, 3  ;;  %v4968_v60 = vpack.i.bf16 %v2395_v55, %v2388_v54  ;;  %v2416_v0 = vperm.slane %v4886_v17, 4  ;;  %v4124_v50 = vld [vmem:[%s4868_s19 + $0xa0] sm:$0xff]  ;;  %v4134_v51 = vld [vmem:[%s4868_s19 + $0xf0] sm:$0xff]  ;;  %v4135_v54 = vld [vmem:[%s4868_s19 + $0xf8] sm:$0xff] }
  0x4a   : > { %4154 = vmatpush.bf16.msra.mxu1 %v4140_v34  ;;  %4155 = vmatpush.bf16.msra.mxu2 %v4140_v34  ;;  %v4970_v61 = vpack.i.bf16 %v2353_v57, %v2346_v56  ;;  %v2423_v1 = vperm.slane %v4886_v17, 5  ;;  %v2374_v3 = vperm.slane %v4898_v23, 6  ;;  %v2381_v4 = vperm.slane %v4898_v23, 7  ;;  %v4110_v55 = vld [vmem:[%s4868_s19 + $0x30] sm:$0xff]  ;;  %v4111_v56 = vld [vmem:[%s4868_s19 + $0x38] sm:$0xff] }
  0x4b   : > { %3025 = vadd.xlane.f32.xlu1 %v3024_v31  ;;  %3022 = vadd.xlane.f32.xlu0 %v3021_v32  ;;  %v4972_v62 = vpack.i.bf16 %v2465_v59, %v2458_v58  ;;  %v2500_v7 = vperm.slane %v4913_v29, 0  ;;  %v2507_v8 = vperm.slane %v4913_v29, 1  ;;  %v2444_v13 = vperm.slane %v4884_v16, 0  ;;  %v4122_v32 = vld [vmem:[%s4868_s19 + $0x90] sm:$0xff] }
  0x4c   : > { %3015 = vadd.xlane.f32.xlu2 %v3014_v35  ;;  %4156 = vmatpush.bf16.msra.mxu3 %v4140_v34  ;;  %v4987_v9 = vpack.i.bf16 %v2423_v1, %v2416_v0  ;;  %v4264_v11 = vpack.i.bf16 %v2381_v4, %v2374_v3  ;;  %v2451_v14 = vperm.slane %v4884_v16, 1  ;;  %v2402_v15 = vperm.slane %v4886_v17, 2  ;;  %v4127_v34 = vld [vmem:[%s4868_s19 + $0xb8] sm:$0xff] }
  0x4d   : > { %663 = vmatpush.bf16.msra.mxu0 %v4139_v36  ;;  %v4989_v12 = vpack.i.bf16 %v2507_v8, %v2500_v7  ;;  %v2409_v18 = vperm.slane %v4886_v17, 3  ;;  %v2542_v19 = vperm.slane %v4913_v29, 6  ;;  %v2549_v20 = vperm.slane %v4913_v29, 7 }
  0x4e   : > { %4157 = vmatpush.bf16.msra.mxu1 %v4139_v36  ;;  %4158 = vmatpush.bf16.msra.mxu2 %v4139_v36  ;;  %v4243_v21 = vpack.i.bf16 %v2451_v14, %v2444_v13  ;;  %v2486_v25 = vperm.slane %v4884_v16, 6  ;;  %v2493_v26 = vperm.slane %v4884_v16, 7  ;;  %v2430_v30 = vperm.slane %v4886_v17, 6 }
  0x4f   : > { %v4269_v22 = vpack.i.bf16 %v2409_v18, %v2402_v15  ;;  %v4999_v23 = vpack.i.bf16 %v2549_v20, %v2542_v19  ;;  %v2437_v31 = vperm.slane %v4886_v17, 7  ;;  %v2535_v17 = vperm.slane %v4913_v29, 5  ;;  %v4113_v19 = vld [vmem:[%s4868_s19 + $0x48] sm:$0xff] }
  0x50   : > { %4159 = vmatpush.bf16.msra.mxu3 %v4139_v36  ;;  %v4248_v35 = vpack.i.bf16 %v2493_v26, %v2486_v25  ;;  %v2521_v46 = vperm.slane %v4913_v29, 3 }
  0x51   : > { %664 = vmatpush.bf16.msra.mxu0 %v4138_v40  ;;  %v4274_v36 = vpack.i.bf16 %v2437_v31, %v2430_v30 }
  0x52   : > { %4160 = vmatpush.bf16.msra.mxu1 %v4138_v40  ;;  %4161 = vmatpush.bf16.msra.mxu2 %v4138_v40 }
  0x53   : > { %3031 = vadd.xlane.f32.xlu0 %v3030_v39  ;;  %v2528_v39 = vperm.slane %v4913_v29, 4 }
  0x54   : > { %3028 = vadd.xlane.f32.xlu2 %v3027_v41  ;;  %4162 = vmatpush.bf16.msra.mxu3 %v4138_v40  ;;  %v2472_v40 = vperm.slane %v4884_v16, 4  ;;  %v2479_v41 = vperm.slane %v4884_v16, 5 }
  0x55   : > { %665 = vmatpush.bf16.msra.mxu0 %v4137_v42 }
  0x56   : > { %4163 = vmatpush.bf16.msra.mxu1 %v4137_v42  ;;  %4164 = vmatpush.bf16.msra.mxu2 %v4137_v42 }
  0x58   : > { %4165 = vmatpush.bf16.msra.mxu3 %v4137_v42  ;;  %v4253_v42 = vpack.i.bf16 %v2535_v17, %v2528_v39 }
  0x59   : > { %666 = vmatpush.bf16.msra.mxu0 %v4136_v43 }
  0x5a   : > { %4166 = vmatpush.bf16.msra.mxu1 %v4136_v43  ;;  %4167 = vmatpush.bf16.msra.mxu2 %v4136_v43 }
  0x5c   : > { %4168 = vmatpush.bf16.msra.mxu3 %v4136_v43  ;;  %667 = vmatmul.bf16.vlgmr.msra.gmra.mxu0 %v4104_v44  ;;  %v4279_v43 = vpack.i.bf16 %v2479_v41, %v2472_v40  ;;  %v4107_v44 = vld [vmem:[%s4868_s19 + $0x18] sm:$0xff] }
  0x5d   : > { %747 = vmatmul.bf16.vlgmr.msra.gmra.mxu1 %v4120_v45  ;;  %772 = vmatmul.bf16.vlgmr.msra.gmra.mxu2 %v4125_v48  ;;  %v2514_v45 = vperm.slane %v4913_v29, 2  ;;  %v4133_v48 = vld [vmem:[%s4868_s19 + $0xe8] sm:$0xff]  ;;  %v4108_v29 = vld [vmem:[%s4868_s19 + $0x20] sm:$0xff] }
  0x5f   : > { %797 = vmatmul.bf16.vlgmr.msra.gmra.mxu3 %v4130_v49  ;;  %v4128_v49 = vld [vmem:[%s4868_s19 + $0xc0] sm:$0xff]  ;;  %v4284_v16 = vpack.i.bf16 %v2521_v46, %v2514_v45 }
  0x64   : > { %4229 = vperm.xlu1 %4227, %v4956_v52  }
  0x67   : > { %4291 = vperm.xlu0 %4289, %v4958_v53  }
  0x6c   : > { %4234 = vperm.xlu1 %4227, %v4968_v60   ;;  %4260 = vperm.xlu2 %4258, %v4970_v61  }
  0x6d   : > { %672 = vmatmul.bf16.gmra.mxu0 %v4105_v63  ;;  %752 = vmatmul.bf16.gmra.mxu1 %v4121_v2 }
  0x6e   : > { %777 = vmatmul.bf16.gmra.mxu2 %v4126_v5 }
  0x6f   : > { %4296 = vperm.xlu0 %4289, %v4972_v62   ;;  %802 = vmatmul.bf16.gmra.mxu3 %v4131_v6 }
  0x74   : > { %4239 = vperm.xlu1 %4227, %v4987_v9   ;;  %4265 = vperm.xlu2 %4258, %v4264_v11  }
  0x77   : > { %4301 = vperm.xlu0 %4289, %v4989_v12  }
  0x7c   : > { %4244 = vperm.xlu1 %4227, %v4243_v21   ;;  %4270 = vperm.xlu2 %4258, %v4269_v22  }
  0x7d   : > { %677 = vmatmul.bf16.gmra.mxu0 %v4106_v24  ;;  %757 = vmatmul.bf16.gmra.mxu1 %v4122_v32 }
  0x7e   : > { %782 = vmatmul.bf16.gmra.mxu2 %v4127_v34 }
  0x7f   : > { %4306 = vperm.xlu0 %4289, %v4999_v23   ;;  %807 = vmatmul.bf16.gmra.mxu3 %v4132_v33 }
  0x84   : > { %4249 = vperm.xlu1 %4227, %v4248_v35   ;;  %4275 = vperm.xlu2 %4258, %v4274_v36  }
  0x87   : > { %4321 = vperm.xlu0 %4289, %v4958_v53   ;;  %v4129_v53 = vld [vmem:[%s4868_s19 + $0xc8] sm:$0xff] }
  0x8c   : > { %4254 = vperm.xlu1 %4227, %v4253_v42   ;;  %4280 = vperm.xlu2 %4258, %v4279_v43  }
  0x8d   : > { %682 = vmatmul.bf16.gmra.mxu0 %v4107_v44  ;;  %762 = vmatmul.bf16.gmra.mxu1 %v4123_v47  ;;  %v4114_v47 = vld [vmem:[%s4868_s19 + $0x50] sm:$0xff] }
  0x8e   : > { %787 = vmatmul.bf16.gmra.mxu2 %v4128_v49 }
  0x8f   : > { %4331 = vperm.xlu0 %4289, %v4968_v60   ;;  %812 = vmatmul.bf16.gmra.mxu3 %v4133_v48  ;;  %v4112_v60 = vld [vmem:[%s4868_s19 + $0x40] sm:$0xff] }
  0x94   : > { %4311 = vperm.xlu1 %4227, %v4956_v52   ;;  %4285 = vperm.xlu2 %4258, %v4284_v16   ;;  %v4109_v52 = vld [vmem:[%s4868_s19 + $0x28] sm:$0xff] }
  0x97   : > { %4346 = vperm.xlu0 %4289, %v4274_v36  }
  0x9c   : > { %4326 = vperm.xlu1 %4227, %v4264_v11   ;;  %4316 = vperm.xlu2 %4258, %v4970_v61  }
  0x9d   : > { %687 = vmatmul.bf16.gmra.mxu0 %v4108_v29  ;;  %767 = vmatmul.bf16.gmra.mxu1 %v4124_v50 }
  0x9e   : > { %792 = vmatmul.bf16.gmra.mxu2 %v4129_v53 }
  0x9f   : > { %4361 = vperm.xlu0 %4289, %v4279_v43   ;;  %817 = vmatmul.bf16.gmra.mxu3 %v4134_v51 }
  0xa4   : > { %4341 = vperm.xlu1 %4227, %v4987_v9   ;;  %4336 = vperm.xlu2 %4258, %v4269_v22  }
  0xa7   : > { %4376 = vperm.xlu0 %4289, %v4284_v16  }
  0xac   : > { %4356 = vperm.xlu1 %4227, %v4972_v62   ;;  %4351 = vperm.xlu2 %4258, %v4243_v21  }
  0xad   : > { %692 = vmatmul.bf16.gmra.mxu0 %v4109_v52 }
  0xaf   : > { %822 = vmatmul.bf16.gmra.mxu3 %v4135_v54 }
  0xb4   : > { %4371 = vperm.xlu1 %4227, %v4989_v12   ;;  %4366 = vperm.xlu2 %4258, %v4248_v35  }
  0xb6   : > { %v5038_v58 = vpop.xlane.xlu1 %3012  ;;  %v5043_v63 = vpop.xlane.xlu0 %3009 }
  0xb7   : > { %v5036_v57 = vpop.xlane.xlu2 %3006  ;;  %7555 = vst [vmem:[#allocation18_spill] sm:$0xff] %v5038_v58 }
  0xb8   : > { %7554 = vst [vmem:[#allocation17_spill] sm:$0xff] %v5036_v57 }
  0xb9   : > { %7557 = vst [vmem:[#allocation20_spill] sm:$0xff] %v5043_v63  ;;  %v4117_v63 = vld [vmem:[%s4868_s19 + $0x68] sm:$0xff] }
  0xbc   : > { %4386 = vperm.xlu1 %4227, %v4999_v23   ;;  %4381 = vperm.xlu2 %4258, %v4253_v42  }
  0xbd   : > { %697 = vmatmul.bf16.gmra.mxu0 %v4110_v55 }
  0xbe   : > { %v5045_v0 = vpop.xlane.xlu1 %3025  ;;  %v5059_v12 = vpop.xlane.xlu0 %3022 }
  0xbf   : > { %v5040_v59 = vpop.xlane.xlu2 %3015  ;;  %7558 = vst [vmem:[#allocation21_spill] sm:$0xff] %v5045_v0 }
  0xc0   : > { %7556 = vst [vmem:[#allocation19_spill] sm:$0xff] %v5040_v59 }
  0xc1   : > { %7560 = vst [vmem:[#allocation23_spill] sm:$0xff] %v5059_v12 }
  0xc6   : > { %v5086_v17 = vpop.xlane.xlu0 %3031 }
  0xc7   : > { %v5047_v1 = vpop.xlane.xlu2 %3028  ;;  %7566 = vst [vmem:[#allocation29_spill] sm:$0xff] %v5086_v17 }
  0xc8   : > { %7559 = vst [vmem:[#allocation22_spill] sm:$0xff] %v5047_v1 }
  0xcd   : > { %702 = vmatmul.bf16.gmra.mxu0 %v4111_v56 }
  0xcf   : > { %v5070_v24 = vpop.permute.xlu2 %4260 }
  0xd0   : > { %7563 = vst [vmem:[#allocation26_spill] sm:$0xff] %v5070_v24 }
  0xd6   : > { %v5061_v13 = vpop.permute.xlu1 %4229 }
  0xd7   : > { %7561 = vst [vmem:[#allocation24_spill] sm:$0xff] %v5061_v13  ;;  %v5090_v42 = vpop.permute.xlu2 %4265 }
  0xd8   : > { %7567 = vst [vmem:[#allocation30_spill] sm:$0xff] %v5090_v42 }
  0xd9   : > { %v668_v61 = vpop.f32.mrf.mxu0  ;;  %v5111_v52 = vpop.permute.xlu0 %4291 }
  0xda   : > { %v748_v62 = vpop.f32.mrf.mxu1  ;;  %4393 = vtanh.f32 %v668_v61  ;;  %7570 = vst [vmem:[#allocation33_spill] sm:$0xff] %v5111_v52 }
  0xdb   : > { %4395 = vtanh.f32 %v748_v62 }
  0xdd   : > { %707 = vmatmul.bf16.gmra.mxu0 %v4112_v60 }
  0xde   : > { %v5082_v36 = vpop.permute.xlu1 %4234 }
  0xdf   : > { %7565 = vst [vmem:[#allocation28_spill] sm:$0xff] %v5082_v36  ;;  %v5113_v54 = vpop.permute.xlu2 %4270 }
  0xe0   : > { %v5049_v2 = vpop.eup %4393  ;;  %v773_v3 = vpop.f32.mrf.mxu2  ;;  %7571 = vst [vmem:[#allocation34_spill] sm:$0xff] %v5113_v54 }
  0xe1   : > { %v5051_v5 = vpop.eup %4395  ;;  %4397 = vtanh.f32 %v773_v3  ;;  %v670_v6 = vpop.f32.mrf.mxu0  ;;  %v892_v7 = vmul.f32 %v5049_v2, %v5049_v2 }
  0xe2   : > { %v798_v4 = vpop.f32.mrf.mxu3  ;;  %v750_v8 = vpop.f32.mrf.mxu1  ;;  %v924_v9 = vmul.f32 %v5051_v5, %v5051_v5 }
  0xe3   : > { %4399 = vtanh.f32 %v798_v4  ;;  %956 = vadd.xlane.f32.xlu0 %v892_v7 }
  0xe4   : > { %4401 = vtanh.f32 %v670_v6 }
  0xe5   : > { %1020 = vadd.xlane.f32.xlu2 %v924_v9 }
  0xe6   : > { %v5107_v51 = vpop.permute.xlu1 %4239 }
  0xe7   : > { %v5057_v11 = vpop.eup %4397  ;;  %7568 = vst [vmem:[#allocation31_spill] sm:$0xff] %v5107_v51 }
  0xe8   : > { %v775_v15 = vpop.f32.mrf.mxu2  ;;  %v934_v22 = vmul.f32 %v5057_v11, %v5057_v11 }
  0xe9   : > { %v5063_v14 = vpop.eup %4399  ;;  %4403 = vtanh.f32 %v775_v15  ;;  %v5129_v15 = vpop.permute.xlu0 %4296 }
  0xea   : > { %7562 = vst [vmem:[#allocation25_spill] sm:$0xff] %v5063_v14  ;;  %v800_v18 = vpop.f32.mrf.mxu3  ;;  %v673_v20 = vpop.f32.mrf.mxu0  ;;  %v944_v21 = vmul.f32 %v5063_v14, %v5063_v14 }
  0xeb   : > { %v753_v23 = vpop.f32.mrf.mxu1  ;;  %4405 = vtanh.f32 %v800_v18  ;;  %1040 = vadd.xlane.f32.xlu0 %v934_v22  ;;  %v5072_v25 = vpop.eup %4401  ;;  %7573 = vst [vmem:[#allocation36_spill] sm:$0xff] %v5129_v15 }
  0xec   : > { %1060 = vadd.xlane.f32.xlu1 %v944_v21  ;;  %4407 = vtanh.f32 %v673_v20  ;;  %v893_v39 = vmul.f32 %v5072_v25, %v5072_v25  ;;  %v4115_v20 = vld [vmem:[%s4868_s19 + $0x58] sm:$0xff] }
  0xed   : > { %712 = vmatmul.bf16.gmra.mxu0 %v4113_v19  ;;  %4409 = vtanh.f32 %v750_v8  ;;  %v5133_v19 = vpop.permute.xlu2 %4275 }
  0xee   : > { %v5125_v7 = vpop.permute.xlu1 %4244  ;;  %7574 = vst [vmem:[#allocation37_spill] sm:$0xff] %v5133_v19 }
  0xef   : > { %v5074_v26 = vpop.eup %4403  ;;  %7572 = vst [vmem:[#allocation35_spill] sm:$0xff] %v5125_v7 }
  0xf0   : > { %v935_v32 = vmul.f32 %v5074_v26, %v5074_v26 }
  0xf1   : > { %v5076_v30 = vpop.eup %4405  ;;  %v778_v31 = vpop.f32.mrf.mxu2 }
  0xf2   : > { %7564 = vst [vmem:[#allocation27_spill] sm:$0xff] %v5076_v30  ;;  %v803_v33 = vpop.f32.mrf.mxu3  ;;  %4411 = vtanh.f32 %v778_v31  ;;  %v675_v34 = vpop.f32.mrf.mxu0  ;;  %v945_v35 = vmul.f32 %v5076_v30, %v5076_v30 }
  0xf3   : > { %v755_v40 = vpop.f32.mrf.mxu1  ;;  %v5088_v41 = vpop.eup %4407  ;;  %958 = vadd.xlane.f32.xlu0 %v893_v39  ;;  %4413 = vtanh.f32 %v753_v23 }
  0xf4   : > { %1062 = vadd.xlane.f32.xlu2 %v945_v35  ;;  %1042 = vadd.xlane.f32.xlu1 %v935_v32  ;;  %v5092_v43 = vpop.eup %4409  ;;  %4415 = vtanh.f32 %v755_v40  ;;  %v894_v45 = vmul.f32 %v5088_v41, %v5088_v41 }
  0xf5   : > { %4417 = vtanh.f32 %v803_v33  ;;  %v925_v16 = vmul.f32 %v5092_v43, %v5092_v43 }
  0xf6   : > { %v5148_v40 = vpop.permute.xlu1 %4249 }
  0xf7   : > { %7577 = vst [vmem:[#allocation40_spill] sm:$0xff] %v5148_v40 }
  0xf8   : > { %v5094_v44 = vpop.eup %4411 }
  0xf9   : > { %v936_v46 = vmul.f32 %v5094_v44, %v5094_v44  ;;  %v5103_v29 = vpop.eup %4413  ;;  %v780_v55 = vpop.f32.mrf.mxu2 }
  0xfa   : > { %v805_v48 = vpop.f32.mrf.mxu3  ;;  %v678_v49 = vpop.f32.mrf.mxu0  ;;  %v926_v60 = vmul.f32 %v5103_v29, %v5103_v29 }
  0xfb   : > { %v5105_v50 = vpop.eup %4415  ;;  %1022 = vadd.xlane.f32.xlu0 %v925_v16  ;;  %4419 = vtanh.f32 %v678_v49  ;;  %v758_v8 = vpop.f32.mrf.mxu1 }
  0xfc   : > { %1044 = vadd.xlane.f32.xlu2 %v936_v46  ;;  %960 = vadd.xlane.f32.xlu1 %v894_v45  ;;  %v5109_v53 = vpop.eup %4417  ;;  %v927_v56 = vmul.f32 %v5105_v50, %v5105_v50  ;;  %4421 = vtanh.f32 %v675_v34  ;;  %v5152_v46 = vpop.permute.xlu0 %4301 }
  0xfd   : > { %717 = vmatmul.bf16.gmra.mxu0 %v4114_v47  ;;  %7569 = vst [vmem:[#allocation32_spill] sm:$0xff] %v5109_v53  ;;  %v946_v61 = vmul.f32 %v5109_v53, %v5109_v53  ;;  %4423 = vtanh.f32 %v780_v55  ;;  %v5156_v49 = vpop.permute.xlu2 %4280 }
  0xfe   : > { %7578 = vst [vmem:[#allocation41_spill] sm:$0xff] %v5152_v46 }
  0xff   : > { %7579 = vst [vmem:[#allocation42_spill] sm:$0xff] %v5156_v49 }
 0x101   : > { %v5121_v4 = vpop.eup %4419  ;;  %v783_v31 = vpop.f32.mrf.mxu2 }
 0x102   : > { %v680_v62 = vpop.f32.mrf.mxu0  ;;  %v808_v3 = vpop.f32.mrf.mxu3  ;;  %v896_v18 = vmul.f32 %v5121_v4, %v5121_v4 }
 0x103   : > { %1064 = vadd.xlane.f32.xlu0 %v946_v61  ;;  %v5123_v6 = vpop.eup %4421  ;;  %4425 = vtanh.f32 %v808_v3  ;;  %v760_v16 = vpop.f32.mrf.mxu1 }
 0x104   : > { %1026 = vadd.xlane.f32.xlu2 %v927_v56  ;;  %1024 = vadd.xlane.f32.xlu1 %v926_v60  ;;  %v5127_v9 = vpop.eup %4423  ;;  %4427 = vtanh.f32 %v758_v8  ;;  %v895_v22 = vmul.f32 %v5123_v6, %v5123_v6  ;;  %v4116_v8 = vld [vmem:[%s4868_s19 + $0x60] sm:$0xff] }
 0x105   : > { %4429 = vtanh.f32 %v805_v48  ;;  %v937_v23 = vmul.f32 %v5127_v9, %v5127_v9 }
 0x106   : > { %4431 = vtanh.f32 %v783_v31 }
 0x107   : > { %4433 = vtanh.f32 %v680_v62 }
 0x109   : > { %v5140_v32 = vpop.eup %4425  ;;  %v785_v56 = vpop.f32.mrf.mxu2 }
 0x10a   : > { %v683_v21 = vpop.f32.mrf.mxu0  ;;  %7575 = vst [vmem:[#allocation38_spill] sm:$0xff] %v5140_v32  ;;  %v810_v33 = vpop.f32.mrf.mxu3  ;;  %v948_v39 = vmul.f32 %v5140_v32, %v5140_v32 }
 0x10b   : > { %1046 = vadd.xlane.f32.xlu0 %v937_v23  ;;  %v5142_v34 = vpop.eup %4427  ;;  %4435 = vtanh.f32 %v810_v33  ;;  %v763_v31 = vpop.f32.mrf.mxu1 }
 0x10c   : > { %964 = vadd.xlane.f32.xlu2 %v896_v18  ;;  %962 = vadd.xlane.f32.xlu1 %v895_v22  ;;  %v5144_v35 = vpop.eup %4429  ;;  %v928_v45 = vmul.f32 %v5142_v34, %v5142_v34  ;;  %4437 = vtanh.f32 %v760_v16  ;;  %v5169_v22 = vpop.permute.xlu1 %4254 }
 0x10d   : > { %722 = vmatmul.bf16.gmra.mxu0 %v4115_v20  ;;  %7576 = vst [vmem:[#allocation39_spill] sm:$0xff] %v5144_v35  ;;  %v947_v48 = vmul.f32 %v5144_v35, %v5144_v35  ;;  %v5158_v55 = vpop.eup %4431  ;;  %4439 = vtanh.f32 %v785_v56  ;;  %v5173_v33 = vpop.permute.xlu0 %4306 }
 0x10e   : > { %v5160_v60 = vpop.eup %4433  ;;  %v938_v3 = vmul.f32 %v5158_v55, %v5158_v55  ;;  %4441 = vtanh.f32 %v683_v21  ;;  %7581 = vst [vmem:[#allocation44_spill] sm:$0xff] %v5169_v22 }
 0x10f   : > { %v897_v20 = vmul.f32 %v5160_v60, %v5160_v60  ;;  %7582 = vst [vmem:[#allocation45_spill] sm:$0xff] %v5173_v33  ;;  %4443 = vtanh.f32 %v763_v31 }
 0x111   : > { %v5162_v62 = vpop.eup %4435 }
 0x112   : > { %v685_v47 = vpop.f32.mrf.mxu0  ;;  %v813_v61 = vpop.f32.mrf.mxu3  ;;  %7580 = vst [vmem:[#allocation43_spill] sm:$0xff] %v5162_v62  ;;  %v949_v23 = vmul.f32 %v5162_v62, %v5162_v62 }
 0x113   : > { %1028 = vadd.xlane.f32.xlu0 %v928_v45  ;;  %v5177_v45 = vpop.eup %4437  ;;  %4445 = vtanh.f32 %v813_v61  ;;  %v765_v59 = vpop.f32.mrf.mxu1 }
 0x114   : > { %1068 = vadd.xlane.f32.xlu2 %v948_v39  ;;  %1066 = vadd.xlane.f32.xlu1 %v947_v48  ;;  %v5175_v39 = vpop.permute.xlu2 %4285  ;;  %v5179_v21 = vpop.eup %4439 }
 0x115   : > { %7583 = vst [vmem:[#allocation46_spill] sm:$0xff] %v5175_v39  ;;  %v788_v48 = vpop.f32.mrf.mxu2  ;;  %v5181_v16 = vpop.eup %4441 }
 0x116   : > { %7584 = vst [vmem:[#allocation47_spill] sm:$0xff] %v5179_v21  ;;  %4447 = vtanh.f32 %v788_v48  ;;  %v5193_v31 = vpop.permute.xlu1 %4311  ;;  %v5197_v58 = vpop.permute.xlu0 %4321 }
 0x117   : > { %7586 = vst [vmem:[#allocation49_spill] sm:$0xff] %v5193_v31  ;;  %4449 = vtanh.f32 %v685_v47 }
 0x118   : > { %7588 = vst [vmem:[#allocation51_spill] sm:$0xff] %v5197_v58 }
 0x11a   : > { %v688_v18 = vpop.f32.mrf.mxu0  ;;  %v815_v56 = vpop.f32.mrf.mxu3 }
 0x11b   : > { %1070 = vadd.xlane.f32.xlu0 %v949_v23  ;;  %v5189_v23 = vpop.eup %4443  ;;  %4451 = vtanh.f32 %v815_v56 }
 0x11c   : > { %966 = vadd.xlane.f32.xlu2 %v897_v20  ;;  %1048 = vadd.xlane.f32.xlu1 %v938_v3  ;;  %v939_v20 = vmul.f32 %v5179_v21, %v5179_v21  ;;  %v929_v3 = vmul.f32 %v5177_v45, %v5177_v45  ;;  %v5191_v61 = vpop.eup %4445  ;;  %v5199_v17 = vpop.permute.xlu2 %4316  ;;  %v930_v0 = vmul.f32 %v5189_v23, %v5189_v23  ;;  %4453 = vtanh.f32 %v765_v59 }
 0x11d   : > { %727 = vmatmul.bf16.gmra.mxu0 %v4116_v8  ;;  %v898_v8 = vmul.f32 %v5181_v16, %v5181_v16  ;;  %7585 = vst [vmem:[#allocation48_spill] sm:$0xff] %v5191_v61  ;;  %v5195_v48 = vpop.eup %4447  ;;  %v790_v57 = vpop.f32.mrf.mxu2  ;;  %4455 = vtanh.f32 %v688_v18 }
 0x11e   : > { %7587 = vst [vmem:[#allocation50_spill] sm:$0xff] %v5195_v48  ;;  %v5210_v47 = vpop.eup %4449  ;;  %v5214_v33 = vpop.permute.xlu1 %4326 }
 0x11f   : > { %7589 = vst [vmem:[#allocation52_spill] sm:$0xff] %v5199_v17  ;;  %v5218_v39 = vpop.permute.xlu0 %4331 }
 0x120   : > { %7591 = vst [vmem:[#allocation54_spill] sm:$0xff] %v5214_v33 }
 0x121   : > { %v5212_v22 = vpop.eup %4451  ;;  %7592 = vst [vmem:[#allocation55_spill] sm:$0xff] %v5218_v39 }
 0x122   : > { %v690_v1 = vpop.f32.mrf.mxu0  ;;  %7590 = vst [vmem:[#allocation53_spill] sm:$0xff] %v5212_v22  ;;  %v5216_v56 = vpop.eup %4453 }
 0x123   : > { %968 = vadd.xlane.f32.xlu0 %v898_v8  ;;  %v818_v8 = vpop.f32.mrf.mxu3  ;;  %v931_v18 = vmul.f32 %v5216_v56, %v5216_v56  ;;  %v5230_v33 = vpop.eup %4455 }
 0x124   : > { %1050 = vadd.xlane.f32.xlu2 %v939_v20  ;;  %1030 = vadd.xlane.f32.xlu1 %v929_v3  ;;  %v950_v20 = vmul.f32 %v5191_v61, %v5191_v61  ;;  %v940_v3 = vmul.f32 %v5195_v48, %v5195_v48  ;;  %4457 = vtanh.f32 %v818_v8  ;;  %v5220_v10 = vpop.permute.xlu2 %4336 }
 0x125   : > { %7593 = vst [vmem:[#allocation56_spill] sm:$0xff] %v5220_v10  ;;  %4459 = vtanh.f32 %v790_v57  ;;  %v793_v8 = vpop.f32.mrf.mxu2 }
 0x126   : > { %v5236_v39 = vpop.permute.xlu1 %4341 }
 0x127   : > { %7596 = vst [vmem:[#allocation59_spill] sm:$0xff] %v5236_v39 }
 0x12a   : > { %v5208_v12 = vpop.f32.mrf.mxu0  ;;  %v5232_v57 = vpop.eup %4457 }
 0x12b   : > { %1052 = vadd.xlane.f32.xlu0 %v940_v3  ;;  %v820_v3 = vpop.f32.mrf.mxu3  ;;  %7594 = vst [vmem:[#allocation57_spill] sm:$0xff] %v5232_v57  ;;  %v5234_v10 = vpop.eup %4459  ;;  %v952_v40 = vmul.f32 %v5232_v57, %v5232_v57 }
 0x12c   : > { %1032 = vadd.xlane.f32.xlu2 %v930_v0  ;;  %1072 = vadd.xlane.f32.xlu1 %v950_v20  ;;  %v899_v0 = vmul.f32 %v5210_v47, %v5210_v47  ;;  %v768_v20 = vpop.f32.mrf.mxu1  ;;  %7595 = vst [vmem:[#allocation58_spill] sm:$0xff] %v5234_v10 }
 0x12d   : > { %732 = vmatmul.bf16.gmra.mxu0 %v4117_v63  ;;  %v951_v63 = vmul.f32 %v5212_v22, %v5212_v22  ;;  %4461 = vtanh.f32 %v768_v20 }
 0x12e   : > { %4463 = vtanh.f32 %v793_v8  ;;  %v5249_v8 = vpop.permute.xlu2 %4351 }
 0x12f   : > { %4465 = vtanh.f32 %v690_v1  ;;  %7598 = vst [vmem:[#allocation61_spill] sm:$0xff] %v5249_v8  ;;  %v795_v1 = vpop.f32.mrf.mxu2 }
 0x132   : > { %v5222_v59 = vpop.f32.mrf.mxu0 }
 0x133   : > { %1034 = vadd.xlane.f32.xlu0 %v931_v18  ;;  %v5245_v18 = vpop.permute.xlu0 %4346  ;;  %v823_v20 = vpop.f32.mrf.mxu3 }
 0x134   : > { %1074 = vadd.xlane.f32.xlu2 %v951_v63  ;;  %970 = vadd.xlane.f32.xlu1 %v899_v0  ;;  %v900_v63 = vmul.f32 %v5230_v33, %v5230_v33  ;;  %v941_v0 = vmul.f32 %v5234_v10, %v5234_v10  ;;  %7597 = vst [vmem:[#allocation60_spill] sm:$0xff] %v5245_v18  ;;  %v5247_v58 = vpop.eup %4461  ;;  %v770_v39 = vpop.f32.mrf.mxu1 }
 0x135   : > { %v5251_v49 = vpop.eup %4463  ;;  %4467 = vtanh.f32 %v770_v39  ;;  %v932_v17 = vmul.f32 %v5247_v58, %v5247_v58 }
 0x136   : > { %7599 = vst [vmem:[#allocation62_spill] sm:$0xff] %v5251_v49  ;;  %v5253_v15 = vpop.eup %4465  ;;  %4469 = vtanh.f32 %v795_v1  ;;  %v942_v18 = vmul.f32 %v5251_v49, %v5251_v49  ;;  %v5269_v31 = vpop.permute.xlu2 %4366 }
 0x137   : > { %4471 = vtanh.f32 %v820_v3  ;;  %7603 = vst [vmem:[#allocation66_spill] sm:$0xff] %v5269_v31 }
 0x138   : > { %4473 = vtanh.f32 %v823_v20 }
 0x13a   : > { %v698_v46 = vpop.f32.mrf.mxu0 }
 0x13b   : > { %1076 = vadd.xlane.f32.xlu0 %v952_v40  ;;  %v901_v40 = vmul.f32 %v5253_v15, %v5253_v15  ;;  %v5265_v39 = vpop.permute.xlu0 %4361 }
 0x13c   : > { %972 = vadd.xlane.f32.xlu2 %v900_v63  ;;  %1054 = vadd.xlane.f32.xlu1 %v941_v0  ;;  %v5259_v63 = vpop.permute.xlu1 %4356  ;;  %7601 = vst [vmem:[#allocation64_spill] sm:$0xff] %v5265_v39  ;;  %v825_v0 = vpop.f32.mrf.mxu3 }
 0x13d   : > { %737 = vmatmul.bf16.gmra.mxu0 %v4118_v37  ;;  %7600 = vst [vmem:[#allocation63_spill] sm:$0xff] %v5259_v63  ;;  %v5263_v37 = vpop.eup %4467  ;;  %4475 = vtanh.f32 %v825_v0 }
 0x13e   : > { %v5267_v1 = vpop.eup %4469  ;;  %4477 = vtanh.f32 %v5208_v12  ;;  %v933_v39 = vmul.f32 %v5263_v37, %v5263_v37  ;;  %v5292_v7 = vpop.permute.xlu2 %4381 }
 0x13f   : > { %7602 = vst [vmem:[#allocation65_spill] sm:$0xff] %v5267_v1  ;;  %v5271_v3 = vpop.eup %4471  ;;  %4479 = vtanh.f32 %v5222_v59 }
 0x140   : > { %7604 = vst [vmem:[#allocation67_spill] sm:$0xff] %v5271_v3  ;;  %v5281_v31 = vpop.eup %4473 }
 0x141   : > { %7605 = vst [vmem:[#allocation68_spill] sm:$0xff] %v5281_v31 }
 0x142   : > { %v700_v8 = vpop.f32.mrf.mxu0  ;;  %7610 = vst [vmem:[#allocation73_spill] sm:$0xff] %v5292_v7 }
 0x143   : > { %974 = vadd.xlane.f32.xlu0 %v901_v40  ;;  %v953_v40 = vmul.f32 %v5271_v3, %v5271_v3  ;;  %v5285_v12 = vpop.eup %4475  ;;  %v5289_v0 = vpop.permute.xlu0 %4376  ;;  %4481 = vtanh.f32 %v700_v8 }
 0x144   : > { %1056 = vadd.xlane.f32.xlu2 %v942_v18  ;;  %1036 = vadd.xlane.f32.xlu1 %v932_v17  ;;  %v943_v18 = vmul.f32 %v5267_v1, %v5267_v1  ;;  %v4119_v17 = vld [vmem:[%s4868_s19 + $0x78] sm:$0xff]  ;;  %v5283_v38 = vpop.permute.xlu1 %4371  ;;  %7607 = vst [vmem:[#allocation70_spill] sm:$0xff] %v5285_v12  ;;  %v5287_v20 = vpop.eup %4477  ;;  %4483 = vtanh.f32 %v698_v46  ;;  %s3912_s19 = sshll.u32 %s4861_s11, 5 }
 0x145   : > { %7606 = vst [vmem:[#allocation69_spill] sm:$0xff] %v5283_v38  ;;  %s7371_s26 = scalar_lea.vmem [#allocation6], %s3912_s19 }
 0x146   : > { %7608 = vst [vmem:[#allocation71_spill] sm:$0xff] %v5287_v20  ;;  %s3804_s16 = sshll.u32 %s7371_s26, 4  ;;  %s3805_s16 = int_to_ptr.vmem [resolvable:$true] %s3804_s16 }
 0x147   : > { %7609 = vst [vmem:[#allocation72_spill] sm:$0xff] %v5289_v0  ;;  %v5300_v0 = vpop.eup %4479 }
 0x148   : > { %7611 = vst [vmem:[#allocation74_spill] sm:$0xff] %v5300_v0 }
 0x149   : > { %v5302_v59 = vpop.eup %4481 }
 0x14a   : > { %v703_v63 = vpop.f32.mrf.mxu0  ;;  %7612 = vst [vmem:[#allocation75_spill] sm:$0xff] %v5302_v59  ;;  %v5306_v8 = vpop.eup %4483 }
 0x14b   : > { %1058 = vadd.xlane.f32.xlu0 %v943_v18  ;;  %4485 = vtanh.f32 %v703_v63  ;;  %7614 = vst [vmem:[#allocation77_spill] sm:$0xff] %v5306_v8 }
 0x14c   : > { %1038 = vadd.xlane.f32.xlu2 %v933_v39  ;;  %1078 = vadd.xlane.f32.xlu1 %v953_v40  ;;  %v954_v39 = vmul.f32 %v5281_v31, %v5281_v31  ;;  %v955_v40 = vmul.f32 %v5285_v12, %v5285_v12  ;;  %v5304_v7 = vpop.permute.xlu1 %4386 }
 0x14d   : > { %742 = vmatmul.bf16.gmra.mxu0 %v4119_v17  ;;  %v902_v17 = vmul.f32 %v5287_v20, %v5287_v20  ;;  %7613 = vst [vmem:[#allocation76_spill] sm:$0xff] %v5304_v7 }
 0x151   : > { %v5314_v63 = vpop.eup %4485 }
 0x152   : > { %v705_v18 = vpop.f32.mrf.mxu0  ;;  %7615 = vst [vmem:[#allocation78_spill] sm:$0xff] %v5314_v63  ;;  %v906_v36 = vmul.f32 %v5314_v63, %v5314_v63 }
 0x153   : > { %1082 = vadd.xlane.f32.xlu0 %v955_v40  ;;  %4487 = vtanh.f32 %v705_v18  ;;  %v905_v40 = vmul.f32 %v5302_v59, %v5302_v59 }
 0x154   : > { %1080 = vadd.xlane.f32.xlu2 %v954_v39  ;;  %976 = vadd.xlane.f32.xlu1 %v902_v17  ;;  %v903_v39 = vmul.f32 %v5300_v0, %v5300_v0  ;;  %v904_v17 = vmul.f32 %v5306_v8, %v5306_v8 }
 0x156   : > { %v957_v38 = vpop.xlane.xlu0 %956 }
 0x157   : > { %v1084_v19 = vadd.f32 1e-12, %v957_v38 }
 0x158   : > { %v1021_v51 = vpop.xlane.xlu2 %1020 }
 0x159   : > { %v1116_v46 = vadd.f32 1e-12, %v1021_v51  ;;  %4489 = vrsqrt.f32 %v1084_v19  ;;  %v5316_v38 = vpop.eup %4487  ;;  %vm1154_vm12 = vweird.f32 %v1084_v19 }
 0x15a   : > { %v708_v54 = vpop.f32.mrf.mxu0  ;;  %7616 = vst [vmem:[#allocation79_spill] sm:$0xff] %v5316_v38 }
 0x15b   : > { %4491 = vrsqrt.f32 %v1116_v46  ;;  %980 = vadd.xlane.f32.xlu0 %v904_v17  ;;  %vm1474_vm9 = vweird.f32 %v1116_v46 }
 0x15c   : > { %4493 = vtanh.f32 %v708_v54  ;;  %978 = vadd.xlane.f32.xlu2 %v903_v39  ;;  %982 = vadd.xlane.f32.xlu1 %v905_v40  ;;  %v907_v40 = vmul.f32 %v5316_v38, %v5316_v38 }
 0x15e   : > { %v5320_v18 = vpop.xlane.xlu0 %1040 }
 0x15f   : > { %v5318_v51 = vpop.xlane.xlu1 %1060  ;;  %v4490_v7 = vpop.eup %4489 }
 0x160   : > { %v1149_v12 = vmul.f32 %v4490_v7, %v1084_v19  ;;  %vm1155_vm13 = vweird.f32 %v4490_v7 }
 0x161   : > { %v4492_v27 = vpop.eup %4491  ;;  %vm1156_vm14 = vmor %vm1154_vm12, %vm1155_vm13 }
 0x162   : > { %v5324_v42 = vpop.eup %4493  ;;  %v1469_v54 = vmul.f32 %v4492_v27, %v1116_v46  ;;  %v710_v39 = vpop.f32.mrf.mxu0  ;;  %v1150_v3 = vmul.f32 %v4490_v7, %v1149_v12  ;;  %vm1475_vm10 = vweird.f32 %v4492_v27 }
 0x163   : > { %7617 = vst [vmem:[#allocation80_spill] sm:$0xff] %v5324_v42  ;;  %v908_v17 = vmul.f32 %v5324_v42, %v5324_v42  ;;  %4495 = vtanh.f32 %v710_v39  ;;  %986 = vadd.xlane.f32.xlu0 %v907_v40  ;;  %vm1476_vm11 = vmor %vm1474_vm9, %vm1475_vm10 }
 0x164   : > { %v1470_v31 = vmul.f32 %v4492_v27, %v1469_v54  ;;  %984 = vadd.xlane.f32.xlu2 %v906_v36  ;;  %v1151_v35 = vmul.f32 0.5, %v1150_v3 }
 0x165   : > { %988 = vadd.xlane.f32.xlu1 %v908_v17 }
 0x166   : > { %v1471_v52 = vmul.f32 0.5, %v1470_v31  ;;  %v959_v62 = vpop.xlane.xlu0 %958  ;;  %v1152_v39 = vsub.f32 1.5, %v1151_v35 }
 0x167   : > { %v5330_v22 = vpop.xlane.xlu2 %1062  ;;  %v5332_v57 = vpop.xlane.xlu1 %1042 }
 0x168   : > { %v1472_v61 = vsub.f32 1.5, %v1471_v52  ;;  %v5340_v52 = vadd.f32 1e-12, %v959_v62  ;;  %v1153_v38 = vmul.f32 %v4490_v7, %v1152_v39 }
 0x169   : > { %v5334_v32 = vpop.eup %4495 }
 0x16a   : > { %7618 = vst [vmem:[#allocation81_spill] sm:$0xff] %v5334_v32  ;;  %v713_v30 = vpop.f32.mrf.mxu0  ;;  %v909_v54 = vmul.f32 %v5334_v32, %v5334_v32  ;;  %v1473_v36 = vmul.f32 %v4492_v27, %v1472_v61  ;;  %v1157_v35 = vsel %vm1156_vm14, %v4490_v7, %v1153_v38  ;;  %vm1164_vm5 = vweird.f32 %v5340_v52 }
 0x16b   : > { %4497 = vtanh.f32 %v713_v30 }
 0x16c   : > { %990 = vadd.xlane.f32.xlu2 %v909_v54  ;;  %v1477_v40 = vsel %vm1476_vm11, %v4492_v27, %v1473_v36  ;;  %4499 = vrsqrt.f32 %v5340_v52  ;;  %v1788_v36 = vmul.f32 %v5049_v2, %v1157_v35 }
 0x16d   : > { %v1820_v3 = vmul.f32 %v5051_v5, %v1477_v40 }
 0x16e   : > { %v1023_v46 = vpop.xlane.xlu0 %1022 }
 0x16f   : > { %v5338_v31 = vpop.xlane.xlu2 %1044  ;;  %v961_v12 = vpop.xlane.xlu1 %960  ;;  %v1117_v17 = vadd.f32 1e-12, %v1023_v46  ;;  %v1884_v30 = vpack.c.bf16 %v1820_v3, %v1820_v3  ;;  %v1852_v3 = vpack.c.bf16 %v1788_v36, %v1788_v36 }
 0x170   : > { %v5361_v46 = vadd.f32 1e-12, %v961_v12 }
 0x171   : > { %v5343_v32 = vpop.eup %4497  ;;  %4501 = vrsqrt.f32 %v1117_v17  ;;  %1923 = vmatpush.bf16.xpose.msrb.mxu1 %v1884_v30  ;;  %vm1484_vm1 = vweird.f32 %v1117_v17 }
 0x172   : > { %v715_v53 = vpop.f32.mrf.mxu0  ;;  %7619 = vst [vmem:[#allocation82_spill] sm:$0xff] %v5343_v32  ;;  %v910_v27 = vmul.f32 %v5343_v32, %v5343_v32  ;;  %v5355_v39 = vpop.eup %4499 }
 0x173   : > { %4503 = vtanh.f32 %v715_v53  ;;  %v1159_v2 = vmul.f32 %v5355_v39, %v5340_v52  ;;  %vm1165_vm3 = vweird.f32 %v5355_v39 }
 0x174   : > { %992 = vadd.xlane.f32.xlu0 %v910_v27  ;;  %vm5429_vm7 = vmor %vm1164_vm5, %vm1165_vm3 }
 0x176   : > { %v5352_v54 = vpop.xlane.xlu0 %1064 }
 0x177   : > { %v1027_v62 = vpop.xlane.xlu2 %1026  ;;  %v1025_v61 = vpop.xlane.xlu1 %1024 }
 0x178   : > { %v5348_v19 = vadd.f32 1e-12, %v1027_v62  ;;  %v5350_v5 = vadd.f32 1e-12, %v1025_v61  ;;  %v4502_v7 = vpop.eup %4501  ;;  %1924 = vmatmul.bf16.vlgmr.msrb.gmra.mxu1 %v1852_v3 }
 0x179   : > { %v5358_v38 = vpop.eup %4503  ;;  %v1479_v40 = vmul.f32 %v4502_v7, %v1117_v17  ;;  %vm1485_vm15 = vweird.f32 %v4502_v7 }
 0x17a   : > { %4505 = vrsqrt.f32 %v5348_v19  ;;  %v718_v53 = vpop.f32.mrf.mxu0  ;;  %7620 = vst [vmem:[#allocation83_spill] sm:$0xff] %v5358_v38  ;;  %v911_v30 = vmul.f32 %v5358_v38, %v5358_v38  ;;  %vm1486_vm2 = vmor %vm1484_vm1, %vm1485_vm15  ;;  %vm1504_vm8 = vweird.f32 %v5348_v19  ;;  %vm1494_vm10 = vweird.f32 %v5350_v5 }
 0x17b   : > { %4507 = vrsqrt.f32 %v5350_v5  ;;  %v1480_v35 = vmul.f32 %v4502_v7, %v1479_v40  ;;  %v1160_v40 = vmul.f32 %v5355_v39, %v1159_v2  ;;  %vm1174_vm1 = vweird.f32 %v5361_v46 }
 0x17c   : > { %4509 = vtanh.f32 %v718_v53  ;;  %994 = vadd.xlane.f32.xlu1 %v911_v30 }
 0x17d   : > { %v1481_v32 = vmul.f32 0.5, %v1480_v35  ;;  %4511 = vrsqrt.f32 %v5361_v46  ;;  %v1161_v2 = vmul.f32 0.5, %v1160_v40 }
 0x17e   : > { %v5371_v12 = vpop.xlane.xlu0 %1046 }
 0x17f   : > { %v965_v27 = vpop.xlane.xlu2 %964  ;;  %v963_v62 = vpop.xlane.xlu1 %962  ;;  %v1482_v3 = vsub.f32 1.5, %v1481_v32 }
 0x180   : > { %v5367_v61 = vpop.eup %4505  ;;  %v5369_v42 = vadd.f32 1e-12, %v963_v62  ;;  %v5413_v20 = vadd.f32 1e-12, %v965_v27 }
 0x181   : > { %v1499_v36 = vmul.f32 %v5367_v61, %v5348_v19  ;;  %v5376_v53 = vpop.eup %4507  ;;  %v1483_v62 = vmul.f32 %v4502_v7, %v1482_v3  ;;  %vm1505_vm4 = vweird.f32 %v5367_v61 }
 0x182   : > { %v720_v30 = vpop.f32.mrf.mxu0  ;;  %v5379_v38 = vpop.eup %4509  ;;  %v1489_v35 = vmul.f32 %v5376_v53, %v5350_v5  ;;  %4513 = vrsqrt.f32 %v5369_v42  ;;  %vm1495_vm6 = vweird.f32 %v5376_v53  ;;  %vm5436_vm9 = vmor %vm1504_vm8, %vm1505_vm4  ;;  %vm1184_vm13 = vweird.f32 %v5369_v42 }
 0x183   : > { %7621 = vst [vmem:[#allocation84_spill] sm:$0xff] %v5379_v38  ;;  %v1500_v14 = vmul.f32 %v5367_v61, %v1499_v36  ;;  %v912_v63 = vmul.f32 %v5379_v38, %v5379_v38  ;;  %v5388_v32 = vpop.eup %4511  ;;  %v1487_v59 = vsel %vm1486_vm2, %v4502_v7, %v1483_v62  ;;  %v5397_v38 = vadd.f32 1e-12, %v5318_v51  ;;  %vm1496_vm11 = vmor %vm1494_vm10, %vm1495_vm6 }
 0x184   : > { %v1490_v49 = vmul.f32 %v5376_v53, %v1489_v35  ;;  %v1169_v17 = vmul.f32 %v5388_v32, %v5361_v46  ;;  %v1162_v35 = vsub.f32 1.5, %v1161_v2  ;;  %v5405_v7 = vadd.f32 1e-12, %v5320_v18 }
 0x185   : > { %996 = vadd.xlane.f32.xlu2 %v912_v63  ;;  %v1501_v1 = vmul.f32 0.5, %v1500_v14  ;;  %v1821_v14 = vmul.f32 %v5092_v43, %v1487_v59  ;;  %4515 = vrsqrt.f32 %v5397_v38  ;;  %vm1175_vm14 = vweird.f32 %v5388_v32 }
 0x186   : > { %v1491_v10 = vmul.f32 0.5, %v1490_v49  ;;  %v1029_v0 = vpop.xlane.xlu0 %1028  ;;  %v1170_v51 = vmul.f32 %v5388_v32, %v1169_v17  ;;  %vm1176_vm2 = vmor %vm1174_vm1, %vm1175_vm14 }
 0x187   : > { %v5390_v36 = vpop.xlane.xlu2 %1068  ;;  %v5392_v8 = vpop.xlane.xlu1 %1066  ;;  %v1502_v48 = vsub.f32 1.5, %v1501_v1  ;;  %v5408_v21 = vadd.f32 1e-12, %v1029_v0  ;;  %v1885_v43 = vpack.c.bf16 %v1821_v14, %v1821_v14  ;;  %v1163_v0 = vmul.f32 %v5355_v39, %v1162_v35 }
 0x188   : > { %v5394_v3 = vpop.eup %4513  ;;  %v1492_v49 = vsub.f32 1.5, %v1491_v10  ;;  %v1171_v17 = vmul.f32 0.5, %v1170_v51 }
 0x189   : > { %v1179_v63 = vmul.f32 %v5394_v3, %v5369_v42  ;;  %4517 = vrsqrt.f32 %v5408_v21  ;;  %v1503_v1 = vmul.f32 %v5367_v61, %v1502_v48  ;;  %1936 = vmatpush.bf16.xpose.msrb.mxu2 %v1885_v43  ;;  %vm1185_vm12 = vweird.f32 %v5394_v3 }
 0x18a   : > { %v723_v40 = vpop.f32.mrf.mxu0  ;;  %4519 = vrsqrt.f32 %v5405_v7  ;;  %v1493_v27 = vmul.f32 %v5376_v53, %v1492_v49  ;;  %v1172_v43 = vsub.f32 1.5, %v1171_v17  ;;  %v5470_v48 = vadd.f32 1e-12, %v5330_v22  ;;  %vm5483_vm15 = vmor %vm1184_vm13, %vm1185_vm12 }
 0x18b   : > { %v1180_v62 = vmul.f32 %v5394_v3, %v1179_v63  ;;  %4521 = vtanh.f32 %v720_v30  ;;  %v5442_v14 = vpop.eup %4515  ;;  %v1507_v35 = vsel %vm5436_vm9, %v5367_v61, %v1503_v1  ;;  %v1167_v30 = vsel %vm5429_vm7, %v5355_v39, %v1163_v0 }
 0x18c   : > { %4523 = vrsqrt.f32 %v5413_v20  ;;  %7626 = vst [vmem:[#allocation85_spill] sm:$0xff] %v5442_v14  ;;  %v1497_v5 = vsel %vm1496_vm11, %v5376_v53, %v1493_v27  ;;  %v1823_v61 = vmul.f32 %v5105_v50, %v1507_v35  ;;  %v1669_v35 = vmul.f32 %v5442_v14, %v5397_v38 }
 0x18d   : > { %v1181_v10 = vmul.f32 0.5, %v1180_v62  ;;  %4525 = vtanh.f32 %v723_v40  ;;  %v1822_v52 = vmul.f32 %v5103_v29, %v1497_v5  ;;  %v1789_v40 = vmul.f32 %v5072_v25, %v1167_v30  ;;  %7628 = vst [vmem:[#allocation87_spill] sm:$0xff] %v5470_v48 }
 0x18e   : > { %v5425_v2 = vpop.xlane.xlu0 %1070  ;;  %v1887_v50 = vpack.c.bf16 %v1823_v61, %v1823_v61  ;;  %v5478_v5 = vadd.f32 1e-12, %v5332_v57  ;;  %v1173_v42 = vmul.f32 %v5388_v32, %v1172_v43  ;;  %vm1514_vm3 = vweird.f32 %v5408_v21 }
 0x18f   : > { %v967_v59 = vpop.xlane.xlu2 %966  ;;  %v5418_v18 = vpop.xlane.xlu1 %1048  ;;  %v1182_v19 = vsub.f32 1.5, %v1181_v10  ;;  %v1886_v29 = vpack.c.bf16 %v1822_v52, %v1822_v52  ;;  %v1853_v30 = vpack.c.bf16 %v1789_v40, %v1789_v40  ;;  %vm1675_vm6 = vweird.f32 %v5442_v14 }
 0x190   : > { %v5450_v49 = vpop.eup %4517  ;;  %1962 = vmatpush.bf16.xpose.msra.mxu1 %v1887_v50  ;;  %v5495_v40 = vadd.f32 1e-12, %v967_v59  ;;  %v1177_v59 = vsel %vm1176_vm2, %v5388_v32, %v1173_v42  ;;  %vm1194_vm7 = vweird.f32 %v5413_v20  ;;  %vm1674_vm9 = vweird.f32 %v5397_v38 }
 0x191   : > { %v1509_v62 = vmul.f32 %v5450_v49, %v5408_v21  ;;  %v5455_v51 = vpop.eup %4519  ;;  %v1183_v39 = vmul.f32 %v5394_v3, %v1182_v19  ;;  %1949 = vmatpush.bf16.xpose.msrb.mxu3 %v1886_v29  ;;  %1937 = vmatmul.bf16.vlgmr.msrb.gmra.mxu2 %v1853_v30  ;;  %v1670_v29 = vmul.f32 %v5442_v14, %v1669_v35  ;;  %vm1515_vm4 = vweird.f32 %v5450_v49  ;;  %vm5632_vm12 = vmor %vm1674_vm9, %vm1675_vm6 }
 0x192   : > { %v725_v63 = vpop.f32.mrf.mxu0  ;;  %v5460_v1 = vpop.eup %4521  ;;  %vm5550_vm5 = vmor %vm1514_vm3, %vm1515_vm4  ;;  %vm1575_vm10 = vweird.f32 %v5455_v51  ;;  %vm1574_vm13 = vweird.f32 %v5405_v7 }
 0x193   : > { %7627 = vst [vmem:[#allocation86_spill] sm:$0xff] %v5460_v1  ;;  %v1510_v53 = vmul.f32 %v5450_v49, %v1509_v62  ;;  %v5467_v27 = vpop.eup %4523  ;;  %v913_v62 = vmul.f32 %v5460_v1, %v5460_v1  ;;  %v1187_v61 = vsel %vm5483_vm15, %v5394_v3, %v1183_v39  ;;  %4527 = vtanh.f32 %v725_v63  ;;  %vm5657_vm14 = vmor %vm1574_vm13, %vm1575_vm10 }
 0x194   : > { %v5472_v25 = vpop.eup %4525  ;;  %v1189_v57 = vmul.f32 %v5467_v27, %v5413_v20  ;;  %4529 = vrsqrt.f32 %v5470_v48  ;;  %v1791_v46 = vmul.f32 %v5123_v6, %v1187_v61  ;;  %v4231_v63 = vunpack.i.l.bf16 %v5061_v13 }
 0x195   : > { %7629 = vst [vmem:[#allocation88_spill] sm:$0xff] %v5472_v25  ;;  %v1511_v19 = vmul.f32 0.5, %v1510_v53  ;;  %v1569_v53 = vmul.f32 %v5455_v51, %v5405_v7  ;;  %998 = vadd.xlane.f32.xlu0 %v913_v62  ;;  %v914_v43 = vmul.f32 %v5472_v25, %v5472_v25  ;;  %4531 = vrsqrt.f32 %v5478_v5 }
 0x196   : > { %v969_v17 = vpop.xlane.xlu0 %968  ;;  %v1190_v50 = vmul.f32 %v5467_v27, %v1189_v57  ;;  %4533 = vrsqrt.f32 %v5495_v40  ;;  %v1790_v62 = vmul.f32 %v5088_v41, %v1177_v59  ;;  %v1855_v42 = vpack.c.bf16 %v1791_v46, %v1791_v46 }
 0x197   : > { %v5465_v10 = vpop.xlane.xlu2 %1050  ;;  %v1031_v0 = vpop.xlane.xlu1 %1030  ;;  %v1512_v3 = vsub.f32 1.5, %v1511_v19  ;;  %1000 = vadd.xlane.f32.xlu1 %v914_v43  ;;  %v2588_v19 = vperm.slane %v4911_v28, 0  ;;  %v1570_v22 = vmul.f32 %v5455_v51, %v1569_v53  ;;  %v1671_v61 = vmul.f32 0.5, %v1670_v29 }
 0x198   : > { %v5508_v39 = vadd.f32 1e-12, %v1031_v0  ;;  %v1854_v43 = vpack.c.bf16 %v1790_v62, %v1790_v62  ;;  %v5528_v53 = vadd.f32 1e-12, %v969_v17  ;;  %v1191_v1 = vmul.f32 0.5, %v1190_v50  ;;  %1963 = vmatmul.bf16.vlgmr.msra.gmra.mxu1 %v1855_v42 }
 0x199   : > { %v1513_v0 = vmul.f32 %v5450_v49, %v1512_v3  ;;  %v5526_v57 = vpop.eup %4527  ;;  %v1571_v62 = vmul.f32 0.5, %v1570_v22  ;;  %v1672_v17 = vsub.f32 1.5, %v1671_v61  ;;  %v5566_v6 = vadd.f32 1e-12, %v5352_v54 }
 0x19a   : > { %v728_v52 = vpop.f32.mrf.mxu0  ;;  %4535 = vrsqrt.f32 %v5508_v39  ;;  %7632 = vst [vmem:[#allocation89_spill] sm:$0xff] %v5526_v57  ;;  %v5532_v59 = vpop.eup %4529  ;;  %v915_v3 = vmul.f32 %v5526_v57, %v5526_v57  ;;  %1950 = vmatmul.bf16.vlgmr.msrb.gmra.mxu3 %v1854_v43  ;;  %v7637_v43 = vrot.slane %v4911_v28, 1  ;;  %v5584_v50 = vadd.f32 1e-12, %v5371_v12 }
 0x19b   : > { %4537 = vtanh.f32 %v728_v52  ;;  %v5539_v46 = vpop.eup %4531  ;;  %v5544_v52 = vadd.f32 1e-12, %v5338_v31  ;;  %v1517_v42 = vsel %vm5550_vm5, %v5450_v49, %v1513_v0  ;;  %v5561_v31 = vmul.f32 %v4231_v63, %v2588_v19  ;;  %7636 = vst [vmem:[#allocation91_spill] sm:$0xff] %v5566_v6 }
 0x19c   : > { %4539 = vrsqrt.f32 %v5528_v53  ;;  %1002 = vadd.xlane.f32.xlu2 %v915_v3  ;;  %v5570_v29 = vperm.slane %v7637_v43, 0  ;;  %v1679_v49 = vmul.f32 %v5532_v59, %v5470_v48  ;;  %v1192_v0 = vsub.f32 1.5, %v1191_v1 }
 0x19d   : > { %7635 = vst [vmem:[#allocation90_spill] sm:$0xff] %v5561_v31  ;;  %v1824_v1 = vmul.f32 %v5142_v34, %v1517_v42  ;;  %v1572_v57 = vsub.f32 1.5, %v1571_v62  ;;  %v1579_v12 = vmul.f32 %v5539_v46, %v5478_v5  ;;  %vm1195_vm8 = vweird.f32 %v5467_v27 }
 0x19e   : > { %v5520_v32 = vpop.xlane.xlu0 %1052  ;;  %7638 = vst [vmem:[#allocation92_spill] sm:$0xff] %v5570_v29  ;;  %v5596_v29 = vmul.f32 %v5442_v14, %v1672_v17  ;;  %v1193_v62 = vmul.f32 %v5467_v27, %v1192_v0  ;;  %vm5620_vm11 = vmor %vm1194_vm7, %vm1195_vm8  ;;  %vm1524_vm1 = vweird.f32 %v5508_v39  ;;  %vm1585_vm3 = vweird.f32 %v5539_v46 }
 0x19f   : > { %v1033_v35 = vpop.xlane.xlu2 %1032  ;;  %v5514_v30 = vpop.xlane.xlu1 %1072  ;;  %v1888_v34 = vpack.c.bf16 %v1824_v1, %v1824_v1  ;;  %v5613_v0 = vmul.f32 %v5455_v51, %v1572_v57  ;;  %v7644_v57 = vmov 0  ;;  %v1580_v20 = vmul.f32 %v5539_v46, %v1579_v12 }
 0x1a0   : > { %v5537_v25 = vadd.f32 1e-12, %v1033_v35  ;;  %v5555_v35 = vpop.eup %4533  ;;  %7641 = vst [vmem:[#allocation95_spill] sm:$0xff] %v5596_v29  ;;  %v7645_v57 = vsel %vm5632_vm12, 4294967295, %v7644_v57  ;;  %vm1584_vm7 = vweird.f32 %v5478_v5  ;;  %vm1204_vm8 = vweird.f32 %v5495_v40 }
 0x1a1   : > { %v5563_v21 = vpop.eup %4535  ;;  %v1199_v43 = vmul.f32 %v5555_v35, %v5495_v40  ;;  %1975 = vmatpush.bf16.xpose.msra.mxu2 %v1888_v34  ;;  %7646 = vst [vmem:[#allocation96_spill] sm:$0xff] %v7645_v57  ;;  %v5680_v14 = vmul.f32 0.5, %v1580_v20  ;;  %v5687_v57 = vadd.f32 1e-12, %v5418_v18  ;;  %v5703_v18 = vadd.f32 1e-12, %v5390_v36 }
 0x1a2   : > { %v5530_v41 = vpop.f32.mrf.mxu0  ;;  %4541 = vrsqrt.f32 %v5537_v25  ;;  %v1519_v63 = vmul.f32 %v5563_v21, %v5508_v39  ;;  %v5580_v54 = vpop.eup %4537  ;;  %vm1525_vm15 = vweird.f32 %v5563_v21  ;;  %v5706_v20 = vadd.f32 1e-12, %v5392_v8 }
 0x1a3   : > { %7640 = vst [vmem:[#allocation94_spill] sm:$0xff] %v5580_v54  ;;  %4543 = vrsqrt.f32 %v5544_v52  ;;  %v916_v61 = vmul.f32 %v5580_v54, %v5580_v54  ;;  %v5593_v13 = vpop.eup %4539  ;;  %v1680_v54 = vmul.f32 %v5532_v59, %v1679_v49  ;;  %v1200_v17 = vmul.f32 %v5555_v35, %v1199_v43  ;;  %vm5689_vm2 = vmor %vm1524_vm1, %vm1525_vm15 }
 0x1a4   : > { %v1520_v24 = vmul.f32 %v5563_v21, %v1519_v63  ;;  %4545 = vrsqrt.f32 %v5566_v6  ;;  %v1209_v43 = vmul.f32 %v5593_v13, %v5528_v53  ;;  %7655 = vst [vmem:[#allocation100_spill] sm:$0xff] %v5703_v18  ;;  %vm1534_vm4 = vweird.f32 %v5537_v25  ;;  %vm5817_vm1 = vmor %vm1584_vm7, %vm1585_vm3 }
 0x1a5   : > { %1004 = vadd.xlane.f32.xlu0 %v916_v61  ;;  %4547 = vrsqrt.f32 %v5584_v50  ;;  %7656 = vst [vmem:[#allocation101_spill] sm:$0xff] %v5706_v20  ;;  %vm1205_vm6 = vweird.f32 %v5555_v35  ;;  %vm1215_vm13 = vweird.f32 %v5593_v13  ;;  %vm1604_vm7 = vweird.f32 %v5584_v50 }
 0x1a6   : > { %v1035_v22 = vpop.xlane.xlu0 %1034  ;;  %v1521_v63 = vmul.f32 0.5, %v1520_v24  ;;  %4549 = vtanh.f32 %v5530_v41  ;;  %v7647_v41 = vrot.slane %v4911_v28, 3  ;;  %vm5749_vm10 = vmor %vm1204_vm8, %vm1205_vm6 }
 0x1a7   : > { %v5577_v19 = vpop.xlane.xlu2 %1074  ;;  %v971_v3 = vpop.xlane.xlu1 %970 }
 0x1a8   : > { %7639 = vst [vmem:[#allocation93_spill] sm:$0xff] %v5577_v19  ;;  %v5601_v42 = vpop.eup %4541  ;;  %v1522_v24 = vsub.f32 1.5, %v1521_v63  ;;  %v5628_v38 = vadd.f32 1e-12, %v971_v3  ;;  %v1197_v63 = vsel %vm5620_vm11, %v5467_v27, %v1193_v62  ;;  %v5647_v3 = vperm.slane %v7647_v41, 0 }
 0x1a9   : > { %v1529_v31 = vmul.f32 %v5601_v42, %v5537_v25  ;;  %v5616_v61 = vpop.eup %4543  ;;  %v5661_v27 = vmul.f32 0.5, %v1680_v54  ;;  %v1201_v62 = vmul.f32 0.5, %v1200_v17  ;;  %v1577_v41 = vsel %vm5657_vm14, %v5455_v51, %v5613_v0 }
 0x1aa   : > { %v733_v1 = vpop.f32.mrf.mxu0  ;;  %7648 = vst [vmem:[#allocation97_spill] sm:$0xff] %v5647_v3  ;;  %v5649_v19 = vpop.eup %4545  ;;  %v1589_v7 = vmul.f32 %v5616_v61, %v5544_v52  ;;  %v1523_v3 = vmul.f32 %v5563_v21, %v1522_v24  ;;  %v1210_v54 = vmul.f32 %v5593_v13, %v1209_v43  ;;  %4551 = vrsqrt.f32 %v5628_v38 }
 0x1ab   : > { %v1530_v34 = vmul.f32 %v5601_v42, %v1529_v31  ;;  %v5673_v29 = vpop.eup %4547  ;;  %v5677_v17 = vadd.f32 1e-12, %v1035_v22  ;;  %4553 = vtanh.f32 %v733_v1  ;;  %v1202_v12 = vsub.f32 1.5, %v1201_v62 }
 0x1ac   : > { %v5683_v0 = vpop.eup %4549  ;;  %v1689_v39 = vmul.f32 %v5649_v19, %v5566_v6  ;;  %v1599_v22 = vmul.f32 %v5673_v29, %v5584_v50  ;;  %v1527_v1 = vsel %vm5689_vm2, %v5563_v21, %v1523_v3  ;;  %vm1535_vm5 = vweird.f32 %v5601_v42 }
 0x1ad   : > { %v1531_v49 = vmul.f32 0.5, %v1530_v34  ;;  %v1792_v34 = vmul.f32 %v5121_v4, %v1197_v63  ;;  %7652 = vst [vmem:[#allocation99_spill] sm:$0xff] %v5683_v0  ;;  %4555 = vrsqrt.f32 %v5677_v17  ;;  %v1590_v4 = vmul.f32 %v5616_v61, %v1589_v7  ;;  %vm5743_vm9 = vmor %vm1534_vm4, %vm1535_vm5 }
 0x1ae   : > { %v5663_v28 = vpop.xlane.xlu0 %1076  ;;  %v1211_v63 = vmul.f32 0.5, %v1210_v54  ;;  %v917_v21 = vmul.f32 %v5683_v0, %v5683_v0  ;;  %v1203_v8 = vmul.f32 %v5555_v35, %v1202_v12  ;;  %4557 = vrsqrt.f32 %v5687_v57 }
 0x1af   : > { %v5641_v48 = vpop.xlane.xlu2 %972  ;;  %v5643_v31 = vpop.xlane.xlu1 %1054  ;;  %7651 = vst [vmem:[#allocation98_spill] sm:$0xff] %v5663_v28  ;;  %v1532_v51 = vsub.f32 1.5, %v1531_v49  ;;  %v1856_v62 = vpack.c.bf16 %v1792_v34, %v1792_v34  ;;  %v1825_v54 = vmul.f32 %v5177_v45, %v1527_v1  ;;  %v5726_v24 = vmul.f32 0.5, %v1590_v4 }
 0x1b0   : > { %v5716_v43 = vpop.eup %4551  ;;  %v1600_v0 = vmul.f32 %v5673_v29, %v1599_v22  ;;  %1006 = vadd.xlane.f32.xlu1 %v917_v21  ;;  %v5732_v12 = vmul.f32 %v5057_v11, %v1577_v41  ;;  %v1690_v45 = vmul.f32 %v5649_v19, %v1689_v39  ;;  %4559 = vrsqrt.f32 %v5703_v18 }
 0x1b1   : > { %v1533_v7 = vmul.f32 %v5601_v42, %v1532_v51  ;;  %1976 = vmatmul.bf16.vlgmr.msra.gmra.mxu2 %v1856_v62  ;;  %v5722_v34 = vpop.eup %4553  ;;  %v1582_v51 = vsub.f32 1.5, %v5680_v14  ;;  %v1212_v14 = vsub.f32 1.5, %v1211_v63  ;;  %v5754_v41 = vadd.f32 1e-12, %v5465_v10 }
 0x1b2   : > { %v735_v49 = vpop.f32.mrf.mxu0  ;;  %7657 = vst [vmem:[#allocation102_spill] sm:$0xff] %v5722_v34  ;;  %vm1594_vm11 = vweird.f32 %v5544_v52  ;;  %v1207_v39 = vsel %vm5749_vm10, %v5555_v35, %v1203_v8  ;;  %v1219_v10 = vmul.f32 %v5716_v43, %v5628_v38  ;;  %v1889_v22 = vpack.c.bf16 %v1825_v54, %v1825_v54 }
 0x1b3   : > { %v5734_v6 = vpop.eup %4555  ;;  %v1537_v40 = vsel %vm5743_vm9, %v5601_v42, %v1533_v7  ;;  %4561 = vtanh.f32 %v735_v49  ;;  %v1601_v1 = vmul.f32 0.5, %v1600_v0  ;;  %v5769_v63 = vadd.f32 1e-12, %v5520_v32 }
 0x1b4   : > { %v1539_v25 = vmul.f32 %v5734_v6, %v5677_v17  ;;  %4563 = vrsqrt.f32 %v5706_v20  ;;  %v918_v62 = vmul.f32 %v5722_v34, %v5722_v34  ;;  %v5774_v49 = vpop.eup %4557  ;;  %v1213_v7 = vmul.f32 %v5593_v13, %v1212_v14  ;;  %1988 = vmatpush.bf16.xpose.msra.mxu3 %v1889_v22 }
 0x1b5   : > { %v1826_v21 = vmul.f32 %v5189_v23, %v1537_v40  ;;  %v5782_v0 = vmul.f32 %v5539_v46, %v1582_v51  ;;  %4565 = vrsqrt.f32 %v5754_v41  ;;  %v1793_v8 = vmul.f32 %v5160_v60, %v1207_v39 }
 0x1b6   : > { %v5729_v28 = vpop.xlane.xlu0 %974  ;;  %v1540_v42 = vmul.f32 %v5734_v6, %v1539_v25  ;;  %1008 = vadd.xlane.f32.xlu2 %v918_v62  ;;  %v5786_v4 = vpop.eup %4559  ;;  %v1592_v14 = vsub.f32 1.5, %v5726_v24  ;;  %vm1214_vm14 = vweird.f32 %v5528_v53  ;;  %v7664_v51 = vsub.f32 1.5, %v5661_v27 }
 0x1b7   : > { %v5714_v3 = vpop.xlane.xlu2 %1056  ;;  %v1037_v36 = vpop.xlane.xlu1 %1036  ;;  %7662 = vst [vmem:[#allocation103_spill] sm:$0xff] %v5786_v4  ;;  %v5799_v40 = vmul.f32 0.5, %v1690_v45  ;;  %v1609_v60 = vmul.f32 %v5774_v49, %v5687_v57  ;;  %vm5805_vm15 = vmor %vm1214_vm14, %vm1215_vm13  ;;  %v1890_v24 = vpack.c.bf16 %v1826_v21, %v1826_v21  ;;  %v1602_v45 = vsub.f32 1.5, %v1601_v1 }
 0x1b8   : > { %v5778_v35 = vadd.f32 1e-12, %v1037_v36  ;;  %v1541_v32 = vmul.f32 0.5, %v1540_v42  ;;  %v1220_v36 = vmul.f32 %v5716_v43, %v1219_v10  ;;  %v5797_v11 = vmul.f32 %v5532_v59, %v7664_v51 }
 0x1b9   : > { %v5792_v23 = vpop.eup %4561  ;;  %v1217_v22 = vsel %vm5805_vm15, %v5593_v13, %v1213_v7  ;;  %v5826_v42 = vadd.f32 1e-12, %v5641_v48  ;;  %vm1595_vm2 = vweird.f32 %v5616_v61  ;;  %v1857_v21 = vpack.c.bf16 %v1793_v8, %v1793_v8  ;;  %2001 = vmatpush.bf16.xpose.msrb.mxu1 %v1890_v24 }
 0x1ba   : > { %4567 = vrsqrt.f32 %v5778_v35  ;;  %7663 = vst [vmem:[#allocation104_spill] sm:$0xff] %v5792_v23  ;;  %v738_v25 = vpop.f32.mrf.mxu0  ;;  %v5811_v10 = vpop.eup %4563  ;;  %v1542_v5 = vsub.f32 1.5, %v1541_v32  ;;  %v5836_v51 = vmul.f32 %v5616_v61, %v1592_v14  ;;  %v1221_v13 = vmul.f32 0.5, %v1220_v36  ;;  %vm5862_vm4 = vmor %vm1594_vm11, %vm1595_vm2 }
 0x1bb   : > { %7665 = vst [vmem:[#allocation105_spill] sm:$0xff] %v5797_v11  ;;  %4569 = vrsqrt.f32 %v5769_v63  ;;  %v919_v48 = vmul.f32 %v5792_v23, %v5792_v23  ;;  %v5842_v53 = vpop.eup %4565  ;;  %v1692_v62 = vsub.f32 1.5, %v5799_v40  ;;  %vm1605_vm3 = vweird.f32 %v5673_v29  ;;  %1989 = vmatmul.bf16.vlgmr.msra.gmra.mxu3 %v1857_v21 }
 0x1bc   : > { %v1610_v32 = vmul.f32 %v5774_v49, %v1609_v60  ;;  %v1794_v8 = vmul.f32 %v5181_v16, %v1217_v22  ;;  %v5851_v14 = vmul.f32 %v5673_v29, %v1602_v45  ;;  %v1699_v36 = vmul.f32 %v5811_v10, %v5706_v20  ;;  %vm5911_vm9 = vmor %vm1604_vm7, %vm1605_vm3 }
 0x1bd   : > { %4571 = vrsqrt.f32 %v5826_v42  ;;  %1010 = vadd.xlane.f32.xlu0 %v919_v48  ;;  %v1543_v40 = vmul.f32 %v5734_v6, %v1542_v5  ;;  %vm1545_vm5 = vweird.f32 %v5734_v6  ;;  %v1222_v22 = vsub.f32 1.5, %v1221_v13 }
 0x1be   : > { %v5833_v1 = vpop.xlane.xlu0 %1058  ;;  %v5874_v21 = vadd.f32 1e-12, %v5729_v28  ;;  %v1858_v52 = vpack.c.bf16 %v1794_v8, %v1794_v8  ;;  %v1611_v48 = vmul.f32 0.5, %v1610_v32  ;;  %v1619_v23 = vmul.f32 %v5842_v53, %v5754_v41 }
 0x1bf   : > { %v1039_v54 = vpop.xlane.xlu2 %1038  ;;  %v5809_v39 = vpop.xlane.xlu1 %1078  ;;  %vm1544_vm6 = vweird.f32 %v5677_v17  ;;  %v1894_v17 = vpack.c.bf16 %v5732_v12, %v5732_v12  ;;  %v1700_v32 = vmul.f32 %v5811_v10, %v1699_v36  ;;  %v1223_v36 = vmul.f32 %v5716_v43, %v1222_v22 }
 0x1c0   : > { %7668 = vst [vmem:[#allocation106_spill] sm:$0xff] %v5809_v39  ;;  %v5840_v7 = vadd.f32 1e-12, %v1039_v54  ;;  %v5848_v24 = vpop.eup %4567  ;;  %v1709_v54 = vmul.f32 %v5786_v4, %v5703_v18  ;;  %vm5889_vm8 = vmor %vm1544_vm6, %vm1545_vm5  ;;  %2002 = vmatmul.bf16.vlgmr.msrb.gmra.mxu1 %v1858_v52  ;;  %vm1225_vm10 = vweird.f32 %v5716_v43  ;;  %v1612_v52 = vsub.f32 1.5, %v1611_v48 }
 0x1c1   : > { %v1549_v60 = vmul.f32 %v5848_v24, %v5778_v35  ;;  %v5871_v45 = vpop.eup %4569  ;;  %v1547_v50 = vsel %vm5889_vm8, %v5734_v6, %v1543_v40  ;;  %vm1224_vm11 = vweird.f32 %v5628_v38  ;;  %v5935_v20 = vmul.f32 0.5, %v1700_v32 }
 0x1c2   : > { %4573 = vrsqrt.f32 %v5840_v7  ;;  %v1629_v8 = vmul.f32 %v5871_v45, %v5769_v63  ;;  %v740_v13 = vpop.f32.mrf.mxu0  ;;  %v5925_v40 = vmul.f32 %v5786_v4, %v1709_v54  ;;  %vm5940_vm13 = vmor %vm1224_vm11, %vm1225_vm10  ;;  %vm1615_vm14 = vweird.f32 %v5774_v49 }
 0x1c3   : > { %4575 = vtanh.f32 %v738_v25  ;;  %v1550_v5 = vmul.f32 %v5848_v24, %v1549_v60  ;;  %v5894_v25 = vadd.f32 1e-12, %v5643_v31  ;;  %v5904_v39 = vpop.eup %4571  ;;  %v5907_v31 = vmul.f32 %v5649_v19, %v1692_v62 }
 0x1c4   : > { %4577 = vrsqrt.f32 %v5874_v21  ;;  %v1607_v62 = vsel %vm5911_vm9, %v5673_v29, %v5851_v14  ;;  %v1630_v29 = vmul.f32 %v5871_v45, %v1629_v8  ;;  %v1227_v38 = vsel %vm5940_vm13, %v5716_v43, %v1223_v36 }
 0x1c5   : > { %v1551_v60 = vmul.f32 0.5, %v1550_v5  ;;  %7676 = vst [vmem:[#allocation108_spill] sm:$0xff] %v5907_v31  ;;  %v1620_v5 = vmul.f32 %v5842_v53, %v1619_v23  ;;  %4579 = vrsqrt.f32 %v5894_v25  ;;  %v1827_v31 = vmul.f32 %v5216_v56, %v1547_v50 }
 0x1c6   : > { %v5928_v28 = vpop.xlane.xlu0 %1082  ;;  %v1229_v23 = vmul.f32 %v5904_v39, %v5826_v42  ;;  %4581 = vtanh.f32 %v740_v13  ;;  %v5950_v56 = vadd.f32 1e-12, %v5714_v3  ;;  %v5956_v32 = vadd.f32 1e-12, %v5425_v2 }
 0x1c7   : > { %v5880_v34 = vpop.xlane.xlu2 %1080  ;;  %7679 = vst [vmem:[#allocation109_spill] sm:$0xff] %v5928_v28  ;;  %v1552_v18 = vsub.f32 1.5, %v1551_v60  ;;  %v1891_v48 = vpack.c.bf16 %v1827_v31, %v1827_v31  ;;  %v1621_v8 = vmul.f32 0.5, %v1620_v5  ;;  %v5963_v43 = vmul.f32 %v5774_v49, %v1612_v52 }
 0x1c8   : > { %7673 = vst [vmem:[#allocation107_spill] sm:$0xff] %v5880_v34  ;;  %v977_v34 = vpop.xlane.xlu1 %976  ;;  %v5918_v6 = vpop.eup %4573  ;;  %vm1555_vm15 = vweird.f32 %v5848_v24  ;;  %vm1614_vm2 = vweird.f32 %v5687_v57  ;;  %v1631_v2 = vmul.f32 0.5, %v1630_v29  ;;  %v1230_v31 = vmul.f32 %v5904_v39, %v1229_v23 }
 0x1c9   : > { %v5930_v22 = vpop.eup %4575  ;;  %v1559_v54 = vmul.f32 %v5918_v6, %v5840_v7  ;;  %v1553_v3 = vmul.f32 %v5848_v24, %v1552_v18  ;;  %2014 = vmatpush.bf16.xpose.msrb.mxu2 %v1891_v48  ;;  %v5967_v60 = vadd.f32 1e-12, %v977_v34  ;;  %v5972_v12 = vadd.f32 1e-12, %v5833_v1  ;;  %vm6037_vm10 = vmor %vm1614_vm2, %vm1615_vm14 }
 0x1ca   : > { %7680 = vst [vmem:[#allocation110_spill] sm:$0xff] %v5930_v22  ;;  %v920_v13 = vmul.f32 %v5930_v22, %v5930_v22  ;;  %v5960_v50 = vpop.eup %4577  ;;  %v1795_v36 = vmul.f32 %v5210_v47, %v1227_v38  ;;  %vm1624_vm3 = vweird.f32 %v5754_v41  ;;  %v5979_v18 = vadd.f32 1e-12, %v5514_v30  ;;  %v743_v29 = vpop.f32.mrf.mxu0  ;;  %v7709_v41 = vld [vmem:[#allocation93_spill] sm:$0xff] }
 0x1cb   : > { %v5975_v5 = vpop.eup %4579  ;;  %4583 = vrsqrt.f32 %v5950_v56  ;;  %vm1554_vm5 = vweird.f32 %v5778_v35  ;;  %v1560_v34 = vmul.f32 %v5918_v6, %v1559_v54  ;;  %vm1625_vm6 = vweird.f32 %v5842_v53 }
 0x1cc   : > { %1012 = vadd.xlane.f32.xlu1 %v920_v13  ;;  %v5984_v1 = vpop.eup %4581  ;;  %vm5989_vm7 = vmor %vm1554_vm5, %vm1555_vm15  ;;  %v1239_v30 = vmul.f32 %v5960_v50, %v5874_v21  ;;  %4585 = vrsqrt.f32 %v5967_v60  ;;  %v1833_v23 = vmul.f32 %v5127_v9, %v1607_v62  ;;  %v1632_v48 = vsub.f32 1.5, %v1631_v2 }
 0x1cd   : > { %v1557_v14 = vsel %vm5989_vm7, %v5848_v24, %v1553_v3  ;;  %v921_v38 = vmul.f32 %v5984_v1, %v5984_v1  ;;  %4587 = vrsqrt.f32 %v5972_v12  ;;  %v1859_v13 = vpack.c.bf16 %v1795_v36, %v1795_v36 }
 0x1ce   : > { %v981_v22 = vpop.xlane.xlu0 %980  ;;  %v1561_v28 = vmul.f32 0.5, %v1560_v34  ;;  %v1897_v4 = vpack.c.bf16 %v1833_v23, %v1833_v23  ;;  %4589 = vtanh.f32 %v743_v29  ;;  %v1639_v9 = vmul.f32 %v5975_v5, %v5894_v25 }
 0x1cf   : > { %v979_v52 = vpop.xlane.xlu2 %978  ;;  %1014 = vadd.xlane.f32.xlu2 %v921_v38  ;;  %v1240_v24 = vmul.f32 %v5960_v50, %v1239_v30  ;;  %v1828_v62 = vmul.f32 %v5247_v58, %v1557_v14  ;;  %v7685_v36 = vsel %vm5817_vm1, %v5539_v46, %v5782_v0  ;;  %v6029_v58 = vmul.f32 %v5871_v45, %v1632_v48  ;;  %vm6055_vm1 = vmor %vm1624_vm3, %vm1625_vm6 }
 0x1d0   : > { %v983_v35 = vpop.xlane.xlu1 %982  ;;  %v6002_v54 = vadd.f32 1e-12, %v979_v52  ;;  %2015 = vmatmul.bf16.vlgmr.msrb.gmra.mxu2 %v1859_v13  ;;  %v1831_v52 = vmul.f32 %v5074_v26, %v7685_v36  ;;  %vm1634_vm8 = vweird.f32 %v5769_v63  ;;  %vm1635_vm9 = vweird.f32 %v5871_v45 }
 0x1d1   : > { %2053 = vmatpush.bf16.xpose.msra.mxu2 %v1894_v17  ;;  %v1622_v17 = vsub.f32 1.5, %v1621_v8  ;;  %v1231_v8 = vmul.f32 0.5, %v1230_v31  ;;  %v6005_v11 = vadd.f32 1e-12, %v983_v35  ;;  %v6012_v3 = vpop.eup %4583  ;;  %v6018_v31 = vadd.f32 1e-12, %v981_v22  ;;  %vm6071_vm11 = vmor %vm1634_vm8, %vm1635_vm9 }
 0x1d2   : > { %4591 = vrsqrt.f32 %v6002_v54  ;;  %v6026_v34 = vpop.eup %4585  ;;  %v1562_v46 = vsub.f32 1.5, %v1561_v28  ;;  %v1892_v0 = vpack.c.bf16 %v1828_v62, %v1828_v62  ;;  %v1640_v28 = vmul.f32 %v5975_v5, %v1639_v9  ;;  %v745_v62 = vpop.f32.mrf.mxu0 }
 0x1d3   : > { %v6015_v2 = vmul.f32 %v5842_v53, %v1622_v17  ;;  %4593 = vrsqrt.f32 %v6005_v11  ;;  %v1249_v26 = vmul.f32 %v6026_v34, %v5967_v60  ;;  %v6044_v22 = vpop.eup %4587  ;;  %v1241_v47 = vmul.f32 0.5, %v1240_v24 }
 0x1d4   : > { %4595 = vrsqrt.f32 %v6018_v31  ;;  %v6060_v30 = vpop.eup %4589  ;;  %2027 = vmatpush.bf16.xpose.msrb.mxu3 %v1892_v0  ;;  %v1895_v14 = vpack.c.bf16 %v1831_v52, %v1831_v52  ;;  %vm1235_vm13 = vweird.f32 %v5904_v39  ;;  %vm1565_vm14 = vweird.f32 %v5918_v6 }
 0x1d5   : > { %4597 = vrsqrt.f32 %v5956_v32  ;;  %v1250_v35 = vmul.f32 %v6026_v34, %v1249_v26  ;;  %v1563_v13 = vmul.f32 %v5918_v6, %v1562_v46  ;;  %v922_v36 = vmul.f32 %v6060_v30, %v6060_v30 }
 0x1d6   : > { %4599 = vrsqrt.f32 %v5979_v18  ;;  %vm1234_vm15 = vweird.f32 %v5826_v42  ;;  %v6093_v52 = vmul.f32 0.5, %v1640_v28  ;;  %vm1564_vm2 = vweird.f32 %v5840_v7  ;;  %v987_v46 = vpop.xlane.xlu0 %986 }
 0x1d7   : > { %v985_v63 = vpop.xlane.xlu2 %984  ;;  %v1251_v9 = vmul.f32 0.5, %v1250_v35  ;;  %vm6100_vm3 = vmor %vm1234_vm15, %vm1235_vm13  ;;  %v1659_v0 = vmul.f32 %v6044_v22, %v5972_v12  ;;  %1016 = vadd.xlane.f32.xlu0 %v922_v36  ;;  %4601 = vtanh.f32 %v745_v62  ;;  %vm1244_vm6 = vweird.f32 %v5874_v21 }
 0x1d8   : > { %v6076_v23 = vpop.eup %4591  ;;  %v6107_v42 = vadd.f32 1e-12, %v985_v63  ;;  %vm6118_vm5 = vmor %vm1564_vm2, %vm1565_vm14  ;;  %vm1245_vm7 = vweird.f32 %v5960_v50  ;;  %vm1645_vm8 = vweird.f32 %v5975_v5  ;;  %vm1255_vm9 = vweird.f32 %v6026_v34 }
 0x1d9   : > { %2092 = vmatpush.bf16.xpose.msrb.mxu2 %v1897_v4  ;;  %v1232_v4 = vsub.f32 1.5, %v1231_v8  ;;  %v6085_v8 = vpop.eup %4593  ;;  %v1259_v24 = vmul.f32 %v6076_v23, %v6002_v54  ;;  %v1252_v35 = vsub.f32 1.5, %v1251_v9  ;;  %v1660_v29 = vmul.f32 %v6044_v22, %v1659_v0  ;;  %vm6147_vm14 = vmor %vm1244_vm6, %vm1245_vm7 }
 0x1da   : > { %v6096_v26 = vpop.eup %4595  ;;  %v1279_v9 = vmul.f32 %v6085_v8, %v6005_v11  ;;  %4603 = vrsqrt.f32 %v6107_v42  ;;  %vm1644_vm13 = vweird.f32 %v5894_v25  ;;  %vm1254_vm15 = vweird.f32 %v5967_v60 }
 0x1db   : > { %v1233_v48 = vmul.f32 %v5904_v39, %v1232_v4  ;;  %v1242_v4 = vsub.f32 1.5, %v1241_v47  ;;  %v6109_v28 = vpop.eup %4597  ;;  %v1649_v47 = vmul.f32 %v6012_v3, %v5950_v56  ;;  %v1269_v62 = vmul.f32 %v6096_v26, %v6018_v31  ;;  %vm6165_vm2 = vmor %vm1254_vm15, %vm1255_vm9 }
 0x1dc   : > { %2066 = vmatpush.bf16.xpose.msra.mxu3 %v1895_v14  ;;  %v1260_v14 = vmul.f32 %v6076_v23, %v1259_v24  ;;  %v6124_v63 = vpop.eup %4599  ;;  %v1642_v24 = vsub.f32 1.5, %v6093_v52  ;;  %v1253_v38 = vmul.f32 %v6026_v34, %v1252_v35  ;;  %vm1664_vm6 = vweird.f32 %v5972_v12 }
 0x1dd   : > { %v1237_v7 = vsel %vm6100_vm3, %v5904_v39, %v1233_v48  ;;  %v1567_v39 = vsel %vm6118_vm5, %v5918_v6, %v1563_v13  ;;  %v1243_v36 = vmul.f32 %v5960_v50, %v1242_v4  ;;  %v1650_v13 = vmul.f32 %v6012_v3, %v1649_v47 }
 0x1de   : > { %v1261_v48 = vmul.f32 0.5, %v1260_v14  ;;  %v1796_v6 = vmul.f32 %v5230_v33, %v1237_v7  ;;  %v1280_v4 = vmul.f32 %v6085_v8, %v1279_v9  ;;  %v1829_v14 = vmul.f32 %v5263_v37, %v1567_v39  ;;  %v6160_v37 = vpop.eup %4601 }
 0x1df   : > { %v7698_v33 = vsel %vm6037_vm10, %v5774_v49, %v5963_v43  ;;  %v6158_v7 = vadd.f32 1e-12, %v987_v46  ;;  %v1247_v21 = vsel %vm6147_vm14, %v5960_v50, %v1243_v36  ;;  %v1270_v60 = vmul.f32 %v6096_v26, %v1269_v62  ;;  %v989_v43 = vpop.xlane.xlu1 %988  ;;  %v7702_v62 = vld [vmem:[#allocation71_spill] sm:$0xff] }
 0x1e0   : > { %v1262_v52 = vsub.f32 1.5, %v1261_v48  ;;  %v1860_v0 = vpack.c.bf16 %v1796_v6, %v1796_v6  ;;  %v1834_v35 = vmul.f32 %v5158_v55, %v7698_v33  ;;  %v1893_v27 = vpack.c.bf16 %v1829_v14, %v1829_v14  ;;  %v6176_v9 = vpop.eup %4603  ;;  %v7704_v6 = vld [vmem:[#allocation47_spill] sm:$0xff] }
 0x1e1   : > { %v7701_v55 = vsel %vm5862_vm4, %v5616_v61, %v5836_v51  ;;  %v1661_v39 = vmul.f32 0.5, %v1660_v29  ;;  %v1257_v50 = vsel %vm6165_vm2, %v6026_v34, %v1253_v38  ;;  %vm1265_vm10 = vweird.f32 %v6076_v23 }
 0x1e2   : > { %v1832_v49 = vmul.f32 %v5094_v44, %v7701_v55  ;;  %2028 = vmatmul.bf16.vlgmr.msrb.gmra.mxu3 %v1860_v0  ;;  %v1898_v17 = vpack.c.bf16 %v1834_v35, %v1834_v35  ;;  %v1263_v48 = vmul.f32 %v6076_v23, %v1262_v52  ;;  %v1281_v16 = vmul.f32 0.5, %v1280_v4  ;;  %2040 = vmatpush.bf16.xpose.msra.mxu1 %v1893_v27  ;;  %v991_v4 = vpop.xlane.xlu2 %990 }
 0x1e3   : > { %v1289_v61 = vmul.f32 %v6176_v9, %v6107_v42  ;;  %4605 = vrsqrt.f32 %v6158_v7  ;;  %v6186_v51 = vadd.f32 1e-12, %v989_v43  ;;  %v923_v34 = vmul.f32 %v6160_v37, %v6160_v37 }
 0x1e4   : > { %2105 = vmatpush.bf16.xpose.msrb.mxu3 %v1898_v17  ;;  %v1896_v44 = vpack.c.bf16 %v1832_v49, %v1832_v49  ;;  %v1797_v29 = vmul.f32 %v5253_v15, %v1247_v21  ;;  %vm1264_vm4 = vweird.f32 %v6002_v54  ;;  %v1271_v36 = vmul.f32 0.5, %v1270_v60  ;;  %v7708_v54 = vld [vmem:[#allocation50_spill] sm:$0xff] }
 0x1e5   : > { %v1798_v46 = vmul.f32 %v7702_v62, %v1257_v50  ;;  %v7703_v38 = vsel %vm6055_vm1, %v5842_v53, %v6015_v2  ;;  %v1643_v14 = vmul.f32 %v5975_v5, %v1642_v24  ;;  %v1651_v0 = vmul.f32 0.5, %v1650_v13  ;;  %vm6202_vm3 = vmor %vm1264_vm4, %vm1265_vm10  ;;  %1018 = vadd.xlane.f32.xlu1 %v923_v34  ;;  %v7715_v62 = vld [vmem:[#allocation58_spill] sm:$0xff] }
 0x1e6   : > { %v1835_v52 = vmul.f32 %v7704_v6, %v7703_v38  ;;  %4607 = vrsqrt.f32 %v6186_v51  ;;  %v7707_v53 = vsel %vm6071_vm11, %v5871_v45, %v6029_v58  ;;  %v1662_v57 = vsub.f32 1.5, %v1661_v39  ;;  %vm6228_vm1 = vmor %vm1644_vm13, %vm1645_vm8  ;;  %v7712_v39 = vld [vmem:[#allocation74_spill] sm:$0xff] }
 0x1e7   : > { %v1836_v2 = vmul.f32 %v7708_v54, %v7707_v53  ;;  %v1267_v24 = vsel %vm6202_vm3, %v6076_v23, %v1263_v48  ;;  %v1290_v13 = vmul.f32 %v6176_v9, %v1289_v61  ;;  %v1862_v33 = vpack.c.bf16 %v1798_v46, %v1798_v46  ;;  %v993_v48 = vpop.xlane.xlu0 %992  ;;  %v7723_v54 = vld [vmem:[#allocation87_spill] sm:$0xff] }
 0x1e8   : > { %v1282_v35 = vsub.f32 1.5, %v1281_v16  ;;  %v1861_v21 = vpack.c.bf16 %v1797_v29, %v1797_v29  ;;  %v6217_v60 = vadd.f32 1e-12, %v991_v4  ;;  %v6222_v55 = vadd.f32 1e-12, %v7709_v41 }
 0x1e9   : > { %v1900_v47 = vpack.c.bf16 %v1836_v2, %v1836_v2  ;;  %v6219_v27 = vpop.eup %4605  ;;  %vm1654_vm11 = vweird.f32 %v5950_v56  ;;  %v1272_v58 = vsub.f32 1.5, %v1271_v36  ;;  %2054 = vmatmul.bf16.vlgmr.msra.gmra.mxu2 %v1862_v33  ;;  %v1899_v23 = vpack.c.bf16 %v1835_v52, %v1835_v52 }
 0x1ea   : > { %2079 = vmatpush.bf16.xpose.msrb.mxu1 %v1896_v44  ;;  %v1647_v49 = vsel %vm6228_vm1, %v5975_v5, %v1643_v14  ;;  %v1652_v43 = vsub.f32 1.5, %v1651_v0  ;;  %vm1655_vm5 = vweird.f32 %v6012_v3  ;;  %v1799_v25 = vmul.f32 %v7712_v39, %v1267_v24 }
 0x1eb   : > { %2041 = vmatmul.bf16.vlgmr.msra.gmra.mxu1 %v1861_v21  ;;  %2131 = vmatpush.bf16.xpose.msra.mxu2 %v1900_v47  ;;  %v1663_v50 = vmul.f32 %v6044_v22, %v1662_v57  ;;  %vm1665_vm7 = vweird.f32 %v6044_v22  ;;  %v1291_v17 = vmul.f32 0.5, %v1290_v13  ;;  %v1283_v5 = vmul.f32 %v6085_v8, %v1282_v35  ;;  %vm6251_vm13 = vmor %vm1654_vm11, %vm1655_vm5  ;;  %v7724_v35 = vld [vmem:[#allocation98_spill] sm:$0xff]  ;;  %v7725_v47 = vld [vmem:[#allocation75_spill] sm:$0xff] }
 0x1ec   : > { %v6241_v16 = vpop.eup %4607  ;;  %vm1285_vm8 = vweird.f32 %v6085_v8  ;;  %vm1275_vm9 = vweird.f32 %v6096_v26  ;;  %4609 = vrsqrt.f32 %v6217_v60  ;;  %v1273_v34 = vmul.f32 %v6096_v26, %v1272_v58  ;;  %vm6266_vm14 = vmor %vm1664_vm6, %vm1665_vm7  ;;  %v7726_v58 = vld [vmem:[#allocation77_spill] sm:$0xff] }
 0x1ed   : > { %v1299_v29 = vmul.f32 %v6219_v27, %v6158_v7  ;;  %v1309_v36 = vmul.f32 %v6241_v16, %v6186_v51  ;;  %v1837_v46 = vmul.f32 %v7715_v62, %v1647_v49  ;;  %v1653_v38 = vmul.f32 %v6012_v3, %v1652_v43  ;;  %v7727_v49 = vld [vmem:[#allocation65_spill] sm:$0xff] }
 0x1ee   : > { %vm1284_vm15 = vweird.f32 %v6005_v11  ;;  %v1863_v6 = vpack.c.bf16 %v1799_v25, %v1799_v25  ;;  %v6271_v52 = vadd.f32 1e-12, %v993_v48  ;;  %vm1685_vm2 = vweird.f32 %v5532_v59  ;;  %v7720_v11 = vld [vmem:[#allocation91_spill] sm:$0xff] }
 0x1ef   : > { %v995_v61 = vpop.xlane.xlu1 %994  ;;  %v6275_v4 = vmul.f32 0.5, %v5925_v40  ;;  %vm6279_vm10 = vmor %vm1284_vm15, %vm1285_vm8  ;;  %vm1274_vm4 = vweird.f32 %v6018_v31  ;;  %v1292_v12 = vsub.f32 1.5, %v1291_v17  ;;  %vm1694_vm3 = vweird.f32 %v7720_v11  ;;  %v7728_v17 = vld [vmem:[#allocation62_spill] sm:$0xff] }
 0x1f0   : > { %v6284_v0 = vadd.f32 1e-12, %v995_v61  ;;  %vm1695_vm1 = vweird.f32 %v5649_v19  ;;  %v1702_v15 = vsub.f32 1.5, %v5935_v20  ;;  %4611 = vrsqrt.f32 %v6222_v55  ;;  %vm6295_vm11 = vmor %vm1274_vm4, %vm1275_vm9 }
 0x1f1   : > { %v1287_v40 = vsel %vm6279_vm10, %v6085_v8, %v1283_v5  ;;  %v1310_v31 = vmul.f32 %v6241_v16, %v1309_v36  ;;  %vm1684_vm5 = vweird.f32 %v7723_v54  ;;  %vm1705_vm6 = vweird.f32 %v5811_v10  ;;  %v7729_v5 = vld [vmem:[#allocation90_spill] sm:$0xff] }
 0x1f2   : > { %2118 = vmatpush.bf16.xpose.msra.mxu1 %v1899_v23  ;;  %v1667_v20 = vsel %vm6266_vm14, %v6044_v22, %v1663_v50  ;;  %v1277_v8 = vsel %vm6295_vm11, %v6096_v26, %v1273_v34  ;;  %v1300_v2 = vmul.f32 %v6219_v27, %v1299_v29  ;;  %v1901_v57 = vpack.c.bf16 %v1837_v46, %v1837_v46  ;;  %v6309_v13 = vpop.eup %4609 }
 0x1f3   : > { %v1719_v33 = vmul.f32 %v6109_v28, %v5956_v32  ;;  %v6314_v21 = vadd.f32 1e-12, %v7724_v35  ;;  %v1657_v22 = vsel %vm6251_vm13, %v6012_v3, %v1653_v38  ;;  %2067 = vmatmul.bf16.vlgmr.msra.gmra.mxu3 %v1863_v6  ;;  %4613 = vrsqrt.f32 %v6271_v52  ;;  %vm6366_vm13 = vmor %vm1684_vm5, %vm1685_vm2 }
 0x1f4   : > { %v1293_v26 = vmul.f32 %v6176_v9, %v1292_v12  ;;  %vm1295_vm7 = vweird.f32 %v6176_v9  ;;  %2144 = vmatpush.bf16.xpose.msra.mxu3 %v1901_v57  ;;  %v1801_v41 = vmul.f32 %v7725_v47, %v1287_v40  ;;  %4615 = vrsqrt.f32 %v6284_v0  ;;  %vm6383_vm2 = vmor %vm1694_vm3, %vm1695_vm1 }
 0x1f5   : > { %v1311_v45 = vmul.f32 0.5, %v1310_v31  ;;  %v1800_v23 = vmul.f32 %v7726_v58, %v1277_v8  ;;  %v1839_v43 = vmul.f32 %v7727_v49, %v1667_v20  ;;  %v1925_v39 = vpop.f32.mrf.mxu1  ;;  %v1301_v3 = vmul.f32 0.5, %v1300_v2 }
 0x1f6   : > { %v1319_v50 = vmul.f32 %v6309_v13, %v6217_v60  ;;  %v1838_v48 = vmul.f32 %v7728_v17, %v1657_v22  ;;  %v2684_v61 = vmul.f32 %v7729_v5, %v1925_v39  ;;  %v6332_v44 = vpop.eup %4611  ;;  %v1712_v34 = vsub.f32 1.5, %v6275_v4  ;;  %v7738_v22 = vld [vmem:[#allocation108_spill] sm:$0xff] }
 0x1f7   : > { %v6336_v29 = vmul.f32 %v5811_v10, %v1702_v15  ;;  %v1720_v36 = vmul.f32 %v6109_v28, %v1719_v33  ;;  %v1729_v62 = vmul.f32 %v6124_v63, %v5979_v18  ;;  %4617 = vrsqrt.f32 %v6314_v21 }
 0x1f8   : > { %v997_v24 = vpop.xlane.xlu2 %996  ;;  %vm1294_vm8 = vweird.f32 %v6107_v42  ;;  %v1865_v46 = vpack.c.bf16 %v1801_v41, %v1801_v41  ;;  %v6344_v38 = vsel %vm2716_vm0, %v2684_v61, -inf  ;;  %v1312_v4 = vsub.f32 1.5, %v1311_v45  ;;  %v7741_v41 = vld [vmem:[#allocation78_spill] sm:$0xff] }
 0x1f9   : > { %v6326_v25 = vadd.f32 1e-12, %v997_v24  ;;  %v6346_v56 = vpop.eup %4613  ;;  %vm6350_vm9 = vmor %vm1294_vm8, %vm1295_vm7  ;;  %v1864_v14 = vpack.c.bf16 %v1800_v23, %v1800_v23  ;;  %v1903_v12 = vpack.c.bf16 %v1839_v43, %v1839_v43  ;;  %2718 = vmax.xlane.f32.xlu2 %v6344_v38  ;;  %v1302_v40 = vsub.f32 1.5, %v1301_v3  ;;  %v7737_v24 = vld [vmem:[#allocation101_spill] sm:$0xff] }
 0x1fa   : > { %v6356_v42 = vpop.eup %4615  ;;  %v1297_v15 = vsel %vm6350_vm9, %v6176_v9, %v1293_v26  ;;  %v1320_v53 = vmul.f32 %v6309_v13, %v1319_v50  ;;  %v1902_v31 = vpack.c.bf16 %v1838_v48, %v1838_v48  ;;  %2093 = vmatmul.bf16.vlgmr.msrb.gmra.mxu2 %v1865_v46  ;;  %v1730_v8 = vmul.f32 %v6124_v63, %v1729_v62  ;;  %v7734_v9 = vld [vmem:[#allocation105_spill] sm:$0xff]  ;;  %v7746_v50 = vld [vmem:[#allocation95_spill] sm:$0xff]  ;;  %v7750_v46 = vld [vmem:[#allocation100_spill] sm:$0xff] }
 0x1fb   : > { %4619 = vrsqrt.f32 %v6326_v25  ;;  %v1739_v2 = vmul.f32 %v6332_v44, %v6222_v55  ;;  %vm1314_vm14 = vweird.f32 %v6186_v51  ;;  %vm1315_vm15 = vweird.f32 %v6241_v16  ;;  %2080 = vmatmul.bf16.vlgmr.msrb.gmra.mxu1 %v1864_v14  ;;  %2170 = vmatpush.bf16.xpose.msrb.mxu2 %v1903_v12  ;;  %v7745_v3 = vld [vmem:[#allocation85_spill] sm:$0xff]  ;;  %v7751_v12 = vld [vmem:[#allocation106_spill] sm:$0xff] }
 0x1fc   : > { %v1687_v54 = vsel %vm6366_vm13, %v5532_v59, %v7734_v9  ;;  %vm1704_vm10 = vweird.f32 %v7737_v24  ;;  %v1721_v33 = vmul.f32 0.5, %v1720_v36  ;;  %v1329_v35 = vmul.f32 %v6346_v56, %v6271_v52  ;;  %2157 = vmatpush.bf16.xpose.msrb.mxu1 %v1902_v31  ;;  %vm6412_vm1 = vmor %vm1314_vm14, %vm1315_vm15  ;;  %v7748_v48 = vld [vmem:[#allocation25_spill] sm:$0xff]  ;;  %v7749_v36 = vld [vmem:[#allocation103_spill] sm:$0xff] }
 0x1fd   : > { %v1697_v59 = vsel %vm6383_vm2, %v5649_v19, %v7738_v22  ;;  %vm6396_vm4 = vmor %vm1704_vm10, %vm1705_vm6  ;;  %v1313_v26 = vmul.f32 %v6241_v16, %v1312_v4  ;;  %v1339_v47 = vmul.f32 %v6356_v42, %v6284_v0  ;;  %v1802_v45 = vmul.f32 %v7741_v41, %v1297_v15  ;;  %v1927_v58 = vpop.f32.mrf.mxu1  ;;  %v6404_v23 = vpop.eup %4617 }
 0x1fe   : > { %v1303_v49 = vmul.f32 %v6219_v27, %v1302_v40  ;;  %vm1305_vm3 = vweird.f32 %v6219_v27  ;;  %v1321_v43 = vmul.f32 0.5, %v1320_v53  ;;  %v7747_v17 = vsel %vm5632_vm12, %v7745_v3, %v7746_v50 }
 0x1ff   : > { %v1840_v5 = vmul.f32 %v7748_v48, %v7747_v17  ;;  %v6425_v62 = vmul.f32 %v7749_v36, %v1712_v34  ;;  %vm1714_vm11 = vweird.f32 %v7750_v46  ;;  %vm1715_vm5 = vweird.f32 %v7749_v36 }
 0x200   : > { %v1707_v51 = vsel %vm6396_vm4, %v5811_v10, %v6336_v29  ;;  %v1731_v6 = vmul.f32 0.5, %v1730_v8  ;;  %v1740_v4 = vmul.f32 %v6332_v44, %v1739_v2  ;;  %v1722_v14 = vsub.f32 1.5, %v1721_v33 }
 0x201   : > { %v6422_v61 = vpop.eup %4619  ;;  %v6435_v15 = vadd.f32 1e-12, %v7751_v12  ;;  %vm1304_vm12 = vweird.f32 %v6158_v7  ;;  %v1330_v34 = vmul.f32 %v6346_v56, %v1329_v35  ;;  %vm1725_vm6 = vweird.f32 %v6109_v28  ;;  %v7754_v35 = vld [vmem:[#allocation80_spill] sm:$0xff] }
 0x202   : > { %vm6442_vm7 = vmor %vm1304_vm12, %vm1305_vm3  ;;  %v1317_v53 = vsel %vm6412_vm1, %v6241_v16, %v1313_v26  ;;  %v1340_v31 = vmul.f32 %v6356_v42, %v1339_v47  ;;  %v1866_v20 = vpack.c.bf16 %v1802_v45, %v1802_v45  ;;  %vm1724_vm8 = vweird.f32 %v5956_v32  ;;  %v7755_v47 = vld [vmem:[#allocation79_spill] sm:$0xff]  ;;  %v7756_v45 = vld [vmem:[#allocation32_spill] sm:$0xff] }
 0x203   : > { %v1307_v7 = vsel %vm6442_vm7, %v6219_v27, %v1303_v49  ;;  %v1322_v8 = vsub.f32 1.5, %v1321_v43  ;;  %v1904_v2 = vpack.c.bf16 %v1840_v5, %v1840_v5  ;;  %v1349_v9 = vmul.f32 %v6422_v61, %v6326_v25  ;;  %v7757_v43 = vld [vmem:[#allocation27_spill] sm:$0xff]  ;;  %vm6495_vm1 = vmor %vm1714_vm11, %vm1715_vm5 }
 0x204   : > { %v1732_v57 = vsub.f32 1.5, %v1731_v6  ;;  %vm1734_vm9 = vweird.f32 %v5979_v18  ;;  %v6457_v24 = vmul.f32 0.5, %v1740_v4  ;;  %v1749_v16 = vmul.f32 %v6404_v23, %v6314_v21  ;;  %2106 = vmatmul.bf16.vlgmr.msrb.gmra.mxu3 %v1866_v20  ;;  %vm6507_vm7 = vmor %vm1724_vm8, %vm1725_vm6 }
 0x205   : > { %v6462_v33 = vmul.f32 %v6109_v28, %v1722_v14  ;;  %4621 = vrsqrt.f32 %v6435_v15  ;;  %v1331_v27 = vmul.f32 0.5, %v1330_v34  ;;  %2183 = vmatpush.bf16.xpose.msrb.mxu3 %v1904_v2  ;;  %v1804_v22 = vmul.f32 %v7754_v35, %v1317_v53 }
 0x206   : > { %vm1324_vm13 = vweird.f32 %v6217_v60  ;;  %v1341_v26 = vmul.f32 0.5, %v1340_v31  ;;  %v1803_v41 = vmul.f32 %v7755_v47, %v1307_v7  ;;  %v1842_v58 = vmul.f32 %v7756_v45, %v1697_v59  ;;  %v7773_v47 = vld [vmem:[#allocation81_spill] sm:$0xff] }
 0x207   : > { %v1323_v49 = vmul.f32 %v6309_v13, %v1322_v8  ;;  %vm1325_vm14 = vweird.f32 %v6309_v13  ;;  %v1350_v19 = vmul.f32 %v6422_v61, %v1349_v9  ;;  %v1841_v39 = vmul.f32 %v7757_v43, %v1687_v54  ;;  %v7766_v9 = vld [vmem:[#allocation92_spill] sm:$0xff]  ;;  %v7774_v45 = vld [vmem:[#allocation97_spill] sm:$0xff] }
 0x208   : > { %v6474_v3 = vmul.f32 %v6124_v63, %v1732_v57  ;;  %vm1735_vm15 = vweird.f32 %v6124_v63  ;;  %v1742_v50 = vsub.f32 1.5, %v6457_v24  ;;  %v1750_v17 = vmul.f32 %v6404_v23, %v1749_v16  ;;  %v999_v5 = vpop.xlane.xlu0 %998  ;;  %vm6483_vm3 = vmor %vm1324_vm13, %vm1325_vm14  ;;  %v7767_v57 = vld [vmem:[#allocation24_spill] sm:$0xff] }
 0x209   : > { %v1332_v48 = vsub.f32 1.5, %v1331_v27  ;;  %vm1334_vm2 = vweird.f32 %v6271_v52  ;;  %vm1344_vm10 = vweird.f32 %v6284_v0  ;;  %v1868_v59 = vpack.c.bf16 %v1804_v22, %v1804_v22  ;;  %vm6520_vm5 = vmor %vm1734_vm9, %vm1735_vm15  ;;  %v7769_v27 = vld [vmem:[#allocation14_spill] sm:$0xff] }
 0x20a   : > { %v1342_v6 = vsub.f32 1.5, %v1341_v26  ;;  %v1867_v4 = vpack.c.bf16 %v1803_v41, %v1803_v41  ;;  %v1906_v14 = vpack.c.bf16 %v1842_v58, %v1842_v58  ;;  %v6487_v12 = vadd.f32 1e-12, %v999_v5  ;;  %v1001_v20 = vpop.xlane.xlu1 %1000  ;;  %v7775_v58 = vld [vmem:[#allocation26_spill] sm:$0xff] }
 0x20b   : > { %v6489_v34 = vpop.eup %4621  ;;  %v1327_v60 = vsel %vm6483_vm3, %v6309_v13, %v1323_v49  ;;  %vm1335_vm12 = vweird.f32 %v6346_v56  ;;  %v1351_v53 = vmul.f32 0.5, %v1350_v19  ;;  %v1905_v31 = vpack.c.bf16 %v1841_v39, %v1841_v39  ;;  %2132 = vmatmul.bf16.vlgmr.msra.gmra.mxu2 %v1868_v59  ;;  %v7781_v59 = vld [vmem:[#allocation109_spill] sm:$0xff] }
 0x20c   : > { %vm1345_vm11 = vweird.f32 %v6356_v42  ;;  %v2813_v7 = vrot.slane %v6344_v38, 4  ;;  %2119 = vmatmul.bf16.vlgmr.msra.gmra.mxu1 %v1867_v4  ;;  %2209 = vmatpush.bf16.xpose.msra.mxu2 %v1906_v14  ;;  %4623 = vrsqrt.f32 %v6487_v12  ;;  %v6514_v13 = vadd.f32 1e-12, %v1001_v20  ;;  %vm6536_vm6 = vmor %vm1334_vm2, %vm1335_vm12  ;;  %v7784_v20 = vld [vmem:[#allocation82_spill] sm:$0xff] }
 0x20d   : > { %v1751_v8 = vmul.f32 0.5, %v1750_v17  ;;  %v1333_v2 = vmul.f32 %v6346_v56, %v1332_v48  ;;  %2196 = vmatpush.bf16.xpose.msra.mxu1 %v1905_v31  ;;  %v7768_v24 = vunpack.i.h.bf16 %v7767_v57  ;;  %v7770_v35 = vrot.slane %v7769_v27, 2  ;;  %vm6560_vm8 = vmor %vm1344_vm10, %vm1345_vm11  ;;  %v7786_v57 = vld [vmem:[#allocation83_spill] sm:$0xff] }
 0x20e   : > { %v1343_v26 = vmul.f32 %v6356_v42, %v1342_v6  ;;  %v1805_v41 = vmul.f32 %v7773_v47, %v1327_v60  ;;  %4625 = vrsqrt.f32 %v6514_v13  ;;  %v7776_v49 = vunpack.i.h.bf16 %v7775_v58 }
 0x20f   : > { %v2653_v16 = vmul.f32 %v7768_v24, %v7766_v9  ;;  %v6530_v22 = vperm.slane %v7770_v35, 0  ;;  %v1717_v52 = vsel %vm6495_vm1, %v7749_v36, %v6425_v62  ;;  %v1727_v43 = vsel %vm6507_vm7, %v6109_v28, %v6462_v33  ;;  %v7779_v36 = vld [vmem:[#allocation39_spill] sm:$0xff]  ;;  %v1003_v6 = vpop.xlane.xlu2 %1002 }
 0x210   : > { %v6546_v19 = vmul.f32 %v7776_v49, %v7774_v45  ;;  %v1352_v17 = vsub.f32 1.5, %v1351_v53  ;;  %v1843_v62 = vmul.f32 %v7779_v36, %v1707_v51  ;;  %v1737_v28 = vsel %vm6520_vm5, %v6124_v63, %v6474_v3  ;;  %v7780_v51 = vld [vmem:[#allocation107_spill] sm:$0xff] }
 0x211   : > { %v6575_v33 = vmul.f32 %v6332_v44, %v1742_v50  ;;  %v1759_v0 = vmul.f32 %v6489_v34, %v6435_v15  ;;  %v2814_v48 = vmax.f32 %v6344_v38, %v2813_v7  ;;  %vm1745_vm9 = vweird.f32 %v6332_v44  ;;  %v7785_v7 = vld [vmem:[#allocation38_spill] sm:$0xff]  ;;  %v7787_v35 = vld [vmem:[#allocation43_spill] sm:$0xff] }
 0x212   : > { %v1752_v11 = vsub.f32 1.5, %v1751_v8  ;;  %v1337_v10 = vsel %vm6536_vm6, %v6346_v56, %v1333_v2  ;;  %vm1354_vm4 = vweird.f32 %v6326_v25  ;;  %vm1355_vm13 = vweird.f32 %v6422_v61  ;;  %v6586_v29 = vpop.eup %4623 }
 0x213   : > { %v6589_v50 = vadd.f32 1e-12, %v7780_v51  ;;  %v6592_v5 = vadd.f32 1e-12, %v7781_v59  ;;  %v1347_v38 = vsel %vm6560_vm8, %v6356_v42, %v1343_v26  ;;  %v1869_v54 = vpack.c.bf16 %v1805_v41, %v1805_v41  ;;  %vm6611_vm2 = vmor %vm1354_vm4, %vm1355_vm13 }
 0x214   : > { %vm1744_vm14 = vweird.f32 %v6222_v55  ;;  %vm1754_vm15 = vweird.f32 %v6314_v21  ;;  %v1353_v56 = vmul.f32 %v6422_v61, %v1352_v17  ;;  %v1359_v4 = vmul.f32 %v6586_v29, %v6487_v12  ;;  %v6604_v60 = vpop.eup %4625  ;;  %v1938_v17 = vpop.f32.mrf.mxu2 }
 0x215   : > { %v1907_v14 = vpack.c.bf16 %v1843_v62, %v1843_v62  ;;  %v6602_v40 = vadd.f32 1e-12, %v1003_v6  ;;  %v1760_v53 = vmul.f32 %v6489_v34, %v1759_v0  ;;  %v2815_v31 = vrot.slane %v2814_v48, 2  ;;  %2145 = vmatmul.bf16.vlgmr.msra.gmra.mxu3 %v1869_v54  ;;  %v1964_v59 = vpop.f32.mrf.mxu1  ;;  %vm6652_vm12 = vmor %vm1744_vm14, %vm1745_vm9 }
 0x216   : > { %v1806_v46 = vmul.f32 %v7784_v20, %v1337_v10  ;;  %v1844_v8 = vmul.f32 %v7785_v7, %v1717_v52  ;;  %v1360_v2 = vmul.f32 %v6586_v29, %v1359_v4  ;;  %v1369_v9 = vmul.f32 %v6604_v60, %v6514_v13  ;;  %v7788_v10 = vld [vmem:[#allocation84_spill] sm:$0xff] }
 0x217   : > { %2222 = vmatpush.bf16.xpose.msra.mxu3 %v1907_v14  ;;  %v1807_v24 = vmul.f32 %v7786_v57, %v1347_v38  ;;  %4627 = vrsqrt.f32 %v6602_v40  ;;  %v6623_v25 = vmul.f32 %v6404_v23, %v1752_v11  ;;  %vm1755_vm10 = vweird.f32 %v6404_v23 }
 0x218   : > { %4629 = vrsqrt.f32 %v6589_v50  ;;  %v1845_v18 = vmul.f32 %v7787_v35, %v1727_v43  ;;  %v1357_v26 = vsel %vm6611_vm2, %v6422_v61, %v1353_v56  ;;  %v1361_v47 = vmul.f32 0.5, %v1360_v2  ;;  %v1005_v36 = vpop.xlane.xlu0 %1004  ;;  %vm6685_vm5 = vmor %vm1754_vm15, %vm1755_vm10 }
 0x219   : > { %4631 = vrsqrt.f32 %v6592_v5  ;;  %v1370_v41 = vmul.f32 %v6604_v60, %v1369_v9  ;;  %v6633_v45 = vmul.f32 0.5, %v1760_v53  ;;  %v6635_v49 = vmax.f32 %v2814_v48, %v2815_v31 }
 0x21a   : > { %v1870_v52 = vpack.c.bf16 %v1806_v46, %v1806_v46  ;;  %v1908_v39 = vpack.c.bf16 %v1844_v8, %v1844_v8  ;;  %v1871_v0 = vpack.c.bf16 %v1807_v24, %v1807_v24  ;;  %v2685_v43 = vmul.f32 %v2653_v16, %v1938_v17 }
 0x21b   : > { %v1371_v62 = vmul.f32 0.5, %v1370_v41  ;;  %v6637_v11 = vadd.f32 1e-12, %v1005_v36  ;;  %v1808_v51 = vmul.f32 %v7788_v10, %v1357_v26  ;;  %vm1374_vm3 = vweird.f32 %v6514_v13 }
 0x21c   : > { %vm1375_vm1 = vweird.f32 %v6604_v60  ;;  %v1909_v61 = vpack.c.bf16 %v1845_v18, %v1845_v18  ;;  %v1362_v48 = vsub.f32 1.5, %v1361_v47  ;;  %2171 = vmatmul.bf16.vlgmr.msrb.gmra.mxu2 %v1871_v0  ;;  %v2687_v6 = vmul.f32 %v6546_v19, %v1964_v59  ;;  %2158 = vmatmul.bf16.vlgmr.msrb.gmra.mxu1 %v1870_v52  ;;  %v7791_v19 = vld [vmem:[#allocation48_spill] sm:$0xff]  ;;  %v1940_v24 = vpop.f32.mrf.mxu2 }
 0x21d   : > { %v6642_v38 = vpop.eup %4627  ;;  %v1372_v54 = vsub.f32 1.5, %v1371_v62  ;;  %v2720_v56 = vsel %vm2716_vm0, %v2685_v43, -inf  ;;  %v1846_v53 = vmul.f32 %v7791_v19, %v1737_v28  ;;  %4633 = vrsqrt.f32 %v6637_v11  ;;  %vm6674_vm6 = vmor %vm1374_vm3, %vm1375_vm1  ;;  %2235 = vmatpush.bf16.xpose.msrb.mxu1 %v1908_v39  ;;  %v1951_v18 = vpop.f32.mrf.mxu3  ;;  %v7799_v39 = vld [vmem:[#allocation88_spill] sm:$0xff] }
 0x21e   : > { %v6646_v16 = vpop.eup %4629  ;;  %2248 = vmatpush.bf16.xpose.msrb.mxu2 %v1909_v61  ;;  %v1379_v14 = vmul.f32 %v6642_v38, %v6602_v40  ;;  %v2819_v31 = vrot.slane %v2720_v56, 4  ;;  %vm1364_vm7 = vweird.f32 %v6487_v12  ;;  %vm1365_vm11 = vweird.f32 %v6586_v29  ;;  %2721 = vmax.xlane.f32.xlu1 %v2720_v56  ;;  %v1966_v52 = vpop.f32.mrf.mxu1  ;;  %v7800_v61 = vld [vmem:[#allocation86_spill] sm:$0xff] }
 0x21f   : > { %v6665_v55 = vpop.eup %4631  ;;  %v1373_v42 = vmul.f32 %v6604_v60, %v1372_v54  ;;  %v6679_v63 = vsel %vm2716_vm0, %v2687_v6, -inf  ;;  %v7544_v20 = vrot.slane %v7769_v27, 4  ;;  %v1747_v46 = vsel %vm6652_vm12, %v6332_v44, %v6575_v33  ;;  %vm6710_vm8 = vmor %vm1364_vm7, %vm1365_vm11  ;;  %v7803_v6 = vld [vmem:[#allocation57_spill] sm:$0xff] }
 0x220   : > { %v1380_v28 = vmul.f32 %v6642_v38, %v1379_v14  ;;  %v2820_v13 = vmax.f32 %v2720_v56, %v2819_v31  ;;  %2727 = vmax.xlane.f32.xlu2 %v6679_v63  ;;  %v1757_v21 = vsel %vm6685_vm5, %v6404_v23, %v6623_v25  ;;  %v1363_v7 = vmul.f32 %v6586_v29, %v1362_v48 }
 0x221   : > { %v7796_v8 = vunpack.i.l.bf16 %v7775_v58  ;;  %v1769_v9 = vmul.f32 %v6646_v16, %v6589_v50  ;;  %v1377_v23 = vsel %vm6674_vm6, %v6604_v60, %v1373_v42  ;;  %v2817_v58 = vrot.slane %v6635_v49, 1 }
 0x222   : > { %v1381_v33 = vmul.f32 0.5, %v1380_v28  ;;  %v2821_v57 = vrot.slane %v2820_v13, 2  ;;  %v1872_v25 = vpack.c.bf16 %v1808_v51, %v1808_v51  ;;  %v1910_v35 = vpack.c.bf16 %v1846_v53, %v1846_v53  ;;  %v7804_v53 = vld [vmem:[#allocation53_spill] sm:$0xff] }
 0x223   : > { %v2654_v2 = vmul.f32 %v7796_v8, %v6530_v22  ;;  %v1762_v22 = vsub.f32 1.5, %v6633_v45  ;;  %v6719_v26 = vpop.eup %4633  ;;  %vm1384_vm9 = vweird.f32 %v6602_v40  ;;  %v1367_v60 = vsel %vm6710_vm8, %v6586_v29, %v1363_v7  ;;  %v1007_v54 = vpop.xlane.xlu1 %1006 }
 0x224   : > { %v1382_v12 = vsub.f32 1.5, %v1381_v33  ;;  %v2822_v47 = vmax.f32 %v2820_v13, %v2821_v57  ;;  %v1810_v17 = vmul.f32 %v7799_v39, %v1377_v23  ;;  %vm1385_vm4 = vweird.f32 %v6642_v38  ;;  %v7808_v57 = vld [vmem:[#allocation89_spill] sm:$0xff] }
 0x225   : > { %v2686_v41 = vmul.f32 %v2654_v2, %v1951_v18  ;;  %v1389_v45 = vmul.f32 %v6719_v26, %v6637_v11  ;;  %v1770_v36 = vmul.f32 %v6646_v16, %v1769_v9  ;;  %v1779_v62 = vmul.f32 %v6665_v55, %v6592_v5  ;;  %2184 = vmatmul.bf16.vlgmr.msrb.gmra.mxu3 %v1872_v25  ;;  %vm6746_vm15 = vmor %vm1384_vm9, %vm1385_vm4  ;;  %v1953_v8 = vpop.f32.mrf.mxu3  ;;  %v7811_v18 = vld [vmem:[#allocation33_spill] sm:$0xff] }
 0x226   : > { %v2823_v0 = vrot.slane %v2822_v47, 1  ;;  %vm1764_vm13 = vweird.f32 %v6435_v15  ;;  %v2818_v29 = vmax.f32 %v6635_v49, %v2817_v58  ;;  %v1383_v10 = vmul.f32 %v6642_v38, %v1382_v12  ;;  %2261 = vmatpush.bf16.xpose.msrb.mxu3 %v1910_v35  ;;  %v7819_v8 = vld [vmem:[#allocation70_spill] sm:$0xff] }
 0x227   : > { %v6733_v43 = vsel %vm2716_vm0, %v2686_v41, -inf  ;;  %v1390_v51 = vmul.f32 %v6719_v26, %v1389_v45  ;;  %vm1765_vm14 = vweird.f32 %v6489_v34  ;;  %v1809_v59 = vmul.f32 %v7800_v61, %v1367_v60 }
 0x228   : > { %2724 = vmax.xlane.f32.xlu0 %v6733_v43  ;;  %v2824_v49 = vmax.f32 %v2822_v47, %v2823_v0  ;;  %v1848_v56 = vmul.f32 %v7803_v6, %v1757_v21  ;;  %v1763_v4 = vmul.f32 %v6489_v34, %v1762_v22  ;;  %v1874_v14 = vpack.c.bf16 %v1810_v17, %v1810_v17  ;;  %vm6766_vm10 = vmor %vm1764_vm13, %vm1765_vm14  ;;  %v7812_v47 = vld [vmem:[#allocation67_spill] sm:$0xff] }
 0x229   : > { %v1391_v19 = vmul.f32 0.5, %v1390_v51  ;;  %v1847_v31 = vmul.f32 %v7804_v53, %v1747_v46  ;;  %v1771_v42 = vmul.f32 0.5, %v1770_v36  ;;  %v1780_v32 = vmul.f32 %v6665_v55, %v1779_v62  ;;  %v1009_v58 = vpop.xlane.xlu2 %1008 }
 0x22a   : > { %v7805_v3 = vrot.slane %v7769_v27, 1  ;;  %v6756_v28 = vadd.f32 1e-12, %v1007_v54  ;;  %v3580_v13 = vmul.f32 %v7769_v27, %v2818_v29  ;;  %v1387_v21 = vsel %vm6746_vm15, %v6642_v38, %v1383_v10  ;;  %v7823_v54 = vld [vmem:[#allocation104_spill] sm:$0xff] }
 0x22b   : > { %vm3489_vm2 = vcmask 1041409   ;;  %v1392_v7 = vsub.f32 1.5, %v1391_v19  ;;  %v1873_v2 = vpack.c.bf16 %v1809_v59, %v1809_v59  ;;  %v1912_v44 = vpack.c.bf16 %v1848_v56, %v1848_v56  ;;  %v7815_v59 = vld [vmem:[#allocation94_spill] sm:$0xff] }
 0x22c   : > { %v3581_v40 = vmul.f32 %v2824_v49, %v7805_v3  ;;  %4635 = vrsqrt.f32 %v6756_v28  ;;  %v1767_v38 = vsel %vm6766_vm10, %v6489_v34, %v1763_v4  ;;  %vm1394_vm3 = vweird.f32 %v6637_v11  ;;  %2210 = vmatmul.bf16.vlgmr.msra.gmra.mxu2 %v1874_v14  ;;  %v7818_v14 = vld [vmem:[#allocation68_spill] sm:$0xff] }
 0x22d   : > { %vm1395_vm1 = vweird.f32 %v6719_v26  ;;  %v1911_v23 = vpack.c.bf16 %v1847_v31, %v1847_v31  ;;  %v1772_v15 = vsub.f32 1.5, %v1771_v42  ;;  %v1781_v33 = vmul.f32 0.5, %v1780_v32  ;;  %2197 = vmatmul.bf16.vlgmr.msra.gmra.mxu1 %v1873_v2  ;;  %2287 = vmatpush.bf16.xpose.msra.mxu2 %v1912_v44  ;;  %v7821_v44 = vld [vmem:[#allocation99_spill] sm:$0xff] }
 0x22e   : > { %v3644_v9 = vrot.slane %v3581_v40, 7  ;;  %v1811_v24 = vmul.f32 %v7808_v57, %v1387_v21  ;;  %v1393_v25 = vmul.f32 %v6719_v26, %v1392_v7  ;;  %v1110_v34 = vadd.f32 1e-12, %v1009_v58  ;;  %vm6787_vm11 = vmor %vm1394_vm3, %vm1395_vm1 }
 0x22f   : > { %2274 = vmatpush.bf16.xpose.msra.mxu1 %v1911_v23  ;;  %vm1774_vm12 = vweird.f32 %v6589_v50  ;;  %vm1775_vm7 = vweird.f32 %v6646_v16  ;;  %v4293_v12 = vunpack.i.l.bf16 %v7811_v18  ;;  %v1849_v41 = vmul.f32 %v7812_v47, %v1767_v38 }
 0x230   : > { %v6778_v22 = vsel %vm3489_vm2, %v3644_v9, %v3580_v13  ;;  %4637 = vrsqrt.f32 %v1110_v34  ;;  %v2592_v52 = vperm.slane %v7544_v20, 0  ;;  %v1773_v50 = vmul.f32 %v6646_v16, %v1772_v15  ;;  %vm6796_vm6 = vmor %vm1774_vm12, %vm1775_vm7  ;;  %v1011_v10 = vpop.xlane.xlu0 %1010  ;;  %v7846_v20 = vld [vmem:[#allocation54_spill] sm:$0xff] }
 0x231   : > { %v1782_v39 = vsub.f32 1.5, %v1781_v33  ;;  %v1875_v17 = vpack.c.bf16 %v1811_v24, %v1811_v24  ;;  %v1397_v11 = vsel %vm6787_vm11, %v6719_v26, %v1393_v25  ;;  %vm1784_vm5 = vweird.f32 %v6592_v5 }
 0x232   : > { %v4636_v60 = vpop.eup %4635  ;;  %vm1785_vm8 = vweird.f32 %v6665_v55  ;;  %v1913_v0 = vpack.c.bf16 %v1849_v41, %v1849_v41  ;;  %v2656_v29 = vmul.f32 %v4293_v12, %v2592_v52  ;;  %v1777_v51 = vsel %vm6796_vm6, %v6646_v16, %v1773_v50 }
 0x233   : > { %v1399_v36 = vmul.f32 %v4636_v60, %v6756_v28  ;;  %v1783_v61 = vmul.f32 %v6665_v55, %v1782_v39  ;;  %v1812_v48 = vmul.f32 %v7815_v59, %v1397_v11  ;;  %v1111_v26 = vadd.f32 1e-12, %v1011_v10  ;;  %vm6811_vm9 = vmor %vm1784_vm5, %vm1785_vm8 }
 0x234   : > { %vm1404_vm4 = vweird.f32 %v6756_v28  ;;  %vm1405_vm13 = vweird.f32 %v4636_v60  ;;  %v1977_v6 = vpop.f32.mrf.mxu2  ;;  %v1850_v19 = vmul.f32 %v7818_v14, %v1777_v51  ;;  %v7542_v53 = vrot.slane %v7769_v27, 6 }
 0x235   : > { %v1400_v62 = vmul.f32 %v4636_v60, %v1399_v36  ;;  %2223 = vmatmul.bf16.vlgmr.msra.gmra.mxu3 %v1875_v17  ;;  %v2688_v4 = vmul.f32 %v2656_v29, %v1977_v6  ;;  %4639 = vrsqrt.f32 %v1111_v26  ;;  %v1787_v31 = vsel %vm6811_vm9, %v6665_v55, %v1783_v61  ;;  %vm1406_vm14 = vmor %vm1404_vm4, %vm1405_vm13  ;;  %v7820_v55 = vld [vmem:[#allocation30_spill] sm:$0xff] }
 0x236   : > { %v4638_v49 = vpop.eup %4637  ;;  %2300 = vmatpush.bf16.xpose.msra.mxu3 %v1913_v0  ;;  %v1876_v42 = vpack.c.bf16 %v1812_v48, %v1812_v48  ;;  %vm1414_vm15 = vweird.f32 %v1110_v34  ;;  %v7543_v13 = vrot.slane %v7769_v27, 5  ;;  %v1914_v7 = vpack.c.bf16 %v1850_v19, %v1850_v19 }
 0x237   : > { %v1401_v5 = vmul.f32 0.5, %v1400_v62  ;;  %v1409_v56 = vmul.f32 %v4638_v49, %v1110_v34  ;;  %v6822_v3 = vsel %vm2716_vm0, %v2688_v4, -inf  ;;  %vm1415_vm10 = vweird.f32 %v4638_v49 }
 0x238   : > { %2730 = vmax.xlane.f32.xlu1 %v6822_v3  ;;  %v1851_v46 = vmul.f32 %v7819_v8, %v1787_v31  ;;  %v4267_v9 = vunpack.i.l.bf16 %v7820_v55  ;;  %v2594_v15 = vperm.slane %v7542_v53, 0  ;;  %vm1416_vm3 = vmor %vm1414_vm15, %vm1415_vm10  ;;  %v4294_v24 = vunpack.i.h.bf16 %v7811_v18 }
 0x239   : > { %v1402_v16 = vsub.f32 1.5, %v1401_v5  ;;  %v1410_v32 = vmul.f32 %v4638_v49, %v1409_v56  ;;  %v2593_v34 = vperm.slane %v7543_v13, 0  ;;  %vm1424_vm1 = vweird.f32 %v1111_v26 }
 0x23a   : > { %v1915_v12 = vpack.c.bf16 %v1851_v46, %v1851_v46  ;;  %v2658_v52 = vmul.f32 %v4267_v9, %v2594_v15  ;;  %v7541_v19 = vrot.slane %v7769_v27, 7 }
 0x23b   : > { %v1403_v40 = vmul.f32 %v4636_v60, %v1402_v16  ;;  %v1411_v28 = vmul.f32 0.5, %v1410_v32  ;;  %v4640_v2 = vpop.eup %4639  ;;  %v2657_v11 = vmul.f32 %v4294_v24, %v2593_v34 }
 0x23c   : > { %v1419_v33 = vmul.f32 %v4640_v2, %v1111_v26  ;;  %v1979_v57 = vpop.f32.mrf.mxu2  ;;  %vm1425_vm12 = vweird.f32 %v4640_v2  ;;  %v2595_v46 = vperm.slane %v7541_v19, 0 }
 0x23d   : > { %v1407_v21 = vsel %vm1406_vm14, %v4636_v60, %v1403_v40  ;;  %v1412_v23 = vsub.f32 1.5, %v1411_v28  ;;  %2236 = vmatmul.bf16.vlgmr.msrb.gmra.mxu1 %v1876_v42  ;;  %v7822_v60 = vld [vmem:[#allocation102_spill] sm:$0xff]  ;;  %v2003_v45 = vpop.f32.mrf.mxu1  ;;  %vm1426_vm7 = vmor %vm1424_vm1, %vm1425_vm12  ;;  %vm3491_vm12 = vcmask 1042434  }
 0x23e   : > { %v1813_v38 = vmul.f32 %v7821_v44, %v1407_v21  ;;  %2313 = vmatpush.bf16.xpose.msrb.mxu1 %v1914_v7  ;;  %v1420_v35 = vmul.f32 %v4640_v2, %v1419_v33  ;;  %v1990_v18 = vpop.f32.mrf.mxu3  ;;  %v2690_v36 = vmul.f32 %v2658_v52, %v2003_v45  ;;  %v4268_v7 = vunpack.i.h.bf16 %v7820_v55 }
 0x23f   : > { %v1413_v25 = vmul.f32 %v4638_v49, %v1412_v23  ;;  %v1013_v41 = vpop.xlane.xlu1 %1012  ;;  %v2689_v29 = vmul.f32 %v2657_v11, %v1990_v18  ;;  %v7825_v18 = vld [vmem:[#allocation13_spill] sm:$0xff] }
 0x240   : > { %v1877_v58 = vpack.c.bf16 %v1813_v38, %v1813_v38  ;;  %v1421_v39 = vmul.f32 0.5, %v1420_v35  ;;  %v1112_v17 = vadd.f32 1e-12, %v1013_v41  ;;  %v6837_v10 = vsel %vm2716_vm0, %v2690_v36, -inf  ;;  %v7824_v38 = vld [vmem:[#allocation110_spill] sm:$0xff] }
 0x241   : > { %v1417_v47 = vsel %vm1416_vm3, %v4638_v49, %v1413_v25  ;;  %2736 = vmax.xlane.f32.xlu0 %v6837_v10  ;;  %v6841_v59 = vsel %vm2716_vm0, %v2689_v29, -inf  ;;  %v2659_v33 = vmul.f32 %v4268_v7, %v2595_v46  ;;  %v2567_v11 = vrot.slane %v7825_v18, 1 }
 0x242   : > { %2249 = vmatmul.bf16.vlgmr.msrb.gmra.mxu2 %v1877_v58  ;;  %v1814_v50 = vmul.f32 %v7822_v60, %v1417_v47  ;;  %v1422_v0 = vsub.f32 1.5, %v1421_v39  ;;  %4641 = vrsqrt.f32 %v1112_v17  ;;  %v1015_v61 = vpop.xlane.xlu2 %1014  ;;  %2733 = vmax.xlane.f32.xlu2 %v6841_v59  ;;  %vm1434_vm11 = vweird.f32 %v1112_v17 }
 0x243   : > { %2326 = vmatpush.bf16.xpose.msrb.mxu2 %v1915_v12  ;;  %v1113_v48 = vadd.f32 1e-12, %v1015_v61 }
 0x244   : > { %v1878_v62 = vpack.c.bf16 %v1814_v50, %v1814_v50  ;;  %v1423_v51 = vmul.f32 %v4640_v2, %v1422_v0 }
 0x245   : > { %4643 = vrsqrt.f32 %v1113_v48  ;;  %v2005_v6 = vpop.f32.mrf.mxu1  ;;  %vm1444_vm8 = vweird.f32 %v1113_v48 }
 0x246   : > { %2262 = vmatmul.bf16.vlgmr.msrb.gmra.mxu3 %v1878_v62  ;;  %v1427_v49 = vsel %vm1426_vm7, %v4640_v2, %v1423_v51  ;;  %v1992_v16 = vpop.f32.mrf.mxu3  ;;  %v7826_v62 = vld [vmem:[#allocation28_spill] sm:$0xff]  ;;  %vm3493_vm7 = vcmask 1043459  }
 0x247   : > { %v1815_v5 = vmul.f32 %v7823_v54, %v1427_v49  ;;  %v4236_v0 = vunpack.i.l.bf16 %v7826_v62  ;;  %v4237_v61 = vunpack.i.h.bf16 %v7826_v62  ;;  %v2597_v49 = vperm.slane %v2567_v11, 0  ;;  %v7827_v16 = vld [vmem:[#allocation34_spill] sm:$0xff] }
 0x248   : > { %v4642_v26 = vpop.eup %4641 }
 0x249   : > { %v1879_v56 = vpack.c.bf16 %v1815_v5, %v1815_v5  ;;  %v1429_v4 = vmul.f32 %v4642_v26, %v1112_v17  ;;  %vm1435_vm6 = vweird.f32 %v4642_v26  ;;  %v7540_v5 = vrot.slane %v7825_v18, 2 }
 0x24a   : > { %v1017_v40 = vpop.xlane.xlu0 %1016  ;;  %vm1436_vm5 = vmor %vm1434_vm11, %vm1435_vm6  ;;  %vm3495_vm11 = vcmask 1044484   ;;  %vm3497_vm6 = vcmask 1045509  }
 0x24b   : > { %v1430_v14 = vmul.f32 %v4642_v26, %v1429_v4  ;;  %v4644_v31 = vpop.eup %4643  ;;  %v1114_v21 = vadd.f32 1e-12, %v1017_v40 }
 0x24c   : > { %v1439_v32 = vmul.f32 %v4644_v31, %v1113_v48  ;;  %vm1445_vm9 = vweird.f32 %v4644_v31 }
 0x24d   : > { %2275 = vmatmul.bf16.vlgmr.msra.gmra.mxu1 %v1879_v56  ;;  %v1431_v42 = vmul.f32 0.5, %v1430_v14  ;;  %4645 = vrsqrt.f32 %v1114_v21  ;;  %vm1446_vm4 = vmor %vm1444_vm8, %vm1445_vm9  ;;  %vm1454_vm13 = vweird.f32 %v1114_v21  ;;  %v4272_v14 = vunpack.i.l.bf16 %v7827_v16 }
 0x24e   : > { %v1440_v8 = vmul.f32 %v4644_v31, %v1439_v32  ;;  %vm3501_vm8 = vcmask 1047559  }
 0x24f   : > { %v1432_v28 = vsub.f32 1.5, %v1431_v42  ;;  %v2661_v42 = vmul.f32 %v4237_v61, %v2597_v49 }
 0x250   : > { %v1441_v9 = vmul.f32 0.5, %v1440_v8 }
 0x251   : > { %v1433_v2 = vmul.f32 %v4642_v26, %v1432_v28 }
 0x252   : > { %v1442_v15 = vsub.f32 1.5, %v1441_v9 }
 0x253   : > { %v1437_v44 = vsel %vm1436_vm5, %v4642_v26, %v1433_v2  ;;  %v2016_v57 = vpop.f32.mrf.mxu2  ;;  %v4646_v25 = vpop.eup %4645  ;;  %vm3499_vm5 = vcmask 1046534  }
 0x254   : > { %v1816_v23 = vmul.f32 %v7824_v38, %v1437_v44  ;;  %v1443_v58 = vmul.f32 %v4644_v31, %v1442_v15  ;;  %v2691_v55 = vmul.f32 %v2659_v33, %v2016_v57  ;;  %v1449_v35 = vmul.f32 %v4646_v25, %v1114_v21 }
 0x255   : > { %vm1455_vm14 = vweird.f32 %v4646_v25  ;;  %v7538_v15 = vrot.slane %v7825_v18, 3 }
 0x256   : > { %v1880_v24 = vpack.c.bf16 %v1816_v23, %v1816_v23  ;;  %v1447_v34 = vsel %vm1446_vm4, %v4644_v31, %v1443_v58  ;;  %v6851_v12 = vsel %vm2716_vm0, %v2691_v55, -inf  ;;  %v1450_v41 = vmul.f32 %v4646_v25, %v1449_v35  ;;  %vm1456_vm15 = vmor %vm1454_vm13, %vm1455_vm14 }
 0x257   : > { %v1817_v47 = vmul.f32 %v5984_v1, %v1447_v34  ;;  %2739 = vmax.xlane.f32.xlu1 %v6851_v12  ;;  %v2596_v1 = vperm.slane %v7825_v18, 0  ;;  %v7537_v34 = vrot.slane %v7825_v18, 4 }
 0x258   : > { %2288 = vmatmul.bf16.vlgmr.msra.gmra.mxu2 %v1880_v24  ;;  %v1019_v52 = vpop.xlane.xlu1 %1018  ;;  %v1451_v39 = vmul.f32 0.5, %v1450_v41 }
 0x259   : > { %v1881_v60 = vpack.c.bf16 %v1817_v47, %v1817_v47  ;;  %v1115_v50 = vadd.f32 1e-12, %v1019_v52  ;;  %v2660_v6 = vmul.f32 %v4236_v0, %v2596_v1  ;;  %v2600_v62 = vperm.slane %v7537_v34, 0 }
 0x25a   : > { %v1452_v45 = vsub.f32 1.5, %v1451_v39  ;;  %v2599_v39 = vperm.slane %v7538_v15, 0  ;;  %v7536_v1 = vrot.slane %v7825_v18, 5 }
 0x25b   : > { %4647 = vrsqrt.f32 %v1115_v50  ;;  %v2018_v17 = vpop.f32.mrf.mxu2  ;;  %2301 = vmatmul.bf16.vlgmr.msra.gmra.mxu3 %v1881_v60  ;;  %vm1464_vm10 = vweird.f32 %v1115_v50  ;;  %v4273_v60 = vunpack.i.h.bf16 %v7827_v16 }
 0x25c   : > { %v1453_v36 = vmul.f32 %v4646_v25, %v1452_v45  ;;  %v2601_v16 = vperm.slane %v7536_v1, 0 }
 0x25e   : > { %v1457_v29 = vsel %vm1456_vm15, %v4646_v25, %v1453_v36  ;;  %v7828_v36 = vld [vmem:[#allocation31_spill] sm:$0xff] }
 0x25f   : > { %v1818_v48 = vmul.f32 %v6060_v30, %v1457_v29  ;;  %v2598_v30 = vperm.slane %v7540_v5, 0 }
 0x261   : > { %v4648_v51 = vpop.eup %4647  ;;  %v1882_v26 = vpack.c.bf16 %v1818_v48, %v1818_v48  ;;  %v2662_v38 = vmul.f32 %v4272_v14, %v2598_v30 }
 0x262   : > { %v1459_v54 = vmul.f32 %v4648_v51, %v1115_v50  ;;  %vm1465_vm3 = vweird.f32 %v4648_v51 }
 0x263   : > { %2314 = vmatmul.bf16.vlgmr.msrb.gmra.mxu1 %v1882_v26  ;;  %vm1466_vm1 = vmor %vm1464_vm10, %vm1465_vm3 }
 0x264   : > { %v1460_v56 = vmul.f32 %v4648_v51, %v1459_v54 }
 0x265   : > { %v2029_v4 = vpop.f32.mrf.mxu3 }
 0x266   : > { %v2692_v31 = vmul.f32 %v2660_v6, %v2029_v4  ;;  %v1461_v32 = vmul.f32 0.5, %v1460_v56  ;;  %v4242_v6 = vunpack.i.h.bf16 %v7828_v36 }
 0x268   : > { %v2042_v40 = vpop.f32.mrf.mxu1  ;;  %v2741_v21 = vsel %vm2716_vm0, %v2692_v31, -inf  ;;  %v1462_v7 = vsub.f32 1.5, %v1461_v32 }
 0x269   : > { %v2693_v28 = vmul.f32 %v2661_v42, %v2042_v40  ;;  %v2861_v8 = vrot.slane %v2741_v21, 4  ;;  %2742 = vmax.xlane.f32.xlu2 %v2741_v21 }
 0x26a   : > { %v1463_v2 = vmul.f32 %v4648_v51, %v1462_v7 }
 0x26b   : > { %v2744_v46 = vsel %vm2716_vm0, %v2693_v28, -inf  ;;  %v2862_v9 = vmax.f32 %v2741_v21, %v2861_v8  ;;  %v7535_v21 = vrot.slane %v7825_v18, 6 }
 0x26c   : > { %2745 = vmax.xlane.f32.xlu0 %v2744_v46  ;;  %v2867_v44 = vrot.slane %v2744_v46, 4  ;;  %v2055_v23 = vpop.f32.mrf.mxu2  ;;  %v1467_v33 = vsel %vm1466_vm1, %v4648_v51, %v1463_v2  ;;  %v2663_v51 = vmul.f32 %v4273_v60, %v2599_v39  ;;  %v7533_v2 = vrot.slane %v7825_v18, 7  ;;  %v7831_v39 = vld [vmem:[#allocation16_spill] sm:$0xff] }
 0x26d   : > { %v2863_v57 = vrot.slane %v2862_v9, 2  ;;  %v2031_v58 = vpop.f32.mrf.mxu3  ;;  %v2694_v55 = vmul.f32 %v2662_v38, %v2055_v23  ;;  %v1819_v25 = vmul.f32 %v6160_v37, %v1467_v33  ;;  %v4241_v37 = vunpack.i.l.bf16 %v7828_v36  ;;  %v7829_v38 = vld [vmem:[#allocation37_spill] sm:$0xff] }
 0x26e   : > { %v2868_v24 = vmax.f32 %v2744_v46, %v2867_v44  ;;  %v4748_v46 = vmov 0   ;;  %v4277_v23 = vunpack.i.l.bf16 %v7829_v38  ;;  %v2602_v33 = vperm.slane %v7535_v21, 0 }
 0x26f   : > { %v2864_v35 = vmax.f32 %v2862_v9, %v2863_v57  ;;  %v6872_v52 = vsel %vm2716_vm0, %v2694_v55, -inf  ;;  %v1883_v50 = vpack.c.bf16 %v1819_v25, %v1819_v25  ;;  %v2664_v26 = vmul.f32 %v4241_v37, %v2600_v62  ;;  %4390 = vset.pattern.permute.xlu0 %v4748_v46  ;;  %4391 = vset.pattern.permute.xlu2 %v4748_v46 }
 0x270   : > { %v2869_v47 = vrot.slane %v2868_v24, 2  ;;  %v2044_v41 = vpop.f32.mrf.mxu1  ;;  %2748 = vmax.xlane.f32.xlu1 %v6872_v52  ;;  %v4278_v57 = vunpack.i.h.bf16 %v7829_v38  ;;  %v2666_v55 = vmul.f32 %v4277_v23, %v2602_v33 }
 0x271   : > { %v2865_v17 = vrot.slane %v2864_v35, 1  ;;  %2327 = vmatmul.bf16.vlgmr.msrb.gmra.mxu2 %v1883_v50  ;;  %4392 = vset.pattern.permute.xlu1 %v4748_v46  ;;  %v7830_v41 = vld [vmem:[#allocation35_spill] sm:$0xff] }
 0x272   : > { %v2870_v45 = vmax.f32 %v2868_v24, %v2869_v47  ;;  %v2603_v24 = vperm.slane %v7533_v2, 0  ;;  %v4246_v60 = vunpack.i.l.bf16 %v7830_v41 }
 0x273   : > { %v2866_v61 = vmax.f32 %v2864_v35, %v2865_v17  ;;  %v2604_v17 = vperm.slane %v7831_v39, 0 }
 0x274   : > { %v2871_v0 = vrot.slane %v2870_v45, 1  ;;  %v2057_v29 = vpop.f32.mrf.mxu2  ;;  %v2667_v47 = vmul.f32 %v4278_v57, %v2603_v24 }
 0x275   : > { %v3588_v42 = vmul.f32 %v7825_v18, %v2866_v61  ;;  %v2668_v62 = vmul.f32 %v4246_v60, %v2604_v17 }
 0x276   : > { %v2872_v48 = vmax.f32 %v2870_v45, %v2871_v0  ;;  %v2068_v49 = vpop.f32.mrf.mxu3 }
 0x277   : > { %v2695_v54 = vmul.f32 %v2663_v51, %v2068_v49 }
 0x278   : > { %v3589_v56 = vmul.f32 %v2872_v48, %v2567_v11  ;;  %v2081_v4 = vpop.f32.mrf.mxu1  ;;  %v2665_v11 = vmul.f32 %v4242_v6, %v2601_v16  ;;  %v2719_v6 = vpop.xlane.xlu2 %2718  ;;  %v2574_v16 = vrot.slane %v7831_v39, 1 }
 0x279   : > { %v2696_v14 = vmul.f32 %v2664_v26, %v2081_v4  ;;  %v6888_v31 = vsel %vm2716_vm0, %v2695_v54, -inf }
 0x27a   : > { %v3658_v32 = vrot.slane %v3589_v56, 7  ;;  %2751 = vmax.xlane.f32.xlu2 %v6888_v31  ;;  %v7832_v56 = vld [vmem:[#allocation49_spill] sm:$0xff] }
 0x27b   : > { %v6893_v40 = vsel %vm2716_vm0, %v2696_v14, -inf  ;;  %v4313_v4 = vunpack.i.l.bf16 %v7832_v56 }
 0x27c   : > { %v6896_v30 = vsel %vm3489_vm2, %v3658_v32, %v3588_v42  ;;  %2754 = vmax.xlane.f32.xlu0 %v6893_v40 }
 0x27d   : > { %v2094_v28 = vpop.f32.mrf.mxu2  ;;  %v3297_v32 = vmul.f32 %v4313_v4, %v2719_v6 }
 0x27e   : > { %v2070_v7 = vpop.f32.mrf.mxu3  ;;  %v2697_v8 = vmul.f32 %v2665_v11, %v2094_v28  ;;  %v4314_v11 = vunpack.i.h.bf16 %v7832_v56 }
 0x27f   : > { %v4247_v7 = vunpack.i.h.bf16 %v7830_v41 }
 0x280   : > { %v2083_v9 = vpop.f32.mrf.mxu1  ;;  %v6902_v44 = vsel %vm2716_vm0, %v2697_v8, -inf  ;;  %v2605_v8 = vperm.slane %v2574_v16, 0 }
 0x281   : > { %2757 = vmax.xlane.f32.xlu1 %v6902_v44 }
 0x282   : > { %v2669_v23 = vmul.f32 %v4247_v7, %v2605_v8  ;;  %v7532_v8 = vrot.slane %v7831_v39, 2 }
 0x285   : > { %v2096_v58 = vpop.f32.mrf.mxu2 }
 0x287   : > { %v2107_v25 = vpop.f32.mrf.mxu3 }
 0x288   : > { %v2698_v35 = vmul.f32 %v2666_v55, %v2107_v25  ;;  %v7833_v55 = vld [vmem:[#allocation52_spill] sm:$0xff] }
 0x289   : > { %v2120_v50 = vpop.f32.mrf.mxu1  ;;  %v4318_v25 = vunpack.i.l.bf16 %v7833_v55 }
 0x28a   : > { %v2699_v45 = vmul.f32 %v2667_v47, %v2120_v50  ;;  %v6914_v36 = vsel %vm2716_vm0, %v2698_v35, -inf }
 0x28b   : > { %2760 = vmax.xlane.f32.xlu2 %v6914_v36 }
 0x28c   : > { %v6918_v37 = vsel %vm2716_vm0, %v2699_v45, -inf }
 0x28d   : > { %2763 = vmax.xlane.f32.xlu0 %v6918_v37 }
 0x28e   : > { %v2133_v0 = vpop.f32.mrf.mxu2 }
 0x28f   : > { %v2109_v29 = vpop.f32.mrf.mxu3  ;;  %v2700_v51 = vmul.f32 %v2668_v62, %v2133_v0 }
 0x291   : > { %v2122_v61 = vpop.f32.mrf.mxu1  ;;  %v2765_v48 = vsel %vm2716_vm0, %v2700_v51, -inf  ;;  %v2722_v14 = vpop.xlane.xlu1 %2721 }
 0x292   : > { %2766 = vmax.xlane.f32.xlu1 %v2765_v48  ;;  %v3298_v46 = vmul.f32 %v4314_v11, %v2722_v14  ;;  %v2909_v38 = vrot.slane %v2765_v48, 4 }
 0x294   : > { %v2910_v33 = vmax.f32 %v2765_v48, %v2909_v38  ;;  %v7834_v38 = vld [vmem:[#allocation36_spill] sm:$0xff] }
 0x296   : > { %v2135_v49 = vpop.f32.mrf.mxu2  ;;  %v2911_v50 = vrot.slane %v2910_v33, 2 }
 0x298   : > { %v2146_v54 = vpop.f32.mrf.mxu3  ;;  %v2912_v45 = vmax.f32 %v2910_v33, %v2911_v50  ;;  %v2606_v33 = vperm.slane %v7532_v8, 0  ;;  %v7835_v50 = vld [vmem:[#allocation42_spill] sm:$0xff]  ;;  %v2825_v8 = vrot.slane %v6733_v43, 4 }
 0x299   : > { %v2159_v26 = vpop.f32.mrf.mxu1  ;;  %v2701_v58 = vmul.f32 %v2669_v23, %v2146_v54  ;;  %v4298_v23 = vunpack.i.l.bf16 %v7834_v38 }
 0x29a   : > { %v2913_v48 = vrot.slane %v2912_v45, 1 }
 0x29b   : > { %v2725_v57 = vpop.xlane.xlu0 %2724  ;;  %v2768_v41 = vsel %vm2716_vm0, %v2701_v58, -inf  ;;  %v7530_v58 = vrot.slane %v7831_v39, 5 }
 0x29c   : > { %v3299_v47 = vmul.f32 %v4318_v25, %v2725_v57  ;;  %v2915_v17 = vrot.slane %v2768_v41, 4  ;;  %v2914_v6 = vmax.f32 %v2912_v45, %v2913_v48 }
 0x29d   : > { %v2609_v45 = vperm.slane %v7530_v58, 0  ;;  %v7841_v58 = vld [vmem:[#allocation15_spill] sm:$0xff] }
 0x29e   : > { %v2916_v0 = vmax.f32 %v2768_v41, %v2915_v17  ;;  %v4283_v17 = vunpack.i.h.bf16 %v7835_v50 }
 0x29f   : > { %v6924_v42 = vpop.f32.mrf.mxu2 }
 0x2a0   : > { %v2148_v28 = vpop.f32.mrf.mxu3  ;;  %v2917_v51 = vrot.slane %v2916_v0, 2 }
 0x2a1   : > { %v2161_v9 = vpop.f32.mrf.mxu1  ;;  %3362 = vperm.xlu0 %4390, %v3297_v32   ;;  %v3596_v28 = vmul.f32 %v7831_v39, %v2914_v6 }
 0x2a2   : > { %v2918_v49 = vmax.f32 %v2916_v0, %v2917_v51  ;;  %v4299_v51 = vunpack.i.h.bf16 %v7834_v38 }
 0x2a3   : > { %3365 = vperm.xlu2 %4391, %v3298_v46  }
 0x2a4   : > { %v2919_v54 = vrot.slane %v2918_v49, 1 }
 0x2a6   : > { %v2920_v4 = vmax.f32 %v2918_v49, %v2919_v54  ;;  %v2673_v49 = vmul.f32 %v4283_v17, %v2609_v45 }
 0x2a7   : > { %v2174_v24 = vpop.f32.mrf.mxu2 }
 0x2a8   : > { %v6929_v35 = vpop.f32.mrf.mxu3  ;;  %v3597_v32 = vmul.f32 %v2920_v4, %v2574_v16  ;;  %v2670_v16 = vmul.f32 %v4298_v23, %v2606_v33  ;;  %v7836_v33 = vld [vmem:[#allocation51_spill] sm:$0xff] }
 0x2aa   : > { %v2198_v60 = vpop.f32.mrf.mxu1  ;;  %v3672_v7 = vrot.slane %v3597_v32, 7  ;;  %v2702_v25 = vmul.f32 %v2670_v16, %v2159_v26 }
 0x2ab   : > { %3368 = vperm.xlu1 %4392, %v3299_v47   ;;  %v7531_v47 = vrot.slane %v7831_v39, 3  ;;  %v2705_v6 = vmul.f32 %v2673_v49, %v2198_v60 }
 0x2ac   : > { %v6941_v46 = vsel %vm3489_vm2, %v3672_v7, %v3596_v28  ;;  %v6961_v48 = vsel %vm2716_vm0, %v2702_v25, -inf }
 0x2ad   : > { %v6966_v28 = vsel %vm2716_vm0, %v2705_v6, -inf }
 0x2af   : > { %v6932_v62 = vpop.f32.mrf.mxu2 }
 0x2b0   : > { %v2187_v29 = vpop.f32.mrf.mxu3 }
 0x2b2   : > { %v2200_v61 = vpop.f32.mrf.mxu1 }
 0x2b3   : > { %v2607_v61 = vperm.slane %v7531_v47, 0  ;;  %v2612_v47 = vperm.slane %v7841_v58, 0 }
 0x2b4   : > { %v6981_v45 = vpop.xlane.xlu0 %2736 }
 0x2b5   : > { %v2671_v54 = vmul.f32 %v4299_v51, %v2607_v61  ;;  %v2731_v51 = vpop.xlane.xlu1 %2730 }
 0x2b7   : > { %v2213_v56 = vpop.f32.mrf.mxu2 }
 0x2b8   : > { %v6934_v14 = vpop.f32.mrf.mxu3  ;;  %v2703_v56 = vmul.f32 %v2671_v54, %v6924_v42 }
 0x2ba   : > { %v6936_v11 = vpop.f32.mrf.mxu1  ;;  %v6970_v7 = vsel %vm2716_vm0, %v2703_v56, -inf }
 0x2c0   : > { %v2226_v9 = vpop.f32.mrf.mxu3 }
 0x2c1   : > { %v2728_v9 = vpop.xlane.xlu2 %2727 }
 0x2c2   : > { %v2239_v57 = vpop.f32.mrf.mxu1 }
 0x2c3   : > { %v4324_v57 = vunpack.i.h.bf16 %v7836_v33 }
 0x2c5   : > { %v6946_v24 = vpop.f32.mrf.mxu2 }
 0x2c9   : > { %v6953_v0 = vpop.f32.mrf.mxu3  ;;  %v2734_v23 = vpop.xlane.xlu2 %2733 }
 0x2ca   : > { %v6955_v29 = vpop.f32.mrf.mxu1  ;;  %v3302_v25 = vmul.f32 %v4324_v57, %v2734_v23 }
 0x2cb   : > { %2772 = vmax.xlane.f32.xlu0 %v6961_v48 }
 0x2cc   : > { %2769 = vmax.xlane.f32.xlu2 %v2768_v41  ;;  %v4319_v41 = vunpack.i.h.bf16 %v7833_v55 }
 0x2cd   : > { %v2252_v26 = vpop.f32.mrf.mxu2 }
 0x2ce   : > { %v3300_v42 = vmul.f32 %v4319_v41, %v2728_v9  ;;  %v4323_v26 = vunpack.i.l.bf16 %v7836_v33  ;;  %v7534_v9 = vrot.slane %v7831_v39, 4  ;;  %v7838_v41 = vld [vmem:[#allocation60_spill] sm:$0xff] }
 0x2d0   : > { %v3301_v49 = vmul.f32 %v4323_v26, %v2731_v51  ;;  %v2608_v51 = vperm.slane %v7534_v9, 0  ;;  %v7840_v26 = vld [vmem:[#allocation41_spill] sm:$0xff]  ;;  %v2826_v9 = vmax.f32 %v6733_v43, %v2825_v8 }
 0x2d1   : > { %v2265_v4 = vpop.f32.mrf.mxu3 }
 0x2d2   : > { %v2278_v32 = vpop.f32.mrf.mxu1 }
 0x2d3   : > { %2781 = vmax.xlane.f32.xlu0 %v6966_v28  ;;  %v6992_v32 = vpop.xlane.xlu1 %2739 }
 0x2d5   : > { %2775 = vmax.xlane.f32.xlu1 %v6970_v7 }
 0x2db   : > { %v6973_v38 = vpop.f32.mrf.mxu2 }
 0x2dc   : > { %v6986_v6 = vpop.xlane.xlu2 %2742 }
 0x2de   : > { %v6976_v60 = vpop.f32.mrf.mxu3 }
 0x2df   : > { %v6984_v54 = vpop.xlane.xlu0 %2745 }
 0x2e0   : > { %v6979_v17 = vpop.f32.mrf.mxu1 }
 0x2e3   : > { %v2291_v16 = vpop.f32.mrf.mxu2 }
 0x2e4   : > { %3371 = vperm.xlu2 %4391, %v3300_v42   ;;  %v4349_v42 = vunpack.i.h.bf16 %v7838_v41 }
 0x2e6   : > { %v2304_v61 = vpop.f32.mrf.mxu3 }
 0x2e7   : > { %3377 = vperm.xlu0 %4390, %v3302_v25   ;;  %v4282_v25 = vunpack.i.l.bf16 %v7835_v50  ;;  %v7003_v61 = vpop.xlane.xlu1 %2748  ;;  %v2831_v50 = vrot.slane %v6679_v63, 4 }
 0x2e8   : > { %v2317_v55 = vpop.f32.mrf.mxu1 }
 0x2e9   : > { %v2672_v55 = vmul.f32 %v4282_v25, %v2608_v51  ;;  %v7842_v25 = vld [vmem:[#allocation40_spill] sm:$0xff] }
 0x2ea   : > { %v4251_v51 = vunpack.i.l.bf16 %v7842_v25 }
 0x2ed   : > { %v6996_v23 = vpop.xlane.xlu2 %2751 }
 0x2ee   : > { %3374 = vperm.xlu1 %4392, %v3301_v49   ;;  %v4303_v49 = vunpack.i.l.bf16 %v7840_v26 }
 0x2ef   : > { %v6990_v4 = vpop.xlane.xlu0 %2754 }
 0x2f4   : > { %v6988_v56 = vpop.f32.mrf.mxu2  ;;  %v7021_v15 = vpop.xlane.xlu1 %2757 }
 0x2f5   : > { %7837 = vst [vmem:[#allocation71_spill] sm:$0xff] %v6988_v56  ;;  %v7848_v56 = vld [vmem:[#allocation56_spill] sm:$0xff] }
 0x2fc   : > { %v2330_v33 = vpop.f32.mrf.mxu2 }
 0x2fd   : > { %v2704_v33 = vmul.f32 %v2672_v55, %v6929_v35  ;;  %v2832_v35 = vmax.f32 %v6679_v63, %v2831_v50  ;;  %v2827_v55 = vrot.slane %v2826_v9, 2 }
 0x2fe   : > { %v7008_v2 = vpop.xlane.xlu2 %2760 }
 0x2ff   : > { %v7016_v1 = vsel %vm2716_vm0, %v2704_v33, -inf  ;;  %v2833_v8 = vrot.slane %v2832_v35, 2 }
 0x300   : > { %v2764_v57 = vpop.xlane.xlu0 %2763 }
 0x301   : > { %v6998_v16 = vmul.f32 %v4349_v42, %v2764_v57  ;;  %v7539_v42 = vrot.slane %v7831_v39, 6  ;;  %v2676_v57 = vmul.f32 %v4303_v49, %v2612_v47  ;;  %v2828_v49 = vmax.f32 %v2826_v9, %v2827_v55 }
 0x302   : > { %v2834_v63 = vmax.f32 %v2832_v35, %v2833_v8  ;;  %v2837_v9 = vrot.slane %v6822_v3, 4  ;;  %v7844_v35 = vrot.slane %v7769_v27, 2 }
 0x303   : > { %7839 = vst [vmem:[#allocation47_spill] sm:$0xff] %v6998_v16  ;;  %v2708_v21 = vmul.f32 %v2676_v57, %v6936_v11  ;;  %v2610_v34 = vperm.slane %v7539_v42, 0  ;;  %v7843_v42 = vld [vmem:[#allocation12_spill] sm:$0xff]  ;;  %v4328_v16 = vunpack.i.l.bf16 %v7846_v20 }
 0x304   : > { %v2838_v55 = vmax.f32 %v6822_v3, %v2837_v9  ;;  %vm3772_vm9 = vcmp.eq.s32.totalorder %v7843_v42, 0 }
 0x305   : > { %v7026_v47 = vsel %vm2716_vm0, %v2708_v21, -inf  ;;  %v2674_v43 = vmul.f32 %v4251_v51, %v2610_v34  ;;  %v7032_v53 = vpop.xlane.xlu1 %2766  ;;  %v2829_v21 = vrot.slane %v2828_v49, 1  ;;  %v2835_v51 = vrot.slane %v2834_v63, 1 }
 0x306   : > { %v3366_v11 = vpop.permute.xlu2 %3365  ;;  %v2839_v13 = vrot.slane %v2838_v55, 2 }
 0x307   : > { %v2706_v33 = vmul.f32 %v2674_v43, %v6932_v62  ;;  %v3458_v5 = vperm.slane %v3366_v11, %v7843_v42  ;;  %v2830_v62 = vmax.f32 %v2828_v49, %v2829_v21  ;;  %v2836_v11 = vmax.f32 %v2834_v63, %v2835_v51 }
 0x308   : > { %v7847_v49 = vrot.slane %v7769_v27, 3  ;;  %v3303_v63 = vmul.f32 %v4328_v16, %v6981_v45  ;;  %v2840_v51 = vmax.f32 %v2838_v55, %v2839_v13  ;;  %v2849_v13 = vrot.slane %v6837_v10, 4 }
 0x309   : > { %v7036_v34 = vsel %vm2716_vm0, %v2706_v33, -inf  ;;  %v3582_v8 = vmul.f32 %v2830_v62, %v7844_v35  ;;  %v4329_v16 = vunpack.i.h.bf16 %v7846_v20 }
 0x30a   : > { %v3583_v21 = vmul.f32 %v2836_v11, %v7847_v49  ;;  %v2841_v35 = vrot.slane %v2840_v51, 1  ;;  %v4339_v11 = vunpack.i.h.bf16 %v7848_v56 }
 0x30b   : > { %v3646_v3 = vrot.slane %v3582_v8, 6 }
 0x30c   : > { %v3648_v62 = vrot.slane %v3583_v21, 5  ;;  %v3308_v45 = vmul.f32 %v4339_v11, %v6996_v23  ;;  %v2850_v21 = vmax.f32 %v6837_v10, %v2849_v13  ;;  %v2581_v23 = vrot.slane %v7841_v58, 1  ;;  %v7850_v11 = vld [vmem:[#allocation63_spill] sm:$0xff] }
 0x30d   : > { %2778 = vmax.xlane.f32.xlu2 %v7016_v1  ;;  %v2957_v10 = vrot.slane %v7026_v47, 4 }
 0x30f   : > { %v2958_v13 = vmax.f32 %v7026_v47, %v2957_v10 }
 0x311   : > { %2790 = vmax.xlane.f32.xlu0 %v7026_v47 }
 0x313   : > { %v3363_v57 = vpop.permute.xlu0 %3362 }
 0x314   : > { %v3457_v19 = vperm.slane %v3363_v57, %v7843_v42 }
 0x316   : > { %v3490_v50 = vsel %vm3489_vm2, %v3458_v5, %v3457_v19  ;;  %v7845_v5 = vld [vmem:[#allocation55_spill] sm:$0xff] }
 0x317   : > { %v4333_v33 = vunpack.i.l.bf16 %v7845_v5 }
 0x318   : > { %2784 = vmax.xlane.f32.xlu1 %v7036_v34 }
 0x319   : > { %v3305_v9 = vmul.f32 %v4333_v33, %v6986_v6  ;;  %v2842_v6 = vmax.f32 %v2840_v51, %v2841_v35  ;;  %v3304_v33 = vmul.f32 %v4329_v16, %v6992_v32  ;;  %v7851_v16 = vrot.slane %v7769_v27, 5 }
 0x31d   : > { %v3369_v43 = vpop.permute.xlu1 %3368 }
 0x31e   : > { %v3459_v57 = vperm.slane %v3369_v43, %v7843_v42  ;;  %v3647_v43 = vsel %vm3491_vm12, %v3646_v3, %v6778_v22  ;;  %v7849_v22 = vrot.slane %v7769_v27, 4 }
 0x320   : > { %v7045_v19 = vsel %vm3491_vm12, %v3459_v57, %v3490_v50  ;;  %v2843_v50 = vrot.slane %v6841_v59, 4  ;;  %v3649_v57 = vsel %vm3493_vm7, %v3648_v62, %v3647_v43  ;;  %v3584_v49 = vmul.f32 %v2842_v6, %v7849_v22 }
 0x321   : > { %v4304_v62 = vunpack.i.h.bf16 %v7840_v26  ;;  %v2855_v6 = vrot.slane %v6851_v12, 4 }
 0x322   : > { %v2844_v8 = vmax.f32 %v6841_v59, %v2843_v50  ;;  %v2851_v59 = vrot.slane %v2850_v21, 2  ;;  %v2613_v50 = vperm.slane %v2581_v23, 0 }
 0x324   : > { %v2845_v55 = vrot.slane %v2844_v8, 2  ;;  %v2852_v32 = vmax.f32 %v2850_v21, %v2851_v59  ;;  %v2856_v21 = vmax.f32 %v6851_v12, %v2855_v6 }
 0x325   : > { %3386 = vperm.xlu0 %4390, %v3305_v9   ;;  %3380 = vperm.xlu2 %4391, %v3303_v63   ;;  %v3650_v63 = vrot.slane %v3584_v49, 4  ;;  %v4338_v9 = vunpack.i.l.bf16 %v7848_v56  ;;  %v2677_v56 = vmul.f32 %v4304_v62, %v2613_v50 }
 0x326   : > { %v2846_v3 = vmax.f32 %v2844_v8, %v2845_v55  ;;  %v4358_v8 = vunpack.i.l.bf16 %v7850_v11  ;;  %v2580_v55 = vrot.slane %v7831_v39, 7 }
 0x327   : > { %v3307_v20 = vmul.f32 %v4338_v9, %v7003_v61  ;;  %v3651_v43 = vsel %vm3495_vm11, %v3650_v63, %v3649_v57  ;;  %v4252_v63 = vunpack.i.h.bf16 %v7842_v25  ;;  %v2583_v25 = vrot.slane %v7841_v58, 3 }
 0x328   : > { %v2847_v51 = vrot.slane %v2846_v3, 1  ;;  %v2611_v47 = vperm.slane %v2580_v55, 0 }
 0x32a   : > { %v2848_v35 = vmax.f32 %v2846_v3, %v2847_v51  ;;  %v2959_v3 = vrot.slane %v2958_v13, 2 }
 0x32c   : > { %v3585_v26 = vmul.f32 %v2848_v35, %v7851_v16  ;;  %v2960_v50 = vmax.f32 %v2958_v13, %v2959_v3 }
 0x32d   : > { %3395 = vperm.xlu0 %4390, %v3308_v45   ;;  %v2853_v45 = vrot.slane %v2852_v32, 1 }
 0x32e   : > { %v3652_v59 = vrot.slane %v3585_v26, 3  ;;  %v2961_v26 = vrot.slane %v2960_v50, 1 }
 0x32f   : > { %v2854_v49 = vmax.f32 %v2852_v32, %v2853_v45  ;;  %v2675_v32 = vmul.f32 %v4252_v63, %v2611_v47 }
 0x330   : > { %v3653_v12 = vsel %vm3497_vm6, %v3652_v59, %v3651_v43  ;;  %v2615_v43 = vperm.slane %v2583_v25, 0 }
 0x331   : > { %3383 = vperm.xlu1 %4392, %v3304_v33   ;;  %v2709_v33 = vmul.f32 %v2677_v56, %v6946_v24  ;;  %v7852_v24 = vrot.slane %v7769_v27, 6 }
 0x333   : > { %v2792_v9 = vsel %vm2716_vm0, %v2709_v33, -inf  ;;  %v3586_v62 = vmul.f32 %v2854_v49, %v7852_v24  ;;  %v7853_v49 = vld [vmem:[#allocation46_spill] sm:$0xff] }
 0x334   : > { %v2963_v51 = vrot.slane %v2792_v9, 4  ;;  %v4288_v3 = vunpack.i.h.bf16 %v7853_v49 }
 0x336   : > { %v2964_v10 = vmax.f32 %v2792_v9, %v2963_v51  ;;  %v2873_v51 = vrot.slane %v6872_v52, 4 }
 0x338   : > { %v2965_v6 = vrot.slane %v2964_v10, 2 }
 0x339   : > { %3392 = vperm.xlu1 %4392, %v3307_v20   ;;  %v2857_v20 = vrot.slane %v2856_v21, 2 }
 0x33a   : > { %v2966_v33 = vmax.f32 %v2964_v10, %v2965_v6 }
 0x33b   : > { %v2858_v56 = vmax.f32 %v2856_v21, %v2857_v20  ;;  %v2962_v21 = vmax.f32 %v2960_v50, %v2961_v26  ;;  %v2679_v20 = vmul.f32 %v4288_v3, %v2615_v43  ;;  %v7854_v50 = vrot.slane %v7769_v27, 7 }
 0x33c   : > { %v2967_v63 = vrot.slane %v2966_v33, 1 }
 0x33d   : > { %v2859_v59 = vrot.slane %v2858_v56, 1  ;;  %v3604_v10 = vmul.f32 %v7841_v58, %v2962_v21 }
 0x33e   : > { %v2773_v61 = vpop.xlane.xlu0 %2772 }
 0x33f   : > { %v7079_v57 = vmul.f32 %v4358_v8, %v2773_v61  ;;  %v7081_v22 = vpop.xlane.xlu2 %2769  ;;  %v3654_v8 = vrot.slane %v3586_v62, 2  ;;  %v2707_v61 = vmul.f32 %v2675_v32, %v6934_v14  ;;  %v2968_v14 = vmax.f32 %v2966_v33, %v2967_v63 }
 0x340   : > { %v2711_v62 = vmul.f32 %v2679_v20, %v6955_v29  ;;  %v2879_v29 = vrot.slane %v6888_v31, 4  ;;  %v2891_v63 = vrot.slane %v6902_v44, 4 }
 0x341   : > { %v3655_v16 = vsel %vm3499_vm5, %v3654_v8, %v3653_v12  ;;  %v7101_v47 = vsel %vm2716_vm0, %v2707_v61, -inf  ;;  %v3605_v24 = vmul.f32 %v2968_v14, %v2581_v23 }
 0x342   : > { %v2880_v27 = vmax.f32 %v6888_v31, %v2879_v29  ;;  %v2892_v31 = vmax.f32 %v6902_v44, %v2891_v63  ;;  %v2897_v44 = vrot.slane %v6914_v36, 4  ;;  %v7856_v29 = vrot.slane %v7825_v18, 3 }
 0x343   : > { %v3686_v32 = vrot.slane %v3605_v24, 7 }
 0x344   : > { %v2881_v43 = vrot.slane %v2880_v27, 2 }
 0x345   : > { %v7109_v12 = vsel %vm3489_vm2, %v3686_v32, %v3604_v10  ;;  %v7855_v10 = vrot.slane %v7825_v18, 2 }
 0x346   : > { %v2882_v24 = vmax.f32 %v2880_v27, %v2881_v43 }
 0x347   : > { %v3372_v35 = vpop.permute.xlu2 %3371 }
 0x348   : > { %v3460_v45 = vperm.slane %v3372_v35, %v7843_v42  ;;  %v2874_v35 = vmax.f32 %v6872_v52, %v2873_v51  ;;  %v2885_v52 = vrot.slane %v6893_v40, 4  ;;  %v4334_v51 = vunpack.i.h.bf16 %v7845_v5 }
 0x34a   : > { %v3494_v13 = vsel %vm3493_vm7, %v3460_v45, %v7045_v19  ;;  %v2860_v19 = vmax.f32 %v2858_v56, %v2859_v59  ;;  %v7114_v45 = vsel %vm2716_vm0, %v2711_v62, -inf  ;;  %v2875_v6 = vrot.slane %v2874_v35, 2  ;;  %v7118_v56 = vpop.xlane.xlu1 %2775 }
 0x34b   : > { %v2886_v33 = vmax.f32 %v6893_v40, %v2885_v52  ;;  %v3306_v40 = vmul.f32 %v4334_v51, %v6984_v54  ;;  %v4348_v62 = vunpack.i.l.bf16 %v7838_v41  ;;  %v2903_v54 = vrot.slane %v6918_v37, 4  ;;  %v7858_v51 = vld [vmem:[#allocation59_spill] sm:$0xff] }
 0x34c   : > { %v3587_v8 = vmul.f32 %v2860_v19, %v7854_v50  ;;  %v2876_v26 = vmax.f32 %v2874_v35, %v2875_v6  ;;  %v2883_v35 = vrot.slane %v2882_v24, 1  ;;  %v2893_v50 = vrot.slane %v2892_v31, 2 }
 0x34d   : > { %v2887_v21 = vrot.slane %v2886_v33, 2 }
 0x34e   : > { %2787 = vmax.xlane.f32.xlu2 %v7101_v47  ;;  %v3656_v23 = vrot.slane %v3587_v8, 1  ;;  %v2877_v3 = vrot.slane %v2876_v26, 1  ;;  %v2884_v8 = vmax.f32 %v2882_v24, %v2883_v35  ;;  %v7859_v24 = vrot.slane %v7825_v18, 5 }
 0x34f   : > { %v2888_v19 = vmax.f32 %v2886_v33, %v2887_v21 }
 0x350   : > { %v7122_v61 = vsel %vm3501_vm8, %v3656_v23, %v3655_v16  ;;  %v2878_v16 = vmax.f32 %v2876_v26, %v2877_v3  ;;  %v2894_v23 = vmax.f32 %v2892_v31, %v2893_v50  ;;  %v3591_v41 = vmul.f32 %v2884_v8, %v7856_v29 }
 0x351   : > { %v2889_v5 = vrot.slane %v2888_v19, 1  ;;  %v2898_v26 = vmax.f32 %v6914_v36, %v2897_v44  ;;  %v2904_v3 = vmax.f32 %v6918_v37, %v2903_v54  ;;  %v7860_v29 = vrot.slane %v7825_v18, 6 }
 0x352   : > { %v3590_v32 = vmul.f32 %v2878_v16, %v7855_v10  ;;  %v2895_v52 = vrot.slane %v2894_v23, 1  ;;  %v3662_v43 = vrot.slane %v3591_v41, 5  ;;  %v4344_v16 = vunpack.i.h.bf16 %v7858_v51 }
 0x353   : > { %v2890_v6 = vmax.f32 %v2888_v19, %v2889_v5 }
 0x354   : > { %v2896_v63 = vmax.f32 %v2894_v23, %v2895_v52  ;;  %v3310_v37 = vmul.f32 %v4344_v16, %v7021_v15  ;;  %v7861_v52 = vrot.slane %v7825_v18, 7 }
 0x356   : > { %v3593_v31 = vmul.f32 %v2896_v63, %v7859_v24 }
 0x357   : > { %2799 = vmax.xlane.f32.xlu0 %v7114_v45 }
 0x358   : > { %v3666_v10 = vrot.slane %v3593_v31, 3 }
 0x360   : > { %v3375_v59 = vpop.permute.xlu1 %3374 }
 0x361   : > { %v3461_v14 = vperm.slane %v3375_v59, %v7843_v42  ;;  %v2899_v59 = vrot.slane %v2898_v26, 2 }
 0x363   : > { %v7130_v20 = vsel %vm3495_vm11, %v3461_v14, %v3494_v13  ;;  %2793 = vmax.xlane.f32.xlu1 %v2792_v9  ;;  %v3311_v13 = vmul.f32 %v4348_v62, %v7008_v2  ;;  %v3660_v9 = vrot.slane %v3590_v32, 6  ;;  %v7857_v2 = vrot.slane %v7825_v18, 4 }
 0x364   : > { %v2905_v14 = vrot.slane %v2904_v3, 2 }
 0x365   : > { %v3661_v27 = vsel %vm3491_vm12, %v3660_v9, %v6896_v30  ;;  %v3592_v33 = vmul.f32 %v2890_v6, %v7857_v2  ;;  %v2921_v30 = vrot.slane %v6961_v48, 4  ;;  %v2927_v9 = vrot.slane %v6970_v7, 4 }
 0x366   : > { %3389 = vperm.xlu2 %4391, %v3306_v40   ;;  %v2900_v40 = vmax.f32 %v2898_v26, %v2899_v59  ;;  %v3663_v36 = vsel %vm3493_vm7, %v3662_v43, %v3661_v27  ;;  %v2906_v19 = vmax.f32 %v2904_v3, %v2905_v14  ;;  %v4287_v6 = vunpack.i.l.bf16 %v7853_v49  ;;  %v7862_v14 = vld [vmem:[#allocation45_spill] sm:$0xff] }
 0x367   : > { %v3664_v21 = vrot.slane %v3592_v33, 4  ;;  %v2922_v50 = vmax.f32 %v6961_v48, %v2921_v30  ;;  %v2928_v54 = vmax.f32 %v6970_v7, %v2927_v9  ;;  %v2586_v27 = vrot.slane %v7841_v58, 6 }
 0x368   : > { %v2901_v32 = vrot.slane %v2900_v40, 1  ;;  %v2907_v35 = vrot.slane %v2906_v19, 1  ;;  %v2933_v49 = vrot.slane %v7016_v1, 4  ;;  %v2939_v7 = vrot.slane %v6966_v28, 4 }
 0x369   : > { %v3665_v62 = vsel %vm3495_vm11, %v3664_v21, %v3663_v36  ;;  %v2923_v44 = vrot.slane %v2922_v50, 2  ;;  %v2929_v43 = vrot.slane %v2928_v54, 2  ;;  %v4308_v16 = vunpack.i.l.bf16 %v7862_v14 }
 0x36a   : > { %v2902_v5 = vmax.f32 %v2900_v40, %v2901_v32  ;;  %v3667_v8 = vsel %vm3497_vm6, %v3666_v10, %v3665_v62  ;;  %v2908_v23 = vmax.f32 %v2906_v19, %v2907_v35  ;;  %v2618_v24 = vperm.slane %v2586_v27, 0 }
 0x36b   : > { %3404 = vperm.xlu0 %4390, %v3311_v13   ;;  %v2582_v13 = vrot.slane %v7841_v58, 2  ;;  %v2924_v48 = vmax.f32 %v2922_v50, %v2923_v44  ;;  %v2930_v31 = vmax.f32 %v2928_v54, %v2929_v43  ;;  %v2934_v40 = vmax.f32 %v7016_v1, %v2933_v49 }
 0x36c   : > { %v3594_v41 = vmul.f32 %v2902_v5, %v7860_v29  ;;  %v3595_v26 = vmul.f32 %v2908_v23, %v7861_v52  ;;  %v2940_v19 = vmax.f32 %v6966_v28, %v2939_v7  ;;  %v2682_v30 = vmul.f32 %v4308_v16, %v2618_v24  ;;  %v2782_v16 = vpop.xlane.xlu0 %2781 }
 0x36d   : > { %v2614_v15 = vperm.slane %v2582_v13, 0  ;;  %v2925_v59 = vrot.slane %v2924_v48, 1  ;;  %v2935_v32 = vrot.slane %v2934_v40, 2  ;;  %v2945_v23 = vrot.slane %v7036_v34, 4 }
 0x36e   : > { %v3668_v2 = vrot.slane %v3594_v41, 2  ;;  %v3670_v33 = vrot.slane %v3595_v26, 1  ;;  %v2714_v10 = vmul.f32 %v2682_v30, %v6979_v17  ;;  %v2941_v50 = vrot.slane %v2940_v19, 2  ;;  %v7868_v30 = vld [vmem:[#allocation61_spill] sm:$0xff] }
 0x36f   : > { %v2678_v3 = vmul.f32 %v4287_v6, %v2614_v15  ;;  %v2926_v36 = vmax.f32 %v2924_v48, %v2925_v59  ;;  %v2936_v9 = vmax.f32 %v2934_v40, %v2935_v32  ;;  %v2584_v44 = vrot.slane %v7841_v58, 4  ;;  %v7865_v48 = vld [vmem:[#allocation44_spill] sm:$0xff] }
 0x370   : > { %v3669_v63 = vsel %vm3499_vm5, %v3668_v2, %v3667_v8  ;;  %v7188_v1 = vsel %vm2716_vm0, %v2714_v10, -inf  ;;  %v2942_v8 = vmax.f32 %v2940_v19, %v2941_v50  ;;  %v7864_v17 = vrot.slane %v7831_v39, 3 }
 0x371   : > { %v7172_v21 = vsel %vm3501_vm8, %v3670_v33, %v3669_v63  ;;  %v2710_v18 = vmul.f32 %v2678_v3, %v6953_v0  ;;  %v7863_v0 = vrot.slane %v7831_v39, 2  ;;  %v2937_v15 = vrot.slane %v2936_v9, 1 }
 0x372   : > { %v2943_v54 = vrot.slane %v2942_v8, 1  ;;  %v2946_v41 = vmax.f32 %v7036_v34, %v2945_v23  ;;  %v4256_v52 = vunpack.i.l.bf16 %v7865_v48  ;;  %v2616_v26 = vperm.slane %v2584_v44, 0 }
 0x373   : > { %v7181_v62 = vsel %vm2716_vm0, %v2710_v18, -inf  ;;  %v3598_v35 = vmul.f32 %v2926_v36, %v7863_v0  ;;  %v2938_v33 = vmax.f32 %v2936_v9, %v2937_v15  ;;  %v2951_v49 = vrot.slane %v7101_v47, 4 }
 0x374   : > { %v2944_v3 = vmax.f32 %v2942_v8, %v2943_v54  ;;  %v2947_v43 = vrot.slane %v2946_v41, 2  ;;  %v2680_v63 = vmul.f32 %v4256_v52, %v2616_v26  ;;  %v7866_v59 = vrot.slane %v7831_v39, 4  ;;  %v7869_v8 = vld [vmem:[#allocation64_spill] sm:$0xff] }
 0x375   : > { %v3674_v28 = vrot.slane %v3598_v35, 6  ;;  %v7867_v34 = vrot.slane %v7831_v39, 5  ;;  %v2952_v40 = vmax.f32 %v7101_v47, %v2951_v49  ;;  %v4343_v36 = vunpack.i.l.bf16 %v7858_v51 }
 0x376   : > { %v3600_v7 = vmul.f32 %v2938_v33, %v7866_v59  ;;  %v2712_v24 = vmul.f32 %v2680_v63, %v6973_v38  ;;  %v7214_v38 = vpop.permute.xlu0 %3377  ;;  %v4364_v23 = vunpack.i.h.bf16 %v7869_v8  ;;  %v7871_v33 = vld [vmem:[#allocation69_spill] sm:$0xff] }
 0x377   : > { %v3675_v29 = vsel %vm3491_vm12, %v3674_v28, %v6941_v46  ;;  %v3601_v18 = vmul.f32 %v2944_v3, %v7867_v34  ;;  %v3309_v32 = vmul.f32 %v4343_v36, %v6990_v4  ;;  %v2953_v50 = vrot.slane %v2952_v40, 2 }
 0x378   : > { %v3678_v19 = vrot.slane %v3600_v7, 4  ;;  %v2801_v0 = vsel %vm2716_vm0, %v2712_v24, -inf  ;;  %v3318_v15 = vmul.f32 %v4364_v23, %v2782_v16  ;;  %v4373_v3 = vunpack.i.l.bf16 %v7871_v33 }
 0x379   : > { %v3680_v10 = vrot.slane %v3601_v18, 3  ;;  %v2954_v28 = vmax.f32 %v2952_v40, %v2953_v50  ;;  %v2585_v34 = vrot.slane %v7841_v58, 5 }
 0x37b   : > { %v2955_v4 = vrot.slane %v2954_v28, 1 }
 0x37c   : > { %3401 = vperm.xlu1 %4392, %v3310_v37   ;;  %v2931_v37 = vrot.slane %v2930_v31, 1 }
 0x37d   : > { %v2956_v52 = vmax.f32 %v2954_v28, %v2955_v4 }
 0x37e   : > { %v2932_v5 = vmax.f32 %v2930_v31, %v2931_v37  ;;  %v2948_v31 = vmax.f32 %v2946_v41, %v2947_v43  ;;  %v4354_v37 = vunpack.i.h.bf16 %v7868_v30  ;;  %v2969_v41 = vrot.slane %v7181_v62, 4 }
 0x37f   : > { %v3603_v63 = vmul.f32 %v2956_v52, %v2580_v55  ;;  %v2617_v55 = vperm.slane %v2585_v34, 0 }
 0x380   : > { %v3599_v6 = vmul.f32 %v2932_v5, %v7864_v17  ;;  %v2949_v35 = vrot.slane %v2948_v31, 1  ;;  %v3314_v5 = vmul.f32 %v4354_v37, %v7081_v22  ;;  %v7870_v17 = vrot.slane %v7831_v39, 6  ;;  %v7221_v54 = vpop.xlane.xlu2 %2778  ;;  %v7872_v37 = vld [vmem:[#allocation66_spill] sm:$0xff] }
 0x381   : > { %v2970_v43 = vmax.f32 %v7181_v62, %v2969_v41  ;;  %v4257_v39 = vunpack.i.h.bf16 %v7865_v48 }
 0x382   : > { %v3676_v2 = vrot.slane %v3599_v6, 5  ;;  %v2950_v9 = vmax.f32 %v2948_v31, %v2949_v35 }
 0x383   : > { %v2971_v24 = vrot.slane %v2970_v43, 2  ;;  %v2681_v35 = vmul.f32 %v4257_v39, %v2617_v55 }
 0x384   : > { %v3677_v46 = vsel %vm3493_vm7, %v3676_v2, %v3675_v29  ;;  %v3602_v6 = vmul.f32 %v2950_v9, %v7870_v17  ;;  %v2791_v22 = vpop.xlane.xlu0 %2790  ;;  %v2975_v2 = vrot.slane %v7114_v45, 4 }
 0x385   : > { %v3679_v47 = vsel %vm3495_vm11, %v3678_v19, %v3677_v46  ;;  %v3321_v59 = vmul.f32 %v4373_v3, %v2791_v22  ;;  %v3684_v46 = vrot.slane %v3603_v63, 1  ;;  %v2972_v36 = vmax.f32 %v2970_v43, %v2971_v24 }
 0x386   : > { %v3681_v51 = vsel %vm3497_vm6, %v3680_v10, %v3679_v47  ;;  %v3682_v29 = vrot.slane %v3602_v6, 2  ;;  %v2976_v7 = vmax.f32 %v7114_v45, %v2975_v2  ;;  %v4369_v10 = vunpack.i.h.bf16 %v7872_v37  ;;  %v7873_v6 = vld [vmem:[#allocation72_spill] sm:$0xff] }
 0x387   : > { %v2973_v50 = vrot.slane %v2972_v36, 1  ;;  %v2713_v48 = vmul.f32 %v2681_v35, %v6976_v60 }
 0x388   : > { %v3683_v26 = vsel %vm3499_vm5, %v3682_v29, %v3681_v51  ;;  %v7234_v18 = vpop.permute.xlu2 %3380  ;;  %v2977_v40 = vrot.slane %v2976_v7, 2 }
 0x389   : > { %v7237_v31 = vsel %vm3501_vm8, %v3684_v46, %v3683_v26  ;;  %v2974_v28 = vmax.f32 %v2972_v36, %v2973_v50  ;;  %v2804_v23 = vsel %vm2716_vm0, %v2713_v48, -inf }
 0x38a   : > { %v2987_v60 = vrot.slane %v2804_v23, 4 }
 0x38b   : > { %v7228_v49 = vpop.xlane.xlu1 %2784  ;;  %v3606_v22 = vmul.f32 %v2974_v28, %v2582_v13 }
 0x38c   : > { %v2988_v46 = vmax.f32 %v2804_v23, %v2987_v60 }
 0x38f   : > { %2796 = vmax.xlane.f32.xlu2 %v7181_v62  ;;  %v4353_v62 = vunpack.i.l.bf16 %v7868_v30  ;;  %v2981_v30 = vrot.slane %v2801_v0, 4 }
 0x391   : > { %v3313_v45 = vmul.f32 %v4353_v62, %v7032_v53  ;;  %v2982_v53 = vmax.f32 %v2801_v0, %v2981_v30  ;;  %v2993_v62 = vrot.slane %v7188_v1, 4 }
 0x393   : > { %v2983_v52 = vrot.slane %v2982_v53, 2  ;;  %v2994_v36 = vmax.f32 %v7188_v1, %v2993_v62  ;;  %v4374_v62 = vunpack.i.h.bf16 %v7871_v33  ;;  %v4378_v33 = vunpack.i.l.bf16 %v7873_v6 }
 0x395   : > { %2808 = vmax.xlane.f32.xlu0 %v7188_v1  ;;  %v2995_v48 = vrot.slane %v2994_v36, 2 }
 0x397   : > { %v3387_v16 = vpop.permute.xlu0 %3386 }
 0x398   : > { %v3465_v41 = vperm.slane %v3387_v16, %v7843_v42  ;;  %v2984_v16 = vmax.f32 %v2982_v53, %v2983_v52  ;;  %v2996_v53 = vmax.f32 %v2994_v36, %v2995_v48 }
 0x39a   : > { %v2985_v55 = vrot.slane %v2984_v16, 1 }
 0x39c   : > { %v2986_v35 = vmax.f32 %v2984_v16, %v2985_v55  ;;  %v4363_v16 = vunpack.i.l.bf16 %v7869_v8  ;;  %v7876_v8 = vld [vmem:[#allocation76_spill] sm:$0xff] }
 0x39f   : > { %v7247_v47 = vpop.permute.xlu0 %3395 }
 0x3a3   : > { %v7244_v19 = vpop.permute.xlu1 %3383 }
 0x3a6   : > { %2802 = vmax.xlane.f32.xlu1 %v2801_v0 }
 0x3a7   : > { %3398 = vperm.xlu2 %4391, %v3309_v32   ;;  %v2978_v32 = vmax.f32 %v2976_v7, %v2977_v40  ;;  %v3688_v7 = vrot.slane %v3606_v22, 6  ;;  %v4309_v40 = vunpack.i.h.bf16 %v7862_v14 }
 0x3a9   : > { %3413 = vperm.xlu0 %4390, %v3314_v5   ;;  %v2979_v9 = vrot.slane %v2978_v32, 1 }
 0x3ab   : > { %v2980_v4 = vmax.f32 %v2978_v32, %v2979_v9  ;;  %v3393_v17 = vpop.permute.xlu1 %3392  ;;  %v3608_v9 = vmul.f32 %v2986_v35, %v2584_v44 }
 0x3ac   : > { %v3467_v3 = vperm.slane %v3393_v17, %v7843_v42  ;;  %v2997_v17 = vrot.slane %v2996_v53, 1 }
 0x3ad   : > { %v3607_v43 = vmul.f32 %v2980_v4, %v2583_v25  ;;  %v3689_v25 = vsel %vm3491_vm12, %v3688_v7, %v7109_v12 }
 0x3af   : > { %v3690_v24 = vrot.slane %v3607_v43, 5 }
 0x3b1   : > { %3425 = vperm.xlu0 %4390, %v3318_v15   ;;  %v4379_v15 = vunpack.i.h.bf16 %v7873_v6  ;;  %v7877_v6 = vld [vmem:[#allocation73_spill] sm:$0xff] }
 0x3b9   : > { %3434 = vperm.xlu0 %4390, %v3321_v59   ;;  %v2587_v59 = vrot.slane %v7841_v58, 7  ;;  %v3317_v58 = vmul.f32 %v4363_v16, %v7221_v54  ;;  %v4388_v54 = vunpack.i.l.bf16 %v7876_v8 }
 0x3bb   : > { %v2619_v39 = vperm.slane %v2587_v59, 0 }
 0x3bd   : > { %v2683_v32 = vmul.f32 %v4309_v40, %v2619_v39 }
 0x3bf   : > { %3410 = vperm.xlu1 %4392, %v3313_v45   ;;  %v2989_v45 = vrot.slane %v2988_v46, 2 }
 0x3c1   : > { %v2788_v5 = vpop.xlane.xlu2 %2787  ;;  %v2990_v50 = vmax.f32 %v2988_v46, %v2989_v45 }
 0x3c2   : > { %v7249_v51 = vmul.f32 %v4369_v10, %v2788_v5  ;;  %v3691_v10 = vsel %vm3493_vm7, %v3690_v24, %v3689_v25  ;;  %v7874_v5 = vld [vmem:[#allocation71_spill] sm:$0xff] }
 0x3c3   : > { %v2715_v30 = vmul.f32 %v2683_v32, %v7874_v5  ;;  %v2991_v14 = vrot.slane %v2990_v50, 1  ;;  %v3462_v32 = vperm.slane %v7214_v38, %v7843_v42  ;;  %v4383_v5 = vunpack.i.l.bf16 %v7877_v6 }
 0x3c5   : > { %v2810_v28 = vsel %vm2716_vm0, %v2715_v30, -inf  ;;  %v2992_v4 = vmax.f32 %v2990_v50, %v2991_v14 }
 0x3c6   : > { %v2999_v12 = vrot.slane %v2810_v28, 4 }
 0x3c7   : > { %v3609_v1 = vmul.f32 %v2992_v4, %v2585_v34 }
 0x3c9   : > { %v3390_v29 = vpop.permute.xlu2 %3389 }
 0x3ca   : > { %v2800_v26 = vpop.xlane.xlu0 %2799  ;;  %v3466_v2 = vperm.slane %v3390_v29, %v7843_v42  ;;  %v2998_v29 = vmax.f32 %v2996_v53, %v2997_v17 }
 0x3cb   : > { %v3324_v0 = vmul.f32 %v4379_v15, %v2800_v26  ;;  %v3000_v15 = vmax.f32 %v2810_v28, %v2999_v12  ;;  %v7875_v26 = vld [vmem:[#allocation47_spill] sm:$0xff] }
 0x3cc   : > { %v3503_v63 = vsel %vm3489_vm2, %v3466_v2, %v3465_v41  ;;  %v3694_v41 = vrot.slane %v3609_v1, 3  ;;  %v3610_v44 = vmul.f32 %v2998_v29, %v2586_v27  ;;  %v3468_v2 = vperm.slane %v7247_v47, %v7843_v42 }
 0x3cd   : > { %v3504_v13 = vsel %vm3491_vm12, %v3467_v3, %v3503_v63  ;;  %3443 = vperm.xlu0 %4390, %v3324_v0   ;;  %v3001_v52 = vrot.slane %v3000_v15, 2  ;;  %v4389_v1 = vunpack.i.h.bf16 %v7876_v8 }
 0x3ce   : > { %v3696_v0 = vrot.slane %v3610_v44, 2  ;;  %v3505_v34 = vsel %vm3493_vm7, %v3468_v2, %v3504_v13  ;;  %v4359_v13 = vunpack.i.h.bf16 %v7850_v11 }
 0x3cf   : > { %v3002_v60 = vmax.f32 %v3000_v15, %v3001_v52 }
 0x3d0   : > { %2805 = vmax.xlane.f32.xlu2 %v2804_v23  ;;  %v3692_v23 = vrot.slane %v3608_v9, 4  ;;  %v3316_v39 = vmul.f32 %v4359_v13, %v7118_v56  ;;  %v3463_v56 = vperm.slane %v7234_v18, %v7843_v42  ;;  %v4384_v9 = vunpack.i.h.bf16 %v7877_v6 }
 0x3d1   : > { %v3003_v63 = vrot.slane %v3002_v60, 1 }
 0x3d2   : > { %v3693_v22 = vsel %vm3495_vm11, %v3692_v23, %v3691_v10 }
 0x3d3   : > { %v3695_v3 = vsel %vm3497_vm6, %v3694_v41, %v3693_v22  ;;  %v3004_v7 = vmax.f32 %v3002_v60, %v3003_v63 }
 0x3d4   : > { %v3697_v43 = vsel %vm3499_vm5, %v3696_v0, %v3695_v3 }
 0x3d5   : > { %v3611_v27 = vmul.f32 %v3004_v7, %v2587_v59 }
 0x3d6   : > { %v2794_v24 = vpop.xlane.xlu1 %2793 }
 0x3d7   : > { %v3698_v47 = vrot.slane %v3611_v27, 1  ;;  %v3322_v40 = vmul.f32 %v4374_v62, %v2794_v24 }
 0x3d9   : > { %v3699_v46 = vsel %vm3501_vm8, %v3698_v47, %v3697_v43 }
 0x3da   : > { %v3713_v2 = vsel %vm2716_vm0, %v3699_v46, 0.0 }
 0x3dd   : > { %v3405_v55 = vpop.permute.xlu0 %3404 }
 0x3de   : > { %v3471_v4 = vperm.slane %v3405_v55, %v7843_v42 }
 0x3e8   : > { %3407 = vperm.xlu2 %4391, %v7875_v26   ;;  %v3704_v26 = vsel %vm2716_vm0, %v7122_v61, 0.0 }
 0x3e9   : > { %2811 = vmax.xlane.f32.xlu1 %v2810_v28 }
 0x3ee   : > { %v3402_v10 = vpop.permute.xlu1 %3401 }
 0x3ef   : > { %v3470_v23 = vperm.slane %v3402_v10, %v7843_v42 }
 0x3f0   : > { %3416 = vperm.xlu2 %4391, %v7079_v57   ;;  %v4368_v57 = vunpack.i.l.bf16 %v7872_v37  ;;  %v3464_v37 = vperm.slane %v7244_v19, %v7843_v42 }
 0x3f2   : > { %v3319_v59 = vmul.f32 %v4368_v57, %v7228_v49  ;;  %v3498_v49 = vsel %vm3497_vm6, %v3462_v32, %v7130_v20 }
 0x3f3   : > { %v3500_v35 = vsel %vm3499_vm5, %v3463_v56, %v3498_v49 }
 0x3f4   : > { %v3502_v50 = vsel %vm3501_vm8, %v3464_v37, %v3500_v35 }
 0x3f5   : > { %v3528_v18 = vsel %vm2716_vm0, %v3502_v50, 0.0 }
 0x3f8   : > { %3422 = vperm.xlu2 %4391, %v3317_v58  }
 0x400   : > { %3437 = vperm.xlu2 %4391, %v3322_v40  }
 0x402   : > { %3419 = vperm.xlu1 %4392, %v3316_v39   ;;  %v2797_v36 = vpop.xlane.xlu2 %2796 }
 0x403   : > { %v3323_v11 = vmul.f32 %v4378_v33, %v2797_v36 }
 0x408   : > { %v2809_v45 = vpop.xlane.xlu0 %2808 }
 0x409   : > { %v3327_v25 = vmul.f32 %v4388_v54, %v2809_v45 }
 0x40a   : > { %3428 = vperm.xlu1 %4392, %v3319_v59   ;;  %v3399_v38 = vpop.permute.xlu2 %3398 }
 0x40b   : > { %3452 = vperm.xlu0 %4390, %v3327_v25   ;;  %v3469_v20 = vperm.slane %v3399_v38, %v7843_v42  ;;  %v3707_v25 = vsel %vm2716_vm0, %v7172_v21, 0.0 }
 0x40d   : > { %v3506_v53 = vsel %vm3495_vm11, %v3469_v20, %v3505_v34 }
 0x40e   : > { %v3507_v12 = vsel %vm3497_vm6, %v3470_v23, %v3506_v53  ;;  %v3710_v53 = vsel %vm2716_vm0, %v7237_v31, 0.0  ;;  %v7878_v23 = vld [vmem:[#allocation17_spill] sm:$0xff] }
 0x40f   : > { %v3508_v17 = vsel %vm3499_vm5, %v3471_v4, %v3507_v12  ;;  %v3017_v4 = vmax.f32 %v7878_v23, 1.0  ;;  %v7879_v12 = vld [vmem:[#allocation23_spill] sm:$0xff] }
 0x411   : > { %4649 = vrcp.f32 %v3017_v4 }
 0x412   : > { %3440 = vperm.xlu1 %4392, %v3323_v11  }
 0x419   : > { %v2803_v30 = vpop.xlane.xlu1 %2802 }
 0x41a   : > { %v3325_v48 = vmul.f32 %v4383_v5, %v2803_v30 }
 0x41b   : > { %v3414_v34 = vpop.permute.xlu0 %3413 }
 0x41c   : > { %3446 = vperm.xlu1 %4392, %v3325_v48   ;;  %v3474_v7 = vperm.slane %v3414_v34, %v7843_v42 }
 0x423   : > { %v3426_v24 = vpop.permute.xlu0 %3425 }
 0x424   : > { %v3478_v39 = vperm.slane %v3426_v24, %v7843_v42  ;;  %v7881_v24 = vld [vmem:[#allocation21_spill] sm:$0xff] }
 0x42b   : > { %v3435_v36 = vpop.permute.xlu0 %3434 }
 0x42c   : > { %v3481_v32 = vperm.slane %v3435_v36, %v7843_v42 }
 0x431   : > { %v3411_v28 = vpop.permute.xlu1 %3410 }
 0x432   : > { %v3473_v43 = vperm.slane %v3411_v28, %v7843_v42 }
 0x434   : > { %v3510_v61 = vsel %vm3489_vm2, %v3474_v7, %v3473_v43 }
 0x435   : > { %3529 = vadd.xlane.f32.xlu0 %v3528_v18 }
 0x43f   : > { %v3444_v11 = vpop.permute.xlu0 %3443 }
 0x440   : > { %v3484_v6 = vperm.slane %v3444_v11, %v7843_v42 }
 0x443   : > { %v2806_v19 = vpop.xlane.xlu2 %2805 }
 0x444   : > { %v3326_v14 = vmul.f32 %v4384_v9, %v2806_v19 }
 0x446   : > { %3449 = vperm.xlu2 %4391, %v3326_v14  }
 0x44b   : > { %v3408_v29 = vpop.permute.xlu2 %3407 }
 0x44e   : > { %3431 = vperm.xlu2 %4391, %v7249_v51   ;;  %v3472_v51 = vperm.slane %v3408_v29, %v7843_v42 }
 0x450   : > { %v3509_v41 = vsel %vm3501_vm8, %v3472_v51, %v3508_v17  ;;  %v3033_v17 = vmax.f32 %v7879_v12, 1.0 }
 0x451   : > { %v3531_v52 = vsel %vm2716_vm0, %v3509_v41, 0.0 }
 0x452   : > { %4651 = vrcp.f32 %v3033_v17 }
 0x453   : > { %v3417_v44 = vpop.permute.xlu2 %3416 }
 0x454   : > { %v3475_v63 = vperm.slane %v3417_v44, %v7843_v42 }
 0x456   : > { %v3511_v27 = vsel %vm3491_vm12, %v3475_v63, %v3510_v61 }
 0x45b   : > { %v3423_v60 = vpop.permute.xlu2 %3422 }
 0x45c   : > { %v2812_v15 = vpop.xlane.xlu1 %2811  ;;  %v3477_v62 = vperm.slane %v3423_v60, %v7843_v42 }
 0x45d   : > { %v3328_v22 = vmul.f32 %v4389_v1, %v2812_v15 }
 0x45f   : > { %3455 = vperm.xlu1 %4392, %v3328_v22   ;;  %v4650_v22 = vpop.eup %4649 }
 0x460   : > { %v4652_v29 = vpop.eup %4651 }
 0x463   : > { %v3438_v3 = vpop.permute.xlu2 %3437 }
 0x464   : > { %v3482_v56 = vperm.slane %v3438_v3, %v7843_v42 }
 0x466   : > { %v3517_v49 = vsel %vm3489_vm2, %v3482_v56, %v3481_v32  ;;  %vm3773_vm2 = vcmp.eq.s32.totalorder %v7843_v42, 1 }
 0x474   : > { %v3420_v0 = vpop.permute.xlu1 %3419 }
 0x475   : > { %v3476_v16 = vperm.slane %v3420_v0, %v7843_v42 }
 0x477   : > { %3532 = vadd.xlane.f32.xlu2 %v3531_v52  ;;  %v3512_v47 = vsel %vm3493_vm7, %v3476_v16, %v3511_v27 }
 0x478   : > { %v3513_v13 = vsel %vm3495_vm11, %v3477_v62, %v3512_v47  ;;  %v7880_v47 = vld [vmem:[#allocation20_spill] sm:$0xff]  ;;  %v3034_v62 = vmax.f32 %v7881_v24, 1.0 }
 0x479   : > { %v3514_v8 = vsel %vm3497_vm6, %v3478_v39, %v3513_v13 }
 0x47c   : > { %v3429_v46 = vpop.permute.xlu1 %3428 }
 0x47d   : > { %v3479_v40 = vperm.slane %v3429_v46, %v7843_v42  ;;  %v3453_v5 = vpop.permute.xlu0 %3452  ;;  %v3018_v46 = vmax.f32 %v7880_v47, 1.0 }
 0x47e   : > { %v3487_v38 = vperm.slane %v3453_v5, %v7843_v42 }
 0x47f   : > { %3705 = vadd.xlane.f32.xlu2 %v3704_v26  ;;  %v3515_v54 = vsel %vm3499_vm5, %v3479_v40, %v3514_v8 }
 0x484   : > { %v3441_v33 = vpop.permute.xlu1 %3440 }
 0x485   : > { %v3483_v10 = vperm.slane %v3441_v33, %v7843_v42 }
 0x487   : > { %3714 = vadd.xlane.f32.xlu2 %v3713_v2  ;;  %v3518_v35 = vsel %vm3491_vm12, %v3483_v10, %v3517_v49 }
 0x488   : > { %v3519_v30 = vsel %vm3493_vm7, %v3484_v6, %v3518_v35  ;;  %v7882_v6 = vld [vmem:[#allocation19_spill] sm:$0xff] }
 0x48e   : > { %v3447_v37 = vpop.permute.xlu1 %3446 }
 0x48f   : > { %v3485_v50 = vperm.slane %v3447_v37, %v7843_v42 }
 0x491   : > { %v3520_v48 = vsel %vm3495_vm11, %v3485_v50, %v3519_v30  ;;  %v7883_v30 = vld [vmem:[#allocation29_spill] sm:$0xff] }
 0x4a0   : > { %v3450_v58 = vpop.permute.xlu2 %3449 }
 0x4a1   : > { %v3486_v21 = vperm.slane %v3450_v58, %v7843_v42 }
 0x4a3   : > { %v3521_v18 = vsel %vm3497_vm6, %v3486_v21, %v3520_v48  ;;  %v3020_v21 = vmax.f32 %v7882_v6, 1.0  ;;  %v3036_v48 = vmax.f32 %v7883_v30, 1.0 }
 0x4a4   : > { %v3522_v14 = vsel %vm3499_vm5, %v3487_v38, %v3521_v18  ;;  %v7884_v18 = vld [vmem:[#allocation18_spill] sm:$0xff] }
 0x4a5   : > { %v3019_v38 = vmax.f32 %v7884_v18, 1.0 }
 0x4a8   : > { %v3432_v55 = vpop.permute.xlu2 %3431  ;;  %v3530_v15 = vpop.xlane.xlu0 %3529 }
 0x4a9   : > { %v3480_v57 = vperm.slane %v3432_v55, %v7843_v42  ;;  %v3544_v41 = vmul.f32 %v4650_v22, %v3530_v15 }
 0x4ab   : > { %v3516_v59 = vsel %vm3501_vm8, %v3480_v57, %v3515_v54  ;;  %v3724_v2 = vmul.f32 2.0, %v3544_v41  ;;  %v4085_v34 = vadd.f32 -0.85, %v3544_v41 }
 0x4ac   : > { %v3534_v45 = vsel %vm2716_vm0, %v3516_v59, 0.0 }
 0x4ad   : > { %3535 = vadd.xlane.f32.xlu1 %v3534_v45  ;;  %v3752_v16 = vmul.f32 6.6666665, %v4085_v34 }
 0x4b5   : > { %3708 = vadd.xlane.f32.xlu1 %v3707_v25 }
 0x4d1   : > { %v3456_v9 = vpop.permute.xlu1 %3455 }
 0x4d2   : > { %v3488_v19 = vperm.slane %v3456_v9, %v7843_v42  ;;  %v7885_v9 = vld [vmem:[#allocation22_spill] sm:$0xff] }
 0x4d4   : > { %v3523_v20 = vsel %vm3501_vm8, %v3488_v19, %v3522_v14  ;;  %v3035_v19 = vmax.f32 %v7885_v9, 1.0 }
 0x4d5   : > { %v3537_v28 = vsel %vm2716_vm0, %v3523_v20, 0.0  ;;  %vm3774_vm0 = vcmp.eq.s32.totalorder %v7843_v42, 2 }
 0x4d6   : > { %3538 = vadd.xlane.f32.xlu0 %v3537_v28 }
 0x4de   : > { %3711 = vadd.xlane.f32.xlu0 %v3710_v53 }
 0x4ea   : > { %v3533_v1 = vpop.xlane.xlu2 %3532 }
 0x4f2   : > { %v3706_v51 = vpop.xlane.xlu2 %3705 }
 0x4f3   : > { %v3720_v52 = vmul.f32 %v4652_v29, %v3706_v51 }
 0x4f5   : > { %v3732_v26 = vadd.f32 %v3720_v52, %v3544_v41  ;;  %v3728_v31 = vmul.f32 %v3724_v2, %v3720_v52  ;;  %v4089_v0 = vadd.f32 -0.85, %v3720_v52 }
 0x4f7   : > { %v3736_v44 = vadd.f32 1e-08, %v3732_v26  ;;  %v3760_v7 = vmul.f32 6.6666665, %v4089_v0 }
 0x4f9   : > { %4653 = vrcp.f32 %v3736_v44 }
 0x4fa   : > { %4655 = vrcp.f32 %v3018_v46  ;;  %v3715_v14 = vpop.xlane.xlu2 %3714 }
 0x4fb   : > { %4657 = vrcp.f32 %v3034_v62 }
 0x4ff   : > { %v4654_v60 = vpop.eup %4653 }
 0x500   : > { %v3744_v3 = vmul.f32 %v4654_v60, %v3728_v31  ;;  %v4656_v40 = vpop.eup %4655 }
 0x501   : > { %v4658_v39 = vpop.eup %4657  ;;  %v3545_v57 = vmul.f32 %v4656_v40, %v3533_v1 }
 0x502   : > { %v4093_v43 = vadd.f32 -0.85, %v3744_v3 }
 0x503   : > { %v3725_v45 = vmul.f32 2.0, %v3545_v57  ;;  %v4086_v56 = vadd.f32 -0.85, %v3545_v57 }
 0x504   : > { %v3768_v63 = vmul.f32 6.6666665, %v4093_v43 }
 0x505   : > { %v3753_v49 = vmul.f32 6.6666665, %v4086_v56 }
 0x506   : > { %v3775_v58 = vsel %vm3774_vm0, %v3768_v63, 0.0 }
 0x507   : > { %v3779_v61 = vsel %vm3773_vm2, %v3760_v7, %v3775_v58 }
 0x508   : > { %v3783_v27 = vsel %vm3772_vm9, %v3752_v16, %v3779_v61 }
 0x509   : > { %3787 = vst [vmem:[%s7371_s26] sm:$0xff] %v3783_v27 }
 0x520   : > { %v3536_v13 = vpop.xlane.xlu1 %3535 }
 0x528   : > { %v3709_v55 = vpop.xlane.xlu1 %3708 }
 0x529   : > { %v3721_v8 = vmul.f32 %v4658_v39, %v3709_v55 }
 0x52b   : > { %v3733_v54 = vadd.f32 %v3721_v8, %v3545_v57  ;;  %v3729_v25 = vmul.f32 %v3725_v45, %v3721_v8  ;;  %v4090_v11 = vadd.f32 -0.85, %v3721_v8 }
 0x52d   : > { %v3737_v59 = vadd.f32 1e-08, %v3733_v54  ;;  %v3761_v37 = vmul.f32 6.6666665, %v4090_v11 }
 0x52f   : > { %4659 = vrcp.f32 %v3737_v59 }
 0x530   : > { %4661 = vrcp.f32 %v3020_v21 }
 0x531   : > { %4663 = vrcp.f32 %v3036_v48 }
 0x532   : > { %4665 = vrcp.f32 %v3019_v38 }
 0x533   : > { %4667 = vrcp.f32 %v3035_v19 }
 0x535   : > { %v4660_v36 = vpop.eup %4659 }
 0x536   : > { %v3745_v33 = vmul.f32 %v4660_v36, %v3729_v25  ;;  %v4662_v20 = vpop.eup %4661 }
 0x537   : > { %v4664_v28 = vpop.eup %4663 }
 0x538   : > { %v4094_v10 = vadd.f32 -0.85, %v3745_v33  ;;  %v3723_v23 = vmul.f32 %v4664_v28, %v3715_v14  ;;  %v4666_v1 = vpop.eup %4665 }
 0x539   : > { %v4668_v15 = vpop.eup %4667  ;;  %v3546_v51 = vmul.f32 %v4666_v1, %v3536_v13 }
 0x53a   : > { %v3769_v32 = vmul.f32 6.6666665, %v4094_v10  ;;  %v4092_v60 = vadd.f32 -0.85, %v3723_v23 }
 0x53b   : > { %v3726_v34 = vmul.f32 2.0, %v3546_v51  ;;  %v4087_v62 = vadd.f32 -0.85, %v3546_v51 }
 0x53c   : > { %v3776_v35 = vsel %vm3774_vm0, %v3769_v32, 0.0  ;;  %v3763_v63 = vmul.f32 6.6666665, %v4092_v60 }
 0x53d   : > { %v3780_v50 = vsel %vm3773_vm2, %v3761_v37, %v3776_v35  ;;  %v3754_v55 = vmul.f32 6.6666665, %v4087_v62 }
 0x53e   : > { %v3784_v5 = vsel %vm3772_vm9, %v3753_v49, %v3780_v50 }
 0x53f   : > { %3788 = vst [vmem:[%s7371_s26 + $0x8] sm:$0xff] %v3784_v5 }
 0x549   : > { %v3539_v53 = vpop.xlane.xlu0 %3538 }
 0x54a   : > { %v3547_v4 = vmul.f32 %v4662_v20, %v3539_v53 }
 0x54c   : > { %v3735_v12 = vadd.f32 %v3723_v23, %v3547_v4  ;;  %v3727_v22 = vmul.f32 2.0, %v3547_v4  ;;  %v4088_v3 = vadd.f32 -0.85, %v3547_v4 }
 0x54e   : > { %v3739_v17 = vadd.f32 1e-08, %v3735_v12  ;;  %v3731_v26 = vmul.f32 %v3727_v22, %v3723_v23  ;;  %v3755_v7 = vmul.f32 6.6666665, %v4088_v3 }
 0x550   : > { %4669 = vrcp.f32 %v3739_v17 }
 0x551   : > { %v3712_v29 = vpop.xlane.xlu0 %3711 }
 0x552   : > { %v3722_v41 = vmul.f32 %v4668_v15, %v3712_v29 }
 0x554   : > { %v3734_v52 = vadd.f32 %v3722_v41, %v3546_v51  ;;  %v3730_v58 = vmul.f32 %v3726_v34, %v3722_v41  ;;  %v4091_v24 = vadd.f32 -0.85, %v3722_v41 }
 0x556   : > { %v4670_v44 = vpop.eup %4669  ;;  %v3738_v2 = vadd.f32 1e-08, %v3734_v52  ;;  %v3762_v39 = vmul.f32 6.6666665, %v4091_v24 }
 0x557   : > { %v3747_v31 = vmul.f32 %v4670_v44, %v3731_v26 }
 0x558   : > { %4671 = vrcp.f32 %v3738_v2 }
 0x559   : > { %v4096_v0 = vadd.f32 -0.85, %v3747_v31 }
 0x55b   : > { %v3771_v43 = vmul.f32 6.6666665, %v4096_v0 }
 0x55d   : > { %v3778_v16 = vsel %vm3774_vm0, %v3771_v43, 0.0 }
 0x55e   : > { %v4672_v61 = vpop.eup %4671  ;;  %v3782_v27 = vsel %vm3773_vm2, %v3763_v63, %v3778_v16 }
 0x55f   : > { %v3786_v47 = vsel %vm3772_vm9, %v3755_v7, %v3782_v27  ;;  %v3746_v46 = vmul.f32 %v4672_v61, %v3730_v58 }
 0x560   : > { %3790 = vst [vmem:[%s7371_s26 + $0x18] sm:$0xff] %v3786_v47 }
 0x561   : > { %v4095_v13 = vadd.f32 -0.85, %v3746_v46 }
 0x563   : > { %v3770_v40 = vmul.f32 6.6666665, %v4095_v13 }
 0x565   : > { %v3777_v57 = vsel %vm3774_vm0, %v3770_v40, 0.0 }
 0x566   : > { %v3781_v8 = vsel %vm3773_vm2, %v3762_v39, %v3777_v57 }
 0x567   : > { %v3785_v54 = vsel %vm3772_vm9, %v3754_v55, %v3781_v8 }
 0x568   : > { %3789 = vst [vmem:[%s7371_s26 + $0x10] sm:$0xff] %v3785_v54 }
 0x569   : > { %4700 = shalt.err (!%p4697_p7)
}
 0x56a   : > { %s4749_s11 = smov 128   ;;  %s4750_s6 = smov 8  }
 0x56b   : > { %4178 = dma.vmem_to_hbm [thread:$0]  (%p4819_p9), %s3805_s16, 512, %s3807_s30, %s3792_s4, %s4749_s11, %s4749_s11, %s4750_s6  }
 0x56c PF: > { %s3821_s22 = sand.u32 1, %s4727_s12   ;;  %p4181_p8 = pnand %p3900_p11, %p4823_p10 }
 0x56d   : > { %s3822_s19 = scalar_lea.sflag [#allocation5], %s3821_s22 }
 0x56e   : > { %p4182_p12 = pneg %p4181_p8 }
 0x570   : > { %4722 = dma.done.wait (%p4182_p12), %s3822_s19, 512  }
 0x571   : > { %4724 = vsyncadd (%p4182_p12), %s3822_s19, 4294966784  ;;  %p16_p13 = scmp.ge.s32.totalorder %s4796_s18, 4   ;;  %s7886_s12 = smov %s4731_s13 }
 0x572   : > { %s7887_s13 = smov %s4735_s14  ;;  %s7888_s14 = smov %s4808_s21 }
 0x573   : > { %s7889_s15 = smov %s4796_s18  ;;  %18 = sbr.rel (!%p16_p13) target bundleno = 5 (0x5), region = 129 }
 0x578   :  { %3828 = vsyncpa [#allocation4], 1 }
 0x579   :  { %3830 = vsyncpa [#allocation4 + $0x1], 1 }
 0x57a   :  { %3831 = vsyncpa [#allocation5], 1 }
 0x57b   :  { %3833 = vsyncpa [#allocation5 + $0x1], 1 }

</bundles_post_ra>
